<compile_context>
chip_gen: v5e
topology: v5e:2x2
jax: 0.10.0
libtpu: 0.0.40
codegen_flags: <defaults>
</compile_context>

<pallas_src>
import functools
import math

import numpy as np
import jax
import jax.numpy as jnp
from jax.experimental import pallas as pl
from jax.experimental.pallas import tpu as pltpu

EMB_SIZE = 32
NHEAD = 4
DH = EMB_SIZE // NHEAD
TGT_VOCAB = 40
V_PAD = 128                      # vocab lanes padded 40 -> 128 (lane-dense logits)
DIM_FF = 64
NUM_DEC_LAYERS = 2
PAD_IDX = 0
NEG = -1e30                      # finite stand-in for float('-inf') additive masks
SCALE = 1.0 / math.sqrt(DH)

# ---------------- packed-slab row layout (shared by wrapper & kernel) ----------------
# bf16 decoder weight slab: per-layer row offsets
DECW_SA_IN, DECW_SA_OUT, DECW_CA_IN, DECW_CA_OUT, DECW_L1, DECW_L2 = 0, 32, 64, 96, 128, 160
DECW_ROWS = 224                  # rows per decoder layer in the slab
# f32 vector slab rows (biases / layernorm params / generator bias)
VEC_B1, VEC_B2, VEC_GENB, VEC_LAYER0, VEC_PER_LAYER = 0, 1, 2, 3, 12
(VO_SA_INB, VO_SA_OUTB, VO_CA_INB, VO_CA_OUTB, VO_L1B, VO_L2B,
 VO_N1W, VO_N1B, VO_N2W, VO_N2B, VO_N3W, VO_N3B) = range(12)
VEC_ROWS = 32


# ------------------------------ the fused kernel -----------------------------

def _fused_forward_kernel(
    p1_ref,        # (B*H1*W1, K1p) f32 : conv1 im2col patches (K padded to 32)
    convw_ref,     # (K1p + 9E, E) bf16 : rows[0:K1p]=w1, rows[K1p+32k : ...]=conv2 tap k
    g_ref,         # (9*S, H1*W1) bf16  : batch-independent conv2 im2col gather (0/1)
    emb_ref,       # (S + B*T, E) f32   : rows[0:S]=pe_src, rows[S:]=tok_emb*sqrt(E)+pe
    padbias_ref,   # (H*B, 1, T) f32    : NEG where trg_inp == PAD (z = h*B + b)
    labels_ref,    # (B*T, 1) int32     : trg_true (flat)
    decw_ref,      # (L*224, 128) bf16  : packed decoder weight slab
    vecs_ref,      # (32, 128) f32      : packed biases / norm params / gen_b(NEG-padded)
    genw_ref,      # (E, V_PAD) bf16    : generator weight, padded cols are zero
    logits_ref,    # (B*T, V_PAD) f32 out
    loss_ref,      # (1, 1) f32 out
    *, B, T, S):
  E, H, L = EMB_SIZE, NHEAD, NUM_DEC_LAYERS
  f32, bf16 = jnp.float32, jnp.bfloat16
  HW1 = g_ref.shape[1]
  k1p = p1_ref.shape[1]

  def mm(act, w_bf16):
    # activation (f32 VPU math) x pre-cast bf16 weight -> f32 accumulate on the MXU
    return jnp.dot(act.astype(bf16), w_bf16, preferred_element_type=f32)

  def vrow(r, w):
    return vecs_ref[r:r + 1, 0:w]                      # (1, w) f32

  def layer_norm(x, wrow, brow):
    mu = jnp.mean(x, axis=-1, keepdims=True)
    var = jnp.mean(jnp.square(x - mu), axis=-1, keepdims=True)
    return (x - mu) * jax.lax.rsqrt(var + 1e-5) * wrow + brow

  def softmax_last(s):
    s = s - jnp.max(s, axis=-1, keepdims=True)
    p = jnp.exp(s)
    return p * pl.reciprocal(jnp.sum(p, axis=-1, keepdims=True), approx=True)

  def split_heads(x2d, rows, col_off):
    # x2d: (B*rows, >= col_off + E) f32 -> (H*B, rows, DH) with z = h*B + b
    parts = []
    for h in range(H):
      c0 = col_off + h * DH
      for b in range(B):
        parts.append(x2d[b * rows:(b + 1) * rows, c0:c0 + DH])
    return jnp.stack(parts, axis=0)

  def attention(q3, k3, v3, bias3):
    # batched over z = h*B + b  (single 3-D einsum instead of per-(b,h) matmuls)
    s3 = jnp.einsum('zqd,zkd->zqk', q3.astype(bf16), k3.astype(bf16),
                    preferred_element_type=f32) * SCALE
    if bias3 is not None:
      s3 = s3 + bias3
    p3 = softmax_last(s3)
    return jnp.einsum('zqk,zkd->zqd', p3.astype(bf16), v3.astype(bf16),
                      preferred_element_type=f32)       # (H*B, Tq, DH)

  def merge_heads(o3, w_row0, bias_row):
    # o3: (H*B, T, DH) -> output projection, (B*T, E); per-head accumulating matmuls
    out = vrow(bias_row, E)
    for h in range(H):
      o_h = jnp.concatenate([o3[h * B + b] for b in range(B)], axis=0)   # (B*T, DH)
      w_h = decw_ref[w_row0 + h * DH:w_row0 + (h + 1) * DH, 0:E]         # (DH, E) bf16
      out = out + mm(o_h, w_h)
    return out

  # ---------------- CNN encoder: conv1 + conv2 (3x3, stride 2, pad 1), ReLU fused ----
  y1 = jnp.maximum(mm(p1_ref[...], convw_ref[0:k1p, :]) + vrow(VEC_B1, E), 0.0)  # (B*HW1, E)
  g = g_ref[...]                                        # (9S, HW1) bf16 constant
  pe_src = emb_ref[0:S, :]                              # (S, E) positional encoding
  b2 = vrow(VEC_B2, E)
  mems = []
  for b in range(B):
    y1b = y1[b * HW1:(b + 1) * HW1, :]
    taps = jnp.dot(g, y1b.astype(bf16), preferred_element_type=f32)       # (9S, E)
    acc = b2
    for k in range(9):
      w2k = convw_ref[k1p + k * E:k1p + (k + 1) * E, :]                   # (E, E) bf16
      acc = acc + mm(taps[k * S:(k + 1) * S, :], w2k)
    mems.append(jnp.maximum(acc, 0.0) + pe_src)         # conv2+ReLU, then src_emb (+pe)
  mem = jnp.concatenate(mems, axis=0)                   # (B*S, E)

  # ---------------- self-attention mask: in-kernel causal iota + key-padding bias ----
  rowq = jax.lax.broadcasted_iota(jnp.int32, (H * B, T, T), 1)
  colk = jax.lax.broadcasted_iota(jnp.int32, (H * B, T, T), 2)
  self_bias = jnp.where(colk <= rowq, 0.0, NEG) + padbias_ref[...]        # (HB, T, T)

  # ---------------- pre-norm transformer decoder (layers unrolled) -------------------
  x = emb_ref[S:S + B * T, :]                           # (B*T, E) target embeddings
  for l in range(L):
    dro = l * DECW_ROWS
    vro = VEC_LAYER0 + l * VEC_PER_LAYER

    # self-attention (fused QKV projection)
    h_ln = layer_norm(x, vrow(vro + VO_N1W, E), vrow(vro + VO_N1B, E))
    sa_in_w = decw_ref[dro + DECW_SA_IN:dro + DECW_SA_IN + E, 0:3 * E]
    qkv = mm(h_ln, sa_in_w) + vrow(vro + VO_SA_INB, 3 * E)                # (B*T, 3E)
    o3 = attention(split_heads(qkv, T, 0),
                   split_heads(qkv, T, E),
                   split_heads(qkv, T, 2 * E), self_bias)
    x = x + merge_heads(o3, dro + DECW_SA_OUT, vro + VO_SA_OUTB)

    # cross-attention over CNN memory (no memory mask)
    h_ln = layer_norm(x, vrow(vro + VO_N2W, E), vrow(vro + VO_N2B, E))
    ca_in_w = decw_ref[dro + DECW_CA_IN:dro + DECW_CA_IN + E, 0:3 * E]
    ca_in_b = vrow(vro + VO_CA_INB, 3 * E)
    q = mm(h_ln, ca_in_w[:, 0:E]) + ca_in_b[:, 0:E]                       # (B*T, E)
    kv = mm(mem, ca_in_w[:, E:3 * E]) + ca_in_b[:, E:3 * E]               # (B*S, 2E)
    o3 = attention(split_heads(q, T, 0),
                   split_heads(kv, S, 0),
                   split_heads(kv, S, E), None)
    x = x + merge_heads(o3, dro + DECW_CA_OUT, vro + VO_CA_OUTB)

    # feed-forward
    h_ln = layer_norm(x, vrow(vro + VO_N3W, E), vrow(vro + VO_N3B, E))
    l1w = decw_ref[dro + DECW_L1:dro + DECW_L1 + E, 0:DIM_FF]
    l2w = decw_ref[dro + DECW_L2:dro + DECW_L2 + DIM_FF, 0:E]
    ff = jnp.maximum(mm(h_ln, l1w) + vrow(vro + VO_L1B, DIM_FF), 0.0)
    x = x + mm(ff, l2w) + vrow(vro + VO_L2B, E)

  # ---------------- generator (vocab padded to 128 lanes) + masked CE loss -----------
  logits = mm(x, genw_ref[...]) + vrow(VEC_GENB, V_PAD)   # padded cols -> NEG via gen_b
  logits_ref[...] = logits                                # lane-dense (B*T, 128) store

  m = jnp.max(logits, axis=-1, keepdims=True)
  lse = m + jnp.log(jnp.sum(jnp.exp(logits - m), axis=-1, keepdims=True))
  lab = labels_ref[...]                                   # (B*T, 1) int32
  cols = jax.lax.broadcasted_iota(jnp.int32, (B * T, V_PAD), 1)
  true_logit = jnp.sum(jnp.where(cols == lab, logits, 0.0), axis=-1, keepdims=True)
  nonpad = (lab != PAD_IDX).astype(f32)                   # (B*T, 1)
  nll = (lse - true_logit) * nonpad
  tot = jnp.sum(nll, axis=0, keepdims=True)               # (1, 1)
  cnt = jnp.maximum(jnp.sum(nonpad, axis=0, keepdims=True), 1.0)
  loss_ref[...] = tot / cnt


# ------------------------------ wrapper-side prep ----------------------------

def _sinusoidal_pe_np(length, emb):
  pos = np.arange(length, dtype=np.float32)[:, None]
  den = np.exp(-np.arange(0, emb, 2, dtype=np.float32) * (math.log(10000.0) / emb))
  pe = np.zeros((length, emb), np.float32)
  pe[:, 0::2] = np.sin(pos * den)
  pe[:, 1::2] = np.cos(pos * den)
  return pe


def _conv2_gather_np(h1, w1, h2, w2, kh=3, kw=3, stride=2, pad=1):
  """Batch-independent 0/1 selection: rows (tap k, out pos p) -> conv1 feature index."""
  s = h2 * w2
  g = np.zeros((kh * kw * s, h1 * w1), np.float32)
  for oh in range(h2):
    for ow in range(w2):
      p = oh * w2 + ow
      for ki in range(kh):
        for kj in range(kw):
          ih, iw = oh * stride + ki - pad, ow * stride + kj - pad
          if 0 <= ih < h1 and 0 <= iw < w1:
            g[(ki * kw + kj) * s + p, ih * w1 + iw] = 1.0
  return g


def _im2col(x_nhwc, kh, kw, stride, pad):
  b, h, w, c = x_nhwc.shape
  xp = jnp.pad(x_nhwc, ((0, 0), (pad, pad), (pad, pad), (0, 0)))
  ho = (h + 2 * pad - kh) // stride + 1
  wo = (w + 2 * pad - kw) // stride + 1
  cols = []
  for i in range(kh):
    for j in range(kw):
      cols.append(xp[:, i:i + stride * ho:stride, j:j + stride * wo:stride, :])
  return jnp.concatenate(cols, axis=-1).reshape(b * ho * wo, kh * kw * c), ho, wo


def prepare_params(params):
  """One-time weight re-layout: transposes, packing into slabs, bf16 pre-cast."""
  E, F = EMB_SIZE, DIM_FF
  bf16 = jnp.bfloat16

  def pad2(a, rows, cols):
    return jnp.pad(a, ((0, rows - a.shape[0]), (0, cols - a.shape[1])))

  # conv weights in im2col layout; conv1 K padded 27 -> 32
  k1, k1p = 3 * 3 * 3, 32
  w1 = jnp.transpose(params['conv1_w'], (2, 3, 1, 0)).reshape(k1, E)
  w1 = jnp.pad(w1, ((0, k1p - k1), (0, 0)))
  w2 = jnp.transpose(params['conv2_w'], (2, 3, 1, 0)).reshape(9 * E, E)
  convw = jnp.concatenate([w1, w2], axis=0).astype(bf16)                  # (320, 32)

  # packed bf16 decoder-weight slab (L*224, 128)
  blocks = []
  for lp in params['layers']:
    rows = [pad2(lp['self_attn']['in_proj_w'].T, E, V_PAD),
            pad2(lp['self_attn']['out_proj_w'].T, E, V_PAD),
            pad2(lp['cross_attn']['in_proj_w'].T, E, V_PAD),
            pad2(lp['cross_attn']['out_proj_w'].T, E, V_PAD),
            pad2(lp['lin1_w'].T, E, V_PAD),
            pad2(lp['lin2_w'].T, F, V_PAD)]
    blocks.append(jnp.concatenate(rows, axis=0))
  decw = jnp.concatenate(blocks, axis=0).astype(bf16)                     # (448, 128)

  # packed f32 vector slab (32, 128): biases, layernorm params, generator bias
  def vec(v):
    v = v.reshape(1, -1)
    return jnp.pad(v, ((0, 0), (0, V_PAD - v.shape[1])))

  gen_b = jnp.full((1, V_PAD), NEG, jnp.float32).at[0, :TGT_VOCAB].set(params['gen_b'])
  rows = [vec(params['conv1_b']), vec(params['conv2_b']), gen_b]
  for lp in params['layers']:
    rows += [vec(lp['self_attn']['in_proj_b']), vec(lp['self_attn']['out_proj_b']),
             vec(lp['cross_attn']['in_proj_b']), vec(lp['cross_attn']['out_proj_b']),
             vec(lp['lin1_b']), vec(lp['lin2_b']),
             vec(lp['norm1_w']), vec(lp['norm1_b']),
             vec(lp['norm2_w']), vec(lp['norm2_b']),
             vec(lp['norm3_w']), vec(lp['norm3_b'])]
  vecs = jnp.concatenate(rows, axis=0)
  vecs = jnp.pad(vecs, ((0, VEC_ROWS - vecs.shape[0]), (0, 0))).astype(jnp.float32)

  genw = pad2(params['gen_w'].T, E, V_PAD).astype(bf16)                   # (32, 128)

  return {'convw': convw, 'decw': decw, 'vecs': vecs, 'genw': genw,
          'tok_emb': params['tok_emb']}


def forward(prep, src, trg):
  E = EMB_SIZE
  B = src.shape[0]

  # conv1 im2col (layout-only wrapper work); K padded 27 -> 32
  x = jnp.transpose(src, (0, 2, 3, 1)).astype(jnp.float32)                # NCHW -> NHWC
  p1, h1, w1o = _im2col(x, 3, 3, 2, 1)
  p1 = jnp.pad(p1, ((0, 0), (0, 32 - p1.shape[1])))

  # conv2 geometry (trace-time constants)
  h2 = (h1 + 2 - 3) // 2 + 1
  w2o = (w1o + 2 - 3) // 2 + 1
  S = h2 * w2o
  g = jnp.asarray(_conv2_gather_np(h1, w1o, h2, w2o), jnp.bfloat16)       # (9S, H1*W1)

  # targets / embeddings / pad bias / labels
  trg_inp, trg_true = trg[:, :-1], trg[:, 1:]
  T = trg_inp.shape[1]
  pe = jnp.asarray(_sinusoidal_pe_np(max(S, T), E))
  tgt_in = (prep['tok_emb'][trg_inp] * math.sqrt(E) + pe[:T][None]).reshape(B * T, E)
  emb = jnp.concatenate([pe[:S], tgt_in], axis=0)                         # (S + B*T, E)
  padbias = jnp.where(trg_inp == PAD_IDX, NEG, 0.0).astype(jnp.float32)   # (B, T)
  padbias = jnp.tile(padbias, (NHEAD, 1)).reshape(NHEAD * B, 1, T)        # z = h*B + b
  labels = trg_true.reshape(B * T, 1).astype(jnp.int32)

  kernel = functools.partial(_fused_forward_kernel, B=B, T=T, S=S)
  vmem = pl.BlockSpec(memory_space=pltpu.MemorySpace.VMEM)
  inputs = [p1, prep['convw'], g, emb, padbias, labels,
            prep['decw'], prep['vecs'], prep['genw']]
  logits_p, loss = pl.pallas_call(
      kernel,
      out_shape=(jax.ShapeDtypeStruct((B * T, V_PAD), jnp.float32),
                 jax.ShapeDtypeStruct((1, 1), jnp.float32)),
      in_specs=[vmem] * len(inputs),
      out_specs=(vmem, vmem),
      compiler_params=pltpu.CompilerParams(vmem_limit_bytes=32 * 1024 * 1024),
  )(*inputs)

  logits = logits_p[:, :TGT_VOCAB].reshape(B, T, TGT_VOCAB)
  return loss[0, 0], logits


# --------------------------- deterministic params ----------------------------

def init_params(key):
  keys = iter(jax.random.split(key, 64))

  def normal(shape, scale=0.02):
    return (scale * jax.random.normal(next(keys), shape)).astype(jnp.float32)

  E, V, F = EMB_SIZE, TGT_VOCAB, DIM_FF
  zeros = lambda *s: jnp.zeros(s, jnp.float32)
  ones = lambda *s: jnp.ones(s, jnp.float32)

  def attn_params():
    return {
        'in_proj_w': normal((3 * E, E)), 'in_proj_b': zeros(3 * E),
        'out_proj_w': normal((E, E)), 'out_proj_b': zeros(E),
    }

  params = {
      'conv1_w': normal((E, 3, 3, 3)), 'conv1_b': zeros(E),
      'conv2_w': normal((E, E, 3, 3)), 'conv2_b': zeros(E),
      'tok_emb': normal((V, E)),
      'gen_w': normal((V, E)), 'gen_b': zeros(V),
      'layers': [],
  }
  for _ in range(NUM_DEC_LAYERS):
    params['layers'].append({
        'self_attn': attn_params(),
        'cross_attn': attn_params(),
        'lin1_w': normal((F, E)), 'lin1_b': zeros(F),
        'lin2_w': normal((E, F)), 'lin2_b': zeros(E),
        'norm1_w': ones(E), 'norm1_b': zeros(E),
        'norm2_w': ones(E), 'norm2_b': zeros(E),
        'norm3_w': ones(E), 'norm3_b': zeros(E),
    })
  return params


if __name__ == "__main__":
  key = jax.random.PRNGKey(0)
  pkey, skey, tkey = jax.random.split(key, 3)
  params = init_params(pkey)
  prep = prepare_params(params)          # one-time weight packing / bf16 pre-cast

  src = jax.random.normal(skey, (2, 3, 16, 16), jnp.float32)              # NCHW images
  trg = jax.random.randint(tkey, (2, 9), 1, TGT_VOCAB).astype(jnp.int32)
  trg = trg.at[:, -2:].set(PAD_IDX)                                       # some padding

  loss, logits = jax.jit(forward)(prep, src, trg)
  jax.block_until_ready((loss, logits))
  assert logits.shape == (2, 8, TGT_VOCAB)
  assert bool(jnp.isfinite(loss))
  print("KERNEL_OK")
</pallas_src>

<mosaic_0001>
module attributes {stable_mosaic.version = 11 : i64} {
  func.func @_fused_forward_kernel(%arg0: memref<128x32xf32, #tpu.memory_space<vmem>>, %arg1: memref<320x32xbf16, #tpu.memory_space<vmem>>, %arg2: memref<144x64xbf16, #tpu.memory_space<vmem>>, %arg3: memref<32x32xf32, #tpu.memory_space<vmem>>, %arg4: memref<8x1x8xf32, #tpu.memory_space<vmem>>, %arg5: memref<16x1xi32, #tpu.memory_space<vmem>>, %arg6: memref<448x128xbf16, #tpu.memory_space<vmem>>, %arg7: memref<32x128xf32, #tpu.memory_space<vmem>>, %arg8: memref<32x128xbf16, #tpu.memory_space<vmem>>, %arg9: memref<16x128xf32, #tpu.memory_space<vmem>>, %arg10: memref<1x1xf32, #tpu.memory_space<vmem>>) attributes {dimension_semantics = [], scalar_prefetch = 0 : i64, scratch_operands = 0 : i64, tpu.core_type = #tpu.core_type<tc>} {
    %c0 = arith.constant 0 : index
    %c0_0 = arith.constant 0 : index
    %0 = vector.load %arg0[%c0, %c0_0] : memref<128x32xf32, #tpu.memory_space<vmem>>, vector<128x32xf32>
    %c0_1 = arith.constant 0 : index
    %c0_2 = arith.constant 0 : index
    %1 = vector.load %arg1[%c0_1, %c0_2] : memref<320x32xbf16, #tpu.memory_space<vmem>>, vector<32x32xbf16>
    %2 = arith.truncf %0 : vector<128x32xf32> to vector<128x32xbf16>
    %cst = arith.constant dense<0.000000e+00> : vector<128x32xf32>
    %3 = tpu.matmul %2, %1, %cst {dimension_numbers = #tpu.dot_dimension_numbers<[1], [0], [0], [1], [0, 0, 1, 1], [], []>} : vector<128x32xbf16>, vector<32x32xbf16>, vector<128x32xf32> -> vector<128x32xf32>
    %c0_3 = arith.constant 0 : index
    %c0_4 = arith.constant 0 : index
    %4 = vector.load %arg7[%c0_3, %c0_4] : memref<32x128xf32, #tpu.memory_space<vmem>>, vector<1x32xf32>
    %5 = vector.broadcast %4 : vector<1x32xf32> to vector<128x32xf32>
    %6 = arith.addf %3, %5 : vector<128x32xf32>
    %cst_5 = arith.constant 0.000000e+00 : f32
    %7 = vector.broadcast %cst_5 : f32 to vector<128x32xf32>
    %8 = arith.maximumf %6, %7 : vector<128x32xf32>
    %c0_6 = arith.constant 0 : index
    %c0_7 = arith.constant 0 : index
    %9 = vector.load %arg2[%c0_6, %c0_7] : memref<144x64xbf16, #tpu.memory_space<vmem>>, vector<144x64xbf16>
    %c0_8 = arith.constant 0 : index
    %c0_9 = arith.constant 0 : index
    %10 = vector.load %arg3[%c0_8, %c0_9] : memref<32x32xf32, #tpu.memory_space<vmem>>, vector<16x32xf32>
    %c1 = arith.constant 1 : index
    %c0_10 = arith.constant 0 : index
    %11 = vector.load %arg7[%c1, %c0_10] : memref<32x128xf32, #tpu.memory_space<vmem>>, vector<1x32xf32>
    %12 = vector.extract_strided_slice %8 {offsets = [0, 0], sizes = [64, 32], strides = [1, 1]} : vector<128x32xf32> to vector<64x32xf32>
    %13 = arith.truncf %12 : vector<64x32xf32> to vector<64x32xbf16>
    %cst_11 = arith.constant dense<0.000000e+00> : vector<144x32xf32>
    %14 = tpu.matmul %9, %13, %cst_11 {dimension_numbers = #tpu.dot_dimension_numbers<[1], [0], [0], [1], [0, 0, 1, 1], [], []>} : vector<144x64xbf16>, vector<64x32xbf16>, vector<144x32xf32> -> vector<144x32xf32>
    %c32 = arith.constant 32 : index
    %c0_12 = arith.constant 0 : index
    %15 = vector.load %arg1[%c32, %c0_12] : memref<320x32xbf16, #tpu.memory_space<vmem>>, vector<32x32xbf16>
    %16 = vector.extract_strided_slice %14 {offsets = [0, 0], sizes = [16, 32], strides = [1, 1]} : vector<144x32xf32> to vector<16x32xf32>
    %17 = arith.truncf %16 : vector<16x32xf32> to vector<16x32xbf16>
    %cst_13 = arith.constant dense<0.000000e+00> : vector<16x32xf32>
    %18 = tpu.matmul %17, %15, %cst_13 {dimension_numbers = #tpu.dot_dimension_numbers<[1], [0], [0], [1], [0, 0, 1, 1], [], []>} : vector<16x32xbf16>, vector<32x32xbf16>, vector<16x32xf32> -> vector<16x32xf32>
    %19 = vector.broadcast %11 : vector<1x32xf32> to vector<16x32xf32>
    %20 = arith.addf %19, %18 : vector<16x32xf32>
    %c64 = arith.constant 64 : index
    %c0_14 = arith.constant 0 : index
    %21 = vector.load %arg1[%c64, %c0_14] : memref<320x32xbf16, #tpu.memory_space<vmem>>, vector<32x32xbf16>
    %22 = vector.extract_strided_slice %14 {offsets = [16, 0], sizes = [16, 32], strides = [1, 1]} : vector<144x32xf32> to vector<16x32xf32>
    %23 = arith.truncf %22 : vector<16x32xf32> to vector<16x32xbf16>
    %cst_15 = arith.constant dense<0.000000e+00> : vector<16x32xf32>
    %24 = tpu.matmul %23, %21, %cst_15 {dimension_numbers = #tpu.dot_dimension_numbers<[1], [0], [0], [1], [0, 0, 1, 1], [], []>} : vector<16x32xbf16>, vector<32x32xbf16>, vector<16x32xf32> -> vector<16x32xf32>
    %25 = arith.addf %20, %24 : vector<16x32xf32>
    %c96 = arith.constant 96 : index
    %c0_16 = arith.constant 0 : index
    %26 = vector.load %arg1[%c96, %c0_16] : memref<320x32xbf16, #tpu.memory_space<vmem>>, vector<32x32xbf16>
    %27 = vector.extract_strided_slice %14 {offsets = [32, 0], sizes = [16, 32], strides = [1, 1]} : vector<144x32xf32> to vector<16x32xf32>
    %28 = arith.truncf %27 : vector<16x32xf32> to vector<16x32xbf16>
    %cst_17 = arith.constant dense<0.000000e+00> : vector<16x32xf32>
    %29 = tpu.matmul %28, %26, %cst_17 {dimension_numbers = #tpu.dot_dimension_numbers<[1], [0], [0], [1], [0, 0, 1, 1], [], []>} : vector<16x32xbf16>, vector<32x32xbf16>, vector<16x32xf32> -> vector<16x32xf32>
    %30 = arith.addf %25, %29 : vector<16x32xf32>
    %c128 = arith.constant 128 : index
    %c0_18 = arith.constant 0 : index
    %31 = vector.load %arg1[%c128, %c0_18] : memref<320x32xbf16, #tpu.memory_space<vmem>>, vector<32x32xbf16>
    %32 = vector.extract_strided_slice %14 {offsets = [48, 0], sizes = [16, 32], strides = [1, 1]} : vector<144x32xf32> to vector<16x32xf32>
    %33 = arith.truncf %32 : vector<16x32xf32> to vector<16x32xbf16>
    %cst_19 = arith.constant dense<0.000000e+00> : vector<16x32xf32>
    %34 = tpu.matmul %33, %31, %cst_19 {dimension_numbers = #tpu.dot_dimension_numbers<[1], [0], [0], [1], [0, 0, 1, 1], [], []>} : vector<16x32xbf16>, vector<32x32xbf16>, vector<16x32xf32> -> vector<16x32xf32>
    %35 = arith.addf %30, %34 : vector<16x32xf32>
    %c160 = arith.constant 160 : index
    %c0_20 = arith.constant 0 : index
    %36 = vector.load %arg1[%c160, %c0_20] : memref<320x32xbf16, #tpu.memory_space<vmem>>, vector<32x32xbf16>
    %37 = vector.extract_strided_slice %14 {offsets = [64, 0], sizes = [16, 32], strides = [1, 1]} : vector<144x32xf32> to vector<16x32xf32>
    %38 = arith.truncf %37 : vector<16x32xf32> to vector<16x32xbf16>
    %cst_21 = arith.constant dense<0.000000e+00> : vector<16x32xf32>
    %39 = tpu.matmul %38, %36, %cst_21 {dimension_numbers = #tpu.dot_dimension_numbers<[1], [0], [0], [1], [0, 0, 1, 1], [], []>} : vector<16x32xbf16>, vector<32x32xbf16>, vector<16x32xf32> -> vector<16x32xf32>
    %40 = arith.addf %35, %39 : vector<16x32xf32>
    %c192 = arith.constant 192 : index
    %c0_22 = arith.constant 0 : index
    %41 = vector.load %arg1[%c192, %c0_22] : memref<320x32xbf16, #tpu.memory_space<vmem>>, vector<32x32xbf16>
    %42 = vector.extract_strided_slice %14 {offsets = [80, 0], sizes = [16, 32], strides = [1, 1]} : vector<144x32xf32> to vector<16x32xf32>
    %43 = arith.truncf %42 : vector<16x32xf32> to vector<16x32xbf16>
    %cst_23 = arith.constant dense<0.000000e+00> : vector<16x32xf32>
    %44 = tpu.matmul %43, %41, %cst_23 {dimension_numbers = #tpu.dot_dimension_numbers<[1], [0], [0], [1], [0, 0, 1, 1], [], []>} : vector<16x32xbf16>, vector<32x32xbf16>, vector<16x32xf32> -> vector<16x32xf32>
    %45 = arith.addf %40, %44 : vector<16x32xf32>
    %c224 = arith.constant 224 : index
    %c0_24 = arith.constant 0 : index
    %46 = vector.load %arg1[%c224, %c0_24] : memref<320x32xbf16, #tpu.memory_space<vmem>>, vector<32x32xbf16>
    %47 = vector.extract_strided_slice %14 {offsets = [96, 0], sizes = [16, 32], strides = [1, 1]} : vector<144x32xf32> to vector<16x32xf32>
    %48 = arith.truncf %47 : vector<16x32xf32> to vector<16x32xbf16>
    %cst_25 = arith.constant dense<0.000000e+00> : vector<16x32xf32>
    %49 = tpu.matmul %48, %46, %cst_25 {dimension_numbers = #tpu.dot_dimension_numbers<[1], [0], [0], [1], [0, 0, 1, 1], [], []>} : vector<16x32xbf16>, vector<32x32xbf16>, vector<16x32xf32> -> vector<16x32xf32>
    %50 = arith.addf %45, %49 : vector<16x32xf32>
    %c256 = arith.constant 256 : index
    %c0_26 = arith.constant 0 : index
    %51 = vector.load %arg1[%c256, %c0_26] : memref<320x32xbf16, #tpu.memory_space<vmem>>, vector<32x32xbf16>
    %52 = vector.extract_strided_slice %14 {offsets = [112, 0], sizes = [16, 32], strides = [1, 1]} : vector<144x32xf32> to vector<16x32xf32>
    %53 = arith.truncf %52 : vector<16x32xf32> to vector<16x32xbf16>
    %cst_27 = arith.constant dense<0.000000e+00> : vector<16x32xf32>
    %54 = tpu.matmul %53, %51, %cst_27 {dimension_numbers = #tpu.dot_dimension_numbers<[1], [0], [0], [1], [0, 0, 1, 1], [], []>} : vector<16x32xbf16>, vector<32x32xbf16>, vector<16x32xf32> -> vector<16x32xf32>
    %55 = arith.addf %50, %54 : vector<16x32xf32>
    %c288 = arith.constant 288 : index
    %c0_28 = arith.constant 0 : index
    %56 = vector.load %arg1[%c288, %c0_28] : memref<320x32xbf16, #tpu.memory_space<vmem>>, vector<32x32xbf16>
    %57 = vector.extract_strided_slice %14 {offsets = [128, 0], sizes = [16, 32], strides = [1, 1]} : vector<144x32xf32> to vector<16x32xf32>
    %58 = arith.truncf %57 : vector<16x32xf32> to vector<16x32xbf16>
    %cst_29 = arith.constant dense<0.000000e+00> : vector<16x32xf32>
    %59 = tpu.matmul %58, %56, %cst_29 {dimension_numbers = #tpu.dot_dimension_numbers<[1], [0], [0], [1], [0, 0, 1, 1], [], []>} : vector<16x32xbf16>, vector<32x32xbf16>, vector<16x32xf32> -> vector<16x32xf32>
    %60 = arith.addf %55, %59 : vector<16x32xf32>
    %cst_30 = arith.constant 0.000000e+00 : f32
    %61 = vector.broadcast %cst_30 : f32 to vector<16x32xf32>
    %62 = arith.maximumf %60, %61 : vector<16x32xf32>
    %63 = arith.addf %62, %10 : vector<16x32xf32>
    %64 = vector.extract_strided_slice %8 {offsets = [64, 0], sizes = [64, 32], strides = [1, 1]} : vector<128x32xf32> to vector<64x32xf32>
    %65 = arith.truncf %64 : vector<64x32xf32> to vector<64x32xbf16>
    %cst_31 = arith.constant dense<0.000000e+00> : vector<144x32xf32>
    %66 = tpu.matmul %9, %65, %cst_31 {dimension_numbers = #tpu.dot_dimension_numbers<[1], [0], [0], [1], [0, 0, 1, 1], [], []>} : vector<144x64xbf16>, vector<64x32xbf16>, vector<144x32xf32> -> vector<144x32xf32>
    %c32_32 = arith.constant 32 : index
    %c0_33 = arith.constant 0 : index
    %67 = vector.load %arg1[%c32_32, %c0_33] : memref<320x32xbf16, #tpu.memory_space<vmem>>, vector<32x32xbf16>
    %68 = vector.extract_strided_slice %66 {offsets = [0, 0], sizes = [16, 32], strides = [1, 1]} : vector<144x32xf32> to vector<16x32xf32>
    %69 = arith.truncf %68 : vector<16x32xf32> to vector<16x32xbf16>
    %cst_34 = arith.constant dense<0.000000e+00> : vector<16x32xf32>
    %70 = tpu.matmul %69, %67, %cst_34 {dimension_numbers = #tpu.dot_dimension_numbers<[1], [0], [0], [1], [0, 0, 1, 1], [], []>} : vector<16x32xbf16>, vector<32x32xbf16>, vector<16x32xf32> -> vector<16x32xf32>
    %71 = vector.broadcast %11 : vector<1x32xf32> to vector<16x32xf32>
    %72 = arith.addf %71, %70 : vector<16x32xf32>
    %c64_35 = arith.constant 64 : index
    %c0_36 = arith.constant 0 : index
    %73 = vector.load %arg1[%c64_35, %c0_36] : memref<320x32xbf16, #tpu.memory_space<vmem>>, vector<32x32xbf16>
    %74 = vector.extract_strided_slice %66 {offsets = [16, 0], sizes = [16, 32], strides = [1, 1]} : vector<144x32xf32> to vector<16x32xf32>
    %75 = arith.truncf %74 : vector<16x32xf32> to vector<16x32xbf16>
    %cst_37 = arith.constant dense<0.000000e+00> : vector<16x32xf32>
    %76 = tpu.matmul %75, %73, %cst_37 {dimension_numbers = #tpu.dot_dimension_numbers<[1], [0], [0], [1], [0, 0, 1, 1], [], []>} : vector<16x32xbf16>, vector<32x32xbf16>, vector<16x32xf32> -> vector<16x32xf32>
    %77 = arith.addf %72, %76 : vector<16x32xf32>
    %c96_38 = arith.constant 96 : index
    %c0_39 = arith.constant 0 : index
    %78 = vector.load %arg1[%c96_38, %c0_39] : memref<320x32xbf16, #tpu.memory_space<vmem>>, vector<32x32xbf16>
    %79 = vector.extract_strided_slice %66 {offsets = [32, 0], sizes = [16, 32], strides = [1, 1]} : vector<144x32xf32> to vector<16x32xf32>
    %80 = arith.truncf %79 : vector<16x32xf32> to vector<16x32xbf16>
    %cst_40 = arith.constant dense<0.000000e+00> : vector<16x32xf32>
    %81 = tpu.matmul %80, %78, %cst_40 {dimension_numbers = #tpu.dot_dimension_numbers<[1], [0], [0], [1], [0, 0, 1, 1], [], []>} : vector<16x32xbf16>, vector<32x32xbf16>, vector<16x32xf32> -> vector<16x32xf32>
    %82 = arith.addf %77, %81 : vector<16x32xf32>
    %c128_41 = arith.constant 128 : index
    %c0_42 = arith.constant 0 : index
    %83 = vector.load %arg1[%c128_41, %c0_42] : memref<320x32xbf16, #tpu.memory_space<vmem>>, vector<32x32xbf16>
    %84 = vector.extract_strided_slice %66 {offsets = [48, 0], sizes = [16, 32], strides = [1, 1]} : vector<144x32xf32> to vector<16x32xf32>
    %85 = arith.truncf %84 : vector<16x32xf32> to vector<16x32xbf16>
    %cst_43 = arith.constant dense<0.000000e+00> : vector<16x32xf32>
    %86 = tpu.matmul %85, %83, %cst_43 {dimension_numbers = #tpu.dot_dimension_numbers<[1], [0], [0], [1], [0, 0, 1, 1], [], []>} : vector<16x32xbf16>, vector<32x32xbf16>, vector<16x32xf32> -> vector<16x32xf32>
    %87 = arith.addf %82, %86 : vector<16x32xf32>
    %c160_44 = arith.constant 160 : index
    %c0_45 = arith.constant 0 : index
    %88 = vector.load %arg1[%c160_44, %c0_45] : memref<320x32xbf16, #tpu.memory_space<vmem>>, vector<32x32xbf16>
    %89 = vector.extract_strided_slice %66 {offsets = [64, 0], sizes = [16, 32], strides = [1, 1]} : vector<144x32xf32> to vector<16x32xf32>
    %90 = arith.truncf %89 : vector<16x32xf32> to vector<16x32xbf16>
    %cst_46 = arith.constant dense<0.000000e+00> : vector<16x32xf32>
    %91 = tpu.matmul %90, %88, %cst_46 {dimension_numbers = #tpu.dot_dimension_numbers<[1], [0], [0], [1], [0, 0, 1, 1], [], []>} : vector<16x32xbf16>, vector<32x32xbf16>, vector<16x32xf32> -> vector<16x32xf32>
    %92 = arith.addf %87, %91 : vector<16x32xf32>
    %c192_47 = arith.constant 192 : index
    %c0_48 = arith.constant 0 : index
    %93 = vector.load %arg1[%c192_47, %c0_48] : memref<320x32xbf16, #tpu.memory_space<vmem>>, vector<32x32xbf16>
    %94 = vector.extract_strided_slice %66 {offsets = [80, 0], sizes = [16, 32], strides = [1, 1]} : vector<144x32xf32> to vector<16x32xf32>
    %95 = arith.truncf %94 : vector<16x32xf32> to vector<16x32xbf16>
    %cst_49 = arith.constant dense<0.000000e+00> : vector<16x32xf32>
    %96 = tpu.matmul %95, %93, %cst_49 {dimension_numbers = #tpu.dot_dimension_numbers<[1], [0], [0], [1], [0, 0, 1, 1], [], []>} : vector<16x32xbf16>, vector<32x32xbf16>, vector<16x32xf32> -> vector<16x32xf32>
    %97 = arith.addf %92, %96 : vector<16x32xf32>
    %c224_50 = arith.constant 224 : index
    %c0_51 = arith.constant 0 : index
    %98 = vector.load %arg1[%c224_50, %c0_51] : memref<320x32xbf16, #tpu.memory_space<vmem>>, vector<32x32xbf16>
    %99 = vector.extract_strided_slice %66 {offsets = [96, 0], sizes = [16, 32], strides = [1, 1]} : vector<144x32xf32> to vector<16x32xf32>
    %100 = arith.truncf %99 : vector<16x32xf32> to vector<16x32xbf16>
    %cst_52 = arith.constant dense<0.000000e+00> : vector<16x32xf32>
    %101 = tpu.matmul %100, %98, %cst_52 {dimension_numbers = #tpu.dot_dimension_numbers<[1], [0], [0], [1], [0, 0, 1, 1], [], []>} : vector<16x32xbf16>, vector<32x32xbf16>, vector<16x32xf32> -> vector<16x32xf32>
    %102 = arith.addf %97, %101 : vector<16x32xf32>
    %c256_53 = arith.constant 256 : index
    %c0_54 = arith.constant 0 : index
    %103 = vector.load %arg1[%c256_53, %c0_54] : memref<320x32xbf16, #tpu.memory_space<vmem>>, vector<32x32xbf16>
    %104 = vector.extract_strided_slice %66 {offsets = [112, 0], sizes = [16, 32], strides = [1, 1]} : vector<144x32xf32> to vector<16x32xf32>
    %105 = arith.truncf %104 : vector<16x32xf32> to vector<16x32xbf16>
    %cst_55 = arith.constant dense<0.000000e+00> : vector<16x32xf32>
    %106 = tpu.matmul %105, %103, %cst_55 {dimension_numbers = #tpu.dot_dimension_numbers<[1], [0], [0], [1], [0, 0, 1, 1], [], []>} : vector<16x32xbf16>, vector<32x32xbf16>, vector<16x32xf32> -> vector<16x32xf32>
    %107 = arith.addf %102, %106 : vector<16x32xf32>
    %c288_56 = arith.constant 288 : index
    %c0_57 = arith.constant 0 : index
    %108 = vector.load %arg1[%c288_56, %c0_57] : memref<320x32xbf16, #tpu.memory_space<vmem>>, vector<32x32xbf16>
    %109 = vector.extract_strided_slice %66 {offsets = [128, 0], sizes = [16, 32], strides = [1, 1]} : vector<144x32xf32> to vector<16x32xf32>
    %110 = arith.truncf %109 : vector<16x32xf32> to vector<16x32xbf16>
    %cst_58 = arith.constant dense<0.000000e+00> : vector<16x32xf32>
    %111 = tpu.matmul %110, %108, %cst_58 {dimension_numbers = #tpu.dot_dimension_numbers<[1], [0], [0], [1], [0, 0, 1, 1], [], []>} : vector<16x32xbf16>, vector<32x32xbf16>, vector<16x32xf32> -> vector<16x32xf32>
    %112 = arith.addf %107, %111 : vector<16x32xf32>
    %cst_59 = arith.constant 0.000000e+00 : f32
    %113 = vector.broadcast %cst_59 : f32 to vector<16x32xf32>
    %114 = arith.maximumf %112, %113 : vector<16x32xf32>
    %115 = arith.addf %114, %10 : vector<16x32xf32>
    %116 = tpu.concatenate %63, %115 in 0 : vector<16x32xf32>, vector<16x32xf32> -> vector<32x32xf32>
    %117 = tpu.iota {dimensions = array<i32: 1>} : vector<8x8x8xi32>
    %118 = tpu.iota {dimensions = array<i32: 2>} : vector<8x8x8xi32>
    %119 = arith.cmpi sle, %118, %117 : vector<8x8x8xi32>
    %cst_60 = arith.constant 0.000000e+00 : f32
    %cst_61 = arith.constant -1.000000e+30 : f32
    %120 = vector.broadcast %cst_60 : f32 to vector<8x8x8xf32>
    %121 = vector.broadcast %cst_61 : f32 to vector<8x8x8xf32>
    %122 = arith.select %119, %120, %121 : vector<8x8x8xi1>, vector<8x8x8xf32>
    %c0_62 = arith.constant 0 : index
    %c0_63 = arith.constant 0 : index
    %c0_64 = arith.constant 0 : index
    %123 = vector.load %arg4[%c0_62, %c0_63, %c0_64] : memref<8x1x8xf32, #tpu.memory_space<vmem>>, vector<8x1x8xf32>
    %124 = vector.broadcast %123 : vector<8x1x8xf32> to vector<8x8x8xf32>
    %125 = arith.addf %122, %124 : vector<8x8x8xf32>
    %c16 = arith.constant 16 : index
    %c0_65 = arith.constant 0 : index
    %126 = vector.load %arg3[%c16, %c0_65] : memref<32x32xf32, #tpu.memory_space<vmem>>, vector<16x32xf32>
    %c9 = arith.constant 9 : index
    %c0_66 = arith.constant 0 : index
    %127 = vector.load %arg7[%c9, %c0_66] : memref<32x128xf32, #tpu.memory_space<vmem>>, vector<1x32xf32>
    %c10 = arith.constant 10 : index
    %c0_67 = arith.constant 0 : index
    %128 = vector.load %arg7[%c10, %c0_67] : memref<32x128xf32, #tpu.memory_space<vmem>>, vector<1x32xf32>
    %cst_68 = arith.constant dense<0.000000e+00> : vector<16xf32>
    %129 = vector.multi_reduction <add>, %126, %cst_68 [1] : vector<16x32xf32> to vector<16xf32>
    %130 = vector.shape_cast %129 : vector<16xf32> to vector<16x1xf32>
    %cst_69 = arith.constant 3.200000e+01 : f32
    %131 = vector.broadcast %cst_69 : f32 to vector<16x1xf32>
    %132 = arith.divf %130, %131 : vector<16x1xf32>
    %133 = vector.broadcast %132 : vector<16x1xf32> to vector<16x32xf32>
    %134 = arith.subf %126, %133 : vector<16x32xf32>
    %135 = arith.mulf %134, %134 : vector<16x32xf32>
    %cst_70 = arith.constant dense<0.000000e+00> : vector<16xf32>
    %136 = vector.multi_reduction <add>, %135, %cst_70 [1] : vector<16x32xf32> to vector<16xf32>
    %137 = vector.shape_cast %136 : vector<16xf32> to vector<16x1xf32>
    %cst_71 = arith.constant 3.200000e+01 : f32
    %138 = vector.broadcast %cst_71 : f32 to vector<16x1xf32>
    %139 = arith.divf %137, %138 : vector<16x1xf32>
    %140 = vector.broadcast %132 : vector<16x1xf32> to vector<16x32xf32>
    %141 = arith.subf %126, %140 : vector<16x32xf32>
    %cst_72 = arith.constant 9.99999974E-6 : f32
    %142 = vector.broadcast %cst_72 : f32 to vector<16x1xf32>
    %143 = arith.addf %139, %142 : vector<16x1xf32>
    %144 = math.rsqrt %143 : vector<16x1xf32>
    %145 = vector.broadcast %144 : vector<16x1xf32> to vector<16x32xf32>
    %146 = arith.mulf %141, %145 : vector<16x32xf32>
    %147 = vector.broadcast %127 : vector<1x32xf32> to vector<16x32xf32>
    %148 = arith.mulf %146, %147 : vector<16x32xf32>
    %149 = vector.broadcast %128 : vector<1x32xf32> to vector<16x32xf32>
    %150 = arith.addf %148, %149 : vector<16x32xf32>
    %c0_73 = arith.constant 0 : index
    %c0_74 = arith.constant 0 : index
    %151 = vector.load %arg6[%c0_73, %c0_74] : memref<448x128xbf16, #tpu.memory_space<vmem>>, vector<32x96xbf16>
    %152 = arith.truncf %150 : vector<16x32xf32> to vector<16x32xbf16>
    %cst_75 = arith.constant dense<0.000000e+00> : vector<16x96xf32>
    %153 = tpu.matmul %152, %151, %cst_75 {dimension_numbers = #tpu.dot_dimension_numbers<[1], [0], [0], [1], [0, 0, 1, 1], [], []>} : vector<16x32xbf16>, vector<32x96xbf16>, vector<16x96xf32> -> vector<16x96xf32>
    %c3 = arith.constant 3 : index
    %c0_76 = arith.constant 0 : index
    %154 = vector.load %arg7[%c3, %c0_76] : memref<32x128xf32, #tpu.memory_space<vmem>>, vector<1x96xf32>
    %155 = vector.broadcast %154 : vector<1x96xf32> to vector<16x96xf32>
    %156 = arith.addf %153, %155 : vector<16x96xf32>
    %157 = vector.extract_strided_slice %156 {offsets = [0, 0], sizes = [8, 8], strides = [1, 1]} : vector<16x96xf32> to vector<8x8xf32>
    %158 = vector.extract_strided_slice %156 {offsets = [8, 0], sizes = [8, 8], strides = [1, 1]} : vector<16x96xf32> to vector<8x8xf32>
    %159 = vector.extract_strided_slice %156 {offsets = [0, 8], sizes = [8, 8], strides = [1, 1]} : vector<16x96xf32> to vector<8x8xf32>
    %160 = vector.extract_strided_slice %156 {offsets = [8, 8], sizes = [8, 8], strides = [1, 1]} : vector<16x96xf32> to vector<8x8xf32>
    %161 = vector.extract_strided_slice %156 {offsets = [0, 16], sizes = [8, 8], strides = [1, 1]} : vector<16x96xf32> to vector<8x8xf32>
    %162 = vector.extract_strided_slice %156 {offsets = [8, 16], sizes = [8, 8], strides = [1, 1]} : vector<16x96xf32> to vector<8x8xf32>
    %163 = vector.extract_strided_slice %156 {offsets = [0, 24], sizes = [8, 8], strides = [1, 1]} : vector<16x96xf32> to vector<8x8xf32>
    %164 = vector.extract_strided_slice %156 {offsets = [8, 24], sizes = [8, 8], strides = [1, 1]} : vector<16x96xf32> to vector<8x8xf32>
    %165 = vector.shape_cast %157 : vector<8x8xf32> to vector<1x8x8xf32>
    %166 = vector.shape_cast %158 : vector<8x8xf32> to vector<1x8x8xf32>
    %167 = vector.shape_cast %159 : vector<8x8xf32> to vector<1x8x8xf32>
    %168 = vector.shape_cast %160 : vector<8x8xf32> to vector<1x8x8xf32>
    %169 = vector.shape_cast %161 : vector<8x8xf32> to vector<1x8x8xf32>
    %170 = vector.shape_cast %162 : vector<8x8xf32> to vector<1x8x8xf32>
    %171 = vector.shape_cast %163 : vector<8x8xf32> to vector<1x8x8xf32>
    %172 = vector.shape_cast %164 : vector<8x8xf32> to vector<1x8x8xf32>
    %173 = tpu.concatenate %165, %166, %167, %168, %169, %170, %171, %172 in 0 : vector<1x8x8xf32>, vector<1x8x8xf32>, vector<1x8x8xf32>, vector<1x8x8xf32>, vector<1x8x8xf32>, vector<1x8x8xf32>, vector<1x8x8xf32>, vector<1x8x8xf32> -> vector<8x8x8xf32>
    %174 = vector.extract_strided_slice %156 {offsets = [0, 32], sizes = [8, 8], strides = [1, 1]} : vector<16x96xf32> to vector<8x8xf32>
    %175 = vector.extract_strided_slice %156 {offsets = [8, 32], sizes = [8, 8], strides = [1, 1]} : vector<16x96xf32> to vector<8x8xf32>
    %176 = vector.extract_strided_slice %156 {offsets = [0, 40], sizes = [8, 8], strides = [1, 1]} : vector<16x96xf32> to vector<8x8xf32>
    %177 = vector.extract_strided_slice %156 {offsets = [8, 40], sizes = [8, 8], strides = [1, 1]} : vector<16x96xf32> to vector<8x8xf32>
    %178 = vector.extract_strided_slice %156 {offsets = [0, 48], sizes = [8, 8], strides = [1, 1]} : vector<16x96xf32> to vector<8x8xf32>
    %179 = vector.extract_strided_slice %156 {offsets = [8, 48], sizes = [8, 8], strides = [1, 1]} : vector<16x96xf32> to vector<8x8xf32>
    %180 = vector.extract_strided_slice %156 {offsets = [0, 56], sizes = [8, 8], strides = [1, 1]} : vector<16x96xf32> to vector<8x8xf32>
    %181 = vector.extract_strided_slice %156 {offsets = [8, 56], sizes = [8, 8], strides = [1, 1]} : vector<16x96xf32> to vector<8x8xf32>
    %182 = vector.shape_cast %174 : vector<8x8xf32> to vector<1x8x8xf32>
    %183 = vector.shape_cast %175 : vector<8x8xf32> to vector<1x8x8xf32>
    %184 = vector.shape_cast %176 : vector<8x8xf32> to vector<1x8x8xf32>
    %185 = vector.shape_cast %177 : vector<8x8xf32> to vector<1x8x8xf32>
    %186 = vector.shape_cast %178 : vector<8x8xf32> to vector<1x8x8xf32>
    %187 = vector.shape_cast %179 : vector<8x8xf32> to vector<1x8x8xf32>
    %188 = vector.shape_cast %180 : vector<8x8xf32> to vector<1x8x8xf32>
    %189 = vector.shape_cast %181 : vector<8x8xf32> to vector<1x8x8xf32>
    %190 = tpu.concatenate %182, %183, %184, %185, %186, %187, %188, %189 in 0 : vector<1x8x8xf32>, vector<1x8x8xf32>, vector<1x8x8xf32>, vector<1x8x8xf32>, vector<1x8x8xf32>, vector<1x8x8xf32>, vector<1x8x8xf32>, vector<1x8x8xf32> -> vector<8x8x8xf32>
    %191 = vector.extract_strided_slice %156 {offsets = [0, 64], sizes = [8, 8], strides = [1, 1]} : vector<16x96xf32> to vector<8x8xf32>
    %192 = vector.extract_strided_slice %156 {offsets = [8, 64], sizes = [8, 8], strides = [1, 1]} : vector<16x96xf32> to vector<8x8xf32>
    %193 = vector.extract_strided_slice %156 {offsets = [0, 72], sizes = [8, 8], strides = [1, 1]} : vector<16x96xf32> to vector<8x8xf32>
    %194 = vector.extract_strided_slice %156 {offsets = [8, 72], sizes = [8, 8], strides = [1, 1]} : vector<16x96xf32> to vector<8x8xf32>
    %195 = vector.extract_strided_slice %156 {offsets = [0, 80], sizes = [8, 8], strides = [1, 1]} : vector<16x96xf32> to vector<8x8xf32>
    %196 = vector.extract_strided_slice %156 {offsets = [8, 80], sizes = [8, 8], strides = [1, 1]} : vector<16x96xf32> to vector<8x8xf32>
    %197 = vector.extract_strided_slice %156 {offsets = [0, 88], sizes = [8, 8], strides = [1, 1]} : vector<16x96xf32> to vector<8x8xf32>
    %198 = vector.extract_strided_slice %156 {offsets = [8, 88], sizes = [8, 8], strides = [1, 1]} : vector<16x96xf32> to vector<8x8xf32>
    %199 = vector.shape_cast %191 : vector<8x8xf32> to vector<1x8x8xf32>
    %200 = vector.shape_cast %192 : vector<8x8xf32> to vector<1x8x8xf32>
    %201 = vector.shape_cast %193 : vector<8x8xf32> to vector<1x8x8xf32>
    %202 = vector.shape_cast %194 : vector<8x8xf32> to vector<1x8x8xf32>
    %203 = vector.shape_cast %195 : vector<8x8xf32> to vector<1x8x8xf32>
    %204 = vector.shape_cast %196 : vector<8x8xf32> to vector<1x8x8xf32>
    %205 = vector.shape_cast %197 : vector<8x8xf32> to vector<1x8x8xf32>
    %206 = vector.shape_cast %198 : vector<8x8xf32> to vector<1x8x8xf32>
    %207 = tpu.concatenate %199, %200, %201, %202, %203, %204, %205, %206 in 0 : vector<1x8x8xf32>, vector<1x8x8xf32>, vector<1x8x8xf32>, vector<1x8x8xf32>, vector<1x8x8xf32>, vector<1x8x8xf32>, vector<1x8x8xf32>, vector<1x8x8xf32> -> vector<8x8x8xf32>
    %208 = arith.truncf %173 : vector<8x8x8xf32> to vector<8x8x8xbf16>
    %209 = arith.truncf %190 : vector<8x8x8xf32> to vector<8x8x8xbf16>
    "tpu.trace_start"() <{level = 10 : i32, message = "zqd,zkd->zqk"}> : () -> ()
    %cst_77 = arith.constant dense<0.000000e+00> : vector<8x8x8xf32>
    %210 = tpu.matmul %208, %209, %cst_77 {dimension_numbers = #tpu.dot_dimension_numbers<[2], [2], [1], [1], [0, 0, 0, 1, 1, 1], [0], [0]>} : vector<8x8x8xbf16>, vector<8x8x8xbf16>, vector<8x8x8xf32> -> vector<8x8x8xf32>
    "tpu.trace_stop"() : () -> ()
    %cst_78 = arith.constant 0.353553385 : f32
    %211 = vector.broadcast %cst_78 : f32 to vector<8x8x8xf32>
    %212 = arith.mulf %210, %211 : vector<8x8x8xf32>
    %213 = arith.addf %212, %125 : vector<8x8x8xf32>
    %cst_79 = arith.constant dense<0xFF800000> : vector<8x8xf32>
    %214 = vector.multi_reduction <maximumf>, %213, %cst_79 [2] : vector<8x8x8xf32> to vector<8x8xf32>
    %215 = vector.shape_cast %214 : vector<8x8xf32> to vector<8x8x1xf32>
    %216 = vector.broadcast %215 : vector<8x8x1xf32> to vector<8x8x8xf32>
    %217 = arith.subf %213, %216 : vector<8x8x8xf32>
    %218 = math.exp %217 : vector<8x8x8xf32>
    %cst_80 = arith.constant dense<0.000000e+00> : vector<8x8xf32>
    %219 = vector.multi_reduction <add>, %218, %cst_80 [2] : vector<8x8x8xf32> to vector<8x8xf32>
    %220 = vector.shape_cast %219 : vector<8x8xf32> to vector<8x8x1xf32>
    %221 = tpu.reciprocal %220 {approx = true} : vector<8x8x1xf32> -> vector<8x8x1xf32>
    %222 = vector.broadcast %221 : vector<8x8x1xf32> to vector<8x8x8xf32>
    %223 = arith.mulf %218, %222 : vector<8x8x8xf32>
    %224 = arith.truncf %223 : vector<8x8x8xf32> to vector<8x8x8xbf16>
    %225 = arith.truncf %207 : vector<8x8x8xf32> to vector<8x8x8xbf16>
    "tpu.trace_start"() <{level = 10 : i32, message = "zqk,zkd->zqd"}> : () -> ()
    %cst_81 = arith.constant dense<0.000000e+00> : vector<8x8x8xf32>
    %226 = tpu.matmul %224, %225, %cst_81 {dimension_numbers = #tpu.dot_dimension_numbers<[2], [1], [1], [2], [0, 0, 0, 1, 1, 2], [0], [0]>} : vector<8x8x8xbf16>, vector<8x8x8xbf16>, vector<8x8x8xf32> -> vector<8x8x8xf32>
    "tpu.trace_stop"() : () -> ()
    %c4 = arith.constant 4 : index
    %c0_82 = arith.constant 0 : index
    %227 = vector.load %arg7[%c4, %c0_82] : memref<32x128xf32, #tpu.memory_space<vmem>>, vector<1x32xf32>
    %228 = vector.extract_strided_slice %226 {offsets = [0, 0, 0], sizes = [1, 8, 8], strides = [1, 1, 1]} : vector<8x8x8xf32> to vector<1x8x8xf32>
    %229 = vector.shape_cast %228 : vector<1x8x8xf32> to vector<8x8xf32>
    %230 = vector.extract_strided_slice %226 {offsets = [1, 0, 0], sizes = [1, 8, 8], strides = [1, 1, 1]} : vector<8x8x8xf32> to vector<1x8x8xf32>
    %231 = vector.shape_cast %230 : vector<1x8x8xf32> to vector<8x8xf32>
    %232 = tpu.concatenate %229, %231 in 0 : vector<8x8xf32>, vector<8x8xf32> -> vector<16x8xf32>
    %c32_83 = arith.constant 32 : index
    %c0_84 = arith.constant 0 : index
    %233 = vector.load %arg6[%c32_83, %c0_84] : memref<448x128xbf16, #tpu.memory_space<vmem>>, vector<8x32xbf16>
    %234 = arith.truncf %232 : vector<16x8xf32> to vector<16x8xbf16>
    %cst_85 = arith.constant dense<0.000000e+00> : vector<16x32xf32>
    %235 = tpu.matmul %234, %233, %cst_85 {dimension_numbers = #tpu.dot_dimension_numbers<[1], [0], [0], [1], [0, 0, 1, 1], [], []>} : vector<16x8xbf16>, vector<8x32xbf16>, vector<16x32xf32> -> vector<16x32xf32>
    %236 = vector.broadcast %227 : vector<1x32xf32> to vector<16x32xf32>
    %237 = arith.addf %236, %235 : vector<16x32xf32>
    %238 = vector.extract_strided_slice %226 {offsets = [2, 0, 0], sizes = [1, 8, 8], strides = [1, 1, 1]} : vector<8x8x8xf32> to vector<1x8x8xf32>
    %239 = vector.shape_cast %238 : vector<1x8x8xf32> to vector<8x8xf32>
    %240 = vector.extract_strided_slice %226 {offsets = [3, 0, 0], sizes = [1, 8, 8], strides = [1, 1, 1]} : vector<8x8x8xf32> to vector<1x8x8xf32>
    %241 = vector.shape_cast %240 : vector<1x8x8xf32> to vector<8x8xf32>
    %242 = tpu.concatenate %239, %241 in 0 : vector<8x8xf32>, vector<8x8xf32> -> vector<16x8xf32>
    %c40 = arith.constant 40 : index
    %c0_86 = arith.constant 0 : index
    %243 = vector.load %arg6[%c40, %c0_86] : memref<448x128xbf16, #tpu.memory_space<vmem>>, vector<8x32xbf16>
    %244 = arith.truncf %242 : vector<16x8xf32> to vector<16x8xbf16>
    %cst_87 = arith.constant dense<0.000000e+00> : vector<16x32xf32>
    %245 = tpu.matmul %244, %243, %cst_87 {dimension_numbers = #tpu.dot_dimension_numbers<[1], [0], [0], [1], [0, 0, 1, 1], [], []>} : vector<16x8xbf16>, vector<8x32xbf16>, vector<16x32xf32> -> vector<16x32xf32>
    %246 = arith.addf %237, %245 : vector<16x32xf32>
    %247 = vector.extract_strided_slice %226 {offsets = [4, 0, 0], sizes = [1, 8, 8], strides = [1, 1, 1]} : vector<8x8x8xf32> to vector<1x8x8xf32>
    %248 = vector.shape_cast %247 : vector<1x8x8xf32> to vector<8x8xf32>
    %249 = vector.extract_strided_slice %226 {offsets = [5, 0, 0], sizes = [1, 8, 8], strides = [1, 1, 1]} : vector<8x8x8xf32> to vector<1x8x8xf32>
    %250 = vector.shape_cast %249 : vector<1x8x8xf32> to vector<8x8xf32>
    %251 = tpu.concatenate %248, %250 in 0 : vector<8x8xf32>, vector<8x8xf32> -> vector<16x8xf32>
    %c48 = arith.constant 48 : index
    %c0_88 = arith.constant 0 : index
    %252 = vector.load %arg6[%c48, %c0_88] : memref<448x128xbf16, #tpu.memory_space<vmem>>, vector<8x32xbf16>
    %253 = arith.truncf %251 : vector<16x8xf32> to vector<16x8xbf16>
    %cst_89 = arith.constant dense<0.000000e+00> : vector<16x32xf32>
    %254 = tpu.matmul %253, %252, %cst_89 {dimension_numbers = #tpu.dot_dimension_numbers<[1], [0], [0], [1], [0, 0, 1, 1], [], []>} : vector<16x8xbf16>, vector<8x32xbf16>, vector<16x32xf32> -> vector<16x32xf32>
    %255 = arith.addf %246, %254 : vector<16x32xf32>
    %256 = vector.extract_strided_slice %226 {offsets = [6, 0, 0], sizes = [1, 8, 8], strides = [1, 1, 1]} : vector<8x8x8xf32> to vector<1x8x8xf32>
    %257 = vector.shape_cast %256 : vector<1x8x8xf32> to vector<8x8xf32>
    %258 = vector.extract_strided_slice %226 {offsets = [7, 0, 0], sizes = [1, 8, 8], strides = [1, 1, 1]} : vector<8x8x8xf32> to vector<1x8x8xf32>
    %259 = vector.shape_cast %258 : vector<1x8x8xf32> to vector<8x8xf32>
    %260 = tpu.concatenate %257, %259 in 0 : vector<8x8xf32>, vector<8x8xf32> -> vector<16x8xf32>
    %c56 = arith.constant 56 : index
    %c0_90 = arith.constant 0 : index
    %261 = vector.load %arg6[%c56, %c0_90] : memref<448x128xbf16, #tpu.memory_space<vmem>>, vector<8x32xbf16>
    %262 = arith.truncf %260 : vector<16x8xf32> to vector<16x8xbf16>
    %cst_91 = arith.constant dense<0.000000e+00> : vector<16x32xf32>
    %263 = tpu.matmul %262, %261, %cst_91 {dimension_numbers = #tpu.dot_dimension_numbers<[1], [0], [0], [1], [0, 0, 1, 1], [], []>} : vector<16x8xbf16>, vector<8x32xbf16>, vector<16x32xf32> -> vector<16x32xf32>
    %264 = arith.addf %255, %263 : vector<16x32xf32>
    %265 = arith.addf %126, %264 : vector<16x32xf32>
    %c11 = arith.constant 11 : index
    %c0_92 = arith.constant 0 : index
    %266 = vector.load %arg7[%c11, %c0_92] : memref<32x128xf32, #tpu.memory_space<vmem>>, vector<1x32xf32>
    %c12 = arith.constant 12 : index
    %c0_93 = arith.constant 0 : index
    %267 = vector.load %arg7[%c12, %c0_93] : memref<32x128xf32, #tpu.memory_space<vmem>>, vector<1x32xf32>
    %cst_94 = arith.constant dense<0.000000e+00> : vector<16xf32>
    %268 = vector.multi_reduction <add>, %265, %cst_94 [1] : vector<16x32xf32> to vector<16xf32>
    %269 = vector.shape_cast %268 : vector<16xf32> to vector<16x1xf32>
    %cst_95 = arith.constant 3.200000e+01 : f32
    %270 = vector.broadcast %cst_95 : f32 to vector<16x1xf32>
    %271 = arith.divf %269, %270 : vector<16x1xf32>
    %272 = vector.broadcast %271 : vector<16x1xf32> to vector<16x32xf32>
    %273 = arith.subf %265, %272 : vector<16x32xf32>
    %274 = arith.mulf %273, %273 : vector<16x32xf32>
    %cst_96 = arith.constant dense<0.000000e+00> : vector<16xf32>
    %275 = vector.multi_reduction <add>, %274, %cst_96 [1] : vector<16x32xf32> to vector<16xf32>
    %276 = vector.shape_cast %275 : vector<16xf32> to vector<16x1xf32>
    %cst_97 = arith.constant 3.200000e+01 : f32
    %277 = vector.broadcast %cst_97 : f32 to vector<16x1xf32>
    %278 = arith.divf %276, %277 : vector<16x1xf32>
    %279 = vector.broadcast %271 : vector<16x1xf32> to vector<16x32xf32>
    %280 = arith.subf %265, %279 : vector<16x32xf32>
    %cst_98 = arith.constant 9.99999974E-6 : f32
    %281 = vector.broadcast %cst_98 : f32 to vector<16x1xf32>
    %282 = arith.addf %278, %281 : vector<16x1xf32>
    %283 = math.rsqrt %282 : vector<16x1xf32>
    %284 = vector.broadcast %283 : vector<16x1xf32> to vector<16x32xf32>
    %285 = arith.mulf %280, %284 : vector<16x32xf32>
    %286 = vector.broadcast %266 : vector<1x32xf32> to vector<16x32xf32>
    %287 = arith.mulf %285, %286 : vector<16x32xf32>
    %288 = vector.broadcast %267 : vector<1x32xf32> to vector<16x32xf32>
    %289 = arith.addf %287, %288 : vector<16x32xf32>
    %c64_99 = arith.constant 64 : index
    %c0_100 = arith.constant 0 : index
    %290 = vector.load %arg6[%c64_99, %c0_100] : memref<448x128xbf16, #tpu.memory_space<vmem>>, vector<32x96xbf16>
    %c5 = arith.constant 5 : index
    %c0_101 = arith.constant 0 : index
    %291 = vector.load %arg7[%c5, %c0_101] : memref<32x128xf32, #tpu.memory_space<vmem>>, vector<1x96xf32>
    %292 = vector.extract_strided_slice %290 {offsets = [0, 0], sizes = [32, 32], strides = [1, 1]} : vector<32x96xbf16> to vector<32x32xbf16>
    %293 = arith.truncf %289 : vector<16x32xf32> to vector<16x32xbf16>
    %cst_102 = arith.constant dense<0.000000e+00> : vector<16x32xf32>
    %294 = tpu.matmul %293, %292, %cst_102 {dimension_numbers = #tpu.dot_dimension_numbers<[1], [0], [0], [1], [0, 0, 1, 1], [], []>} : vector<16x32xbf16>, vector<32x32xbf16>, vector<16x32xf32> -> vector<16x32xf32>
    %295 = vector.extract_strided_slice %291 {offsets = [0, 0], sizes = [1, 32], strides = [1, 1]} : vector<1x96xf32> to vector<1x32xf32>
    %296 = vector.broadcast %295 : vector<1x32xf32> to vector<16x32xf32>
    %297 = arith.addf %294, %296 : vector<16x32xf32>
    %298 = vector.extract_strided_slice %290 {offsets = [0, 32], sizes = [32, 64], strides = [1, 1]} : vector<32x96xbf16> to vector<32x64xbf16>
    %299 = arith.truncf %116 : vector<32x32xf32> to vector<32x32xbf16>
    %cst_103 = arith.constant dense<0.000000e+00> : vector<32x64xf32>
    %300 = tpu.matmul %299, %298, %cst_103 {dimension_numbers = #tpu.dot_dimension_numbers<[1], [0], [0], [1], [0, 0, 1, 1], [], []>} : vector<32x32xbf16>, vector<32x64xbf16>, vector<32x64xf32> -> vector<32x64xf32>
    %301 = vector.extract_strided_slice %291 {offsets = [0, 32], sizes = [1, 64], strides = [1, 1]} : vector<1x96xf32> to vector<1x64xf32>
    %302 = vector.broadcast %301 : vector<1x64xf32> to vector<32x64xf32>
    %303 = arith.addf %300, %302 : vector<32x64xf32>
    %304 = vector.extract_strided_slice %297 {offsets = [0, 0], sizes = [8, 8], strides = [1, 1]} : vector<16x32xf32> to vector<8x8xf32>
    %305 = vector.extract_strided_slice %297 {offsets = [8, 0], sizes = [8, 8], strides = [1, 1]} : vector<16x32xf32> to vector<8x8xf32>
    %306 = vector.extract_strided_slice %297 {offsets = [0, 8], sizes = [8, 8], strides = [1, 1]} : vector<16x32xf32> to vector<8x8xf32>
    %307 = vector.extract_strided_slice %297 {offsets = [8, 8], sizes = [8, 8], strides = [1, 1]} : vector<16x32xf32> to vector<8x8xf32>
    %308 = vector.extract_strided_slice %297 {offsets = [0, 16], sizes = [8, 8], strides = [1, 1]} : vector<16x32xf32> to vector<8x8xf32>
    %309 = vector.extract_strided_slice %297 {offsets = [8, 16], sizes = [8, 8], strides = [1, 1]} : vector<16x32xf32> to vector<8x8xf32>
    %310 = vector.extract_strided_slice %297 {offsets = [0, 24], sizes = [8, 8], strides = [1, 1]} : vector<16x32xf32> to vector<8x8xf32>
    %311 = vector.extract_strided_slice %297 {offsets = [8, 24], sizes = [8, 8], strides = [1, 1]} : vector<16x32xf32> to vector<8x8xf32>
    %312 = vector.shape_cast %304 : vector<8x8xf32> to vector<1x8x8xf32>
    %313 = vector.shape_cast %305 : vector<8x8xf32> to vector<1x8x8xf32>
    %314 = vector.shape_cast %306 : vector<8x8xf32> to vector<1x8x8xf32>
    %315 = vector.shape_cast %307 : vector<8x8xf32> to vector<1x8x8xf32>
    %316 = vector.shape_cast %308 : vector<8x8xf32> to vector<1x8x8xf32>
    %317 = vector.shape_cast %309 : vector<8x8xf32> to vector<1x8x8xf32>
    %318 = vector.shape_cast %310 : vector<8x8xf32> to vector<1x8x8xf32>
    %319 = vector.shape_cast %311 : vector<8x8xf32> to vector<1x8x8xf32>
    %320 = tpu.concatenate %312, %313, %314, %315, %316, %317, %318, %319 in 0 : vector<1x8x8xf32>, vector<1x8x8xf32>, vector<1x8x8xf32>, vector<1x8x8xf32>, vector<1x8x8xf32>, vector<1x8x8xf32>, vector<1x8x8xf32>, vector<1x8x8xf32> -> vector<8x8x8xf32>
    %321 = vector.extract_strided_slice %303 {offsets = [0, 0], sizes = [16, 8], strides = [1, 1]} : vector<32x64xf32> to vector<16x8xf32>
    %322 = vector.extract_strided_slice %303 {offsets = [16, 0], sizes = [16, 8], strides = [1, 1]} : vector<32x64xf32> to vector<16x8xf32>
    %323 = vector.extract_strided_slice %303 {offsets = [0, 8], sizes = [16, 8], strides = [1, 1]} : vector<32x64xf32> to vector<16x8xf32>
    %324 = vector.extract_strided_slice %303 {offsets = [16, 8], sizes = [16, 8], strides = [1, 1]} : vector<32x64xf32> to vector<16x8xf32>
    %325 = vector.extract_strided_slice %303 {offsets = [0, 16], sizes = [16, 8], strides = [1, 1]} : vector<32x64xf32> to vector<16x8xf32>
    %326 = vector.extract_strided_slice %303 {offsets = [16, 16], sizes = [16, 8], strides = [1, 1]} : vector<32x64xf32> to vector<16x8xf32>
    %327 = vector.extract_strided_slice %303 {offsets = [0, 24], sizes = [16, 8], strides = [1, 1]} : vector<32x64xf32> to vector<16x8xf32>
    %328 = vector.extract_strided_slice %303 {offsets = [16, 24], sizes = [16, 8], strides = [1, 1]} : vector<32x64xf32> to vector<16x8xf32>
    %329 = vector.shape_cast %321 : vector<16x8xf32> to vector<1x16x8xf32>
    %330 = vector.shape_cast %322 : vector<16x8xf32> to vector<1x16x8xf32>
    %331 = vector.shape_cast %323 : vector<16x8xf32> to vector<1x16x8xf32>
    %332 = vector.shape_cast %324 : vector<16x8xf32> to vector<1x16x8xf32>
    %333 = vector.shape_cast %325 : vector<16x8xf32> to vector<1x16x8xf32>
    %334 = vector.shape_cast %326 : vector<16x8xf32> to vector<1x16x8xf32>
    %335 = vector.shape_cast %327 : vector<16x8xf32> to vector<1x16x8xf32>
    %336 = vector.shape_cast %328 : vector<16x8xf32> to vector<1x16x8xf32>
    %337 = tpu.concatenate %329, %330, %331, %332, %333, %334, %335, %336 in 0 : vector<1x16x8xf32>, vector<1x16x8xf32>, vector<1x16x8xf32>, vector<1x16x8xf32>, vector<1x16x8xf32>, vector<1x16x8xf32>, vector<1x16x8xf32>, vector<1x16x8xf32> -> vector<8x16x8xf32>
    %338 = vector.extract_strided_slice %303 {offsets = [0, 32], sizes = [16, 8], strides = [1, 1]} : vector<32x64xf32> to vector<16x8xf32>
    %339 = vector.extract_strided_slice %303 {offsets = [16, 32], sizes = [16, 8], strides = [1, 1]} : vector<32x64xf32> to vector<16x8xf32>
    %340 = vector.extract_strided_slice %303 {offsets = [0, 40], sizes = [16, 8], strides = [1, 1]} : vector<32x64xf32> to vector<16x8xf32>
    %341 = vector.extract_strided_slice %303 {offsets = [16, 40], sizes = [16, 8], strides = [1, 1]} : vector<32x64xf32> to vector<16x8xf32>
    %342 = vector.extract_strided_slice %303 {offsets = [0, 48], sizes = [16, 8], strides = [1, 1]} : vector<32x64xf32> to vector<16x8xf32>
    %343 = vector.extract_strided_slice %303 {offsets = [16, 48], sizes = [16, 8], strides = [1, 1]} : vector<32x64xf32> to vector<16x8xf32>
    %344 = vector.extract_strided_slice %303 {offsets = [0, 56], sizes = [16, 8], strides = [1, 1]} : vector<32x64xf32> to vector<16x8xf32>
    %345 = vector.extract_strided_slice %303 {offsets = [16, 56], sizes = [16, 8], strides = [1, 1]} : vector<32x64xf32> to vector<16x8xf32>
    %346 = vector.shape_cast %338 : vector<16x8xf32> to vector<1x16x8xf32>
    %347 = vector.shape_cast %339 : vector<16x8xf32> to vector<1x16x8xf32>
    %348 = vector.shape_cast %340 : vector<16x8xf32> to vector<1x16x8xf32>
    %349 = vector.shape_cast %341 : vector<16x8xf32> to vector<1x16x8xf32>
    %350 = vector.shape_cast %342 : vector<16x8xf32> to vector<1x16x8xf32>
    %351 = vector.shape_cast %343 : vector<16x8xf32> to vector<1x16x8xf32>
    %352 = vector.shape_cast %344 : vector<16x8xf32> to vector<1x16x8xf32>
    %353 = vector.shape_cast %345 : vector<16x8xf32> to vector<1x16x8xf32>
    %354 = tpu.concatenate %346, %347, %348, %349, %350, %351, %352, %353 in 0 : vector<1x16x8xf32>, vector<1x16x8xf32>, vector<1x16x8xf32>, vector<1x16x8xf32>, vector<1x16x8xf32>, vector<1x16x8xf32>, vector<1x16x8xf32>, vector<1x16x8xf32> -> vector<8x16x8xf32>
    %355 = arith.truncf %320 : vector<8x8x8xf32> to vector<8x8x8xbf16>
    %356 = arith.truncf %337 : vector<8x16x8xf32> to vector<8x16x8xbf16>
    "tpu.trace_start"() <{level = 10 : i32, message = "zqd,zkd->zqk"}> : () -> ()
    %cst_104 = arith.constant dense<0.000000e+00> : vector<8x8x16xf32>
    %357 = tpu.matmul %355, %356, %cst_104 {dimension_numbers = #tpu.dot_dimension_numbers<[2], [2], [1], [1], [0, 0, 0, 1, 1, 1], [0], [0]>} : vector<8x8x8xbf16>, vector<8x16x8xbf16>, vector<8x8x16xf32> -> vector<8x8x16xf32>
    "tpu.trace_stop"() : () -> ()
    %cst_105 = arith.constant 0.353553385 : f32
    %358 = vector.broadcast %cst_105 : f32 to vector<8x8x16xf32>
    %359 = arith.mulf %357, %358 : vector<8x8x16xf32>
    %cst_106 = arith.constant dense<0xFF800000> : vector<8x8xf32>
    %360 = vector.multi_reduction <maximumf>, %359, %cst_106 [2] : vector<8x8x16xf32> to vector<8x8xf32>
    %361 = vector.shape_cast %360 : vector<8x8xf32> to vector<8x8x1xf32>
    %362 = vector.broadcast %361 : vector<8x8x1xf32> to vector<8x8x16xf32>
    %363 = arith.subf %359, %362 : vector<8x8x16xf32>
    %364 = math.exp %363 : vector<8x8x16xf32>
    %cst_107 = arith.constant dense<0.000000e+00> : vector<8x8xf32>
    %365 = vector.multi_reduction <add>, %364, %cst_107 [2] : vector<8x8x16xf32> to vector<8x8xf32>
    %366 = vector.shape_cast %365 : vector<8x8xf32> to vector<8x8x1xf32>
    %367 = tpu.reciprocal %366 {approx = true} : vector<8x8x1xf32> -> vector<8x8x1xf32>
    %368 = vector.broadcast %367 : vector<8x8x1xf32> to vector<8x8x16xf32>
    %369 = arith.mulf %364, %368 : vector<8x8x16xf32>
    %370 = arith.truncf %369 : vector<8x8x16xf32> to vector<8x8x16xbf16>
    %371 = arith.truncf %354 : vector<8x16x8xf32> to vector<8x16x8xbf16>
    "tpu.trace_start"() <{level = 10 : i32, message = "zqk,zkd->zqd"}> : () -> ()
    %cst_108 = arith.constant dense<0.000000e+00> : vector<8x8x8xf32>
    %372 = tpu.matmul %370, %371, %cst_108 {dimension_numbers = #tpu.dot_dimension_numbers<[2], [1], [1], [2], [0, 0, 0, 1, 1, 2], [0], [0]>} : vector<8x8x16xbf16>, vector<8x16x8xbf16>, vector<8x8x8xf32> -> vector<8x8x8xf32>
    "tpu.trace_stop"() : () -> ()
    %c6 = arith.constant 6 : index
    %c0_109 = arith.constant 0 : index
    %373 = vector.load %arg7[%c6, %c0_109] : memref<32x128xf32, #tpu.memory_space<vmem>>, vector<1x32xf32>
    %374 = vector.extract_strided_slice %372 {offsets = [0, 0, 0], sizes = [1, 8, 8], strides = [1, 1, 1]} : vector<8x8x8xf32> to vector<1x8x8xf32>
    %375 = vector.shape_cast %374 : vector<1x8x8xf32> to vector<8x8xf32>
    %376 = vector.extract_strided_slice %372 {offsets = [1, 0, 0], sizes = [1, 8, 8], strides = [1, 1, 1]} : vector<8x8x8xf32> to vector<1x8x8xf32>
    %377 = vector.shape_cast %376 : vector<1x8x8xf32> to vector<8x8xf32>
    %378 = tpu.concatenate %375, %377 in 0 : vector<8x8xf32>, vector<8x8xf32> -> vector<16x8xf32>
    %c96_110 = arith.constant 96 : index
    %c0_111 = arith.constant 0 : index
    %379 = vector.load %arg6[%c96_110, %c0_111] : memref<448x128xbf16, #tpu.memory_space<vmem>>, vector<8x32xbf16>
    %380 = arith.truncf %378 : vector<16x8xf32> to vector<16x8xbf16>
    %cst_112 = arith.constant dense<0.000000e+00> : vector<16x32xf32>
    %381 = tpu.matmul %380, %379, %cst_112 {dimension_numbers = #tpu.dot_dimension_numbers<[1], [0], [0], [1], [0, 0, 1, 1], [], []>} : vector<16x8xbf16>, vector<8x32xbf16>, vector<16x32xf32> -> vector<16x32xf32>
    %382 = vector.broadcast %373 : vector<1x32xf32> to vector<16x32xf32>
    %383 = arith.addf %382, %381 : vector<16x32xf32>
    %384 = vector.extract_strided_slice %372 {offsets = [2, 0, 0], sizes = [1, 8, 8], strides = [1, 1, 1]} : vector<8x8x8xf32> to vector<1x8x8xf32>
    %385 = vector.shape_cast %384 : vector<1x8x8xf32> to vector<8x8xf32>
    %386 = vector.extract_strided_slice %372 {offsets = [3, 0, 0], sizes = [1, 8, 8], strides = [1, 1, 1]} : vector<8x8x8xf32> to vector<1x8x8xf32>
    %387 = vector.shape_cast %386 : vector<1x8x8xf32> to vector<8x8xf32>
    %388 = tpu.concatenate %385, %387 in 0 : vector<8x8xf32>, vector<8x8xf32> -> vector<16x8xf32>
    %c104 = arith.constant 104 : index
    %c0_113 = arith.constant 0 : index
    %389 = vector.load %arg6[%c104, %c0_113] : memref<448x128xbf16, #tpu.memory_space<vmem>>, vector<8x32xbf16>
    %390 = arith.truncf %388 : vector<16x8xf32> to vector<16x8xbf16>
    %cst_114 = arith.constant dense<0.000000e+00> : vector<16x32xf32>
    %391 = tpu.matmul %390, %389, %cst_114 {dimension_numbers = #tpu.dot_dimension_numbers<[1], [0], [0], [1], [0, 0, 1, 1], [], []>} : vector<16x8xbf16>, vector<8x32xbf16>, vector<16x32xf32> -> vector<16x32xf32>
    %392 = arith.addf %383, %391 : vector<16x32xf32>
    %393 = vector.extract_strided_slice %372 {offsets = [4, 0, 0], sizes = [1, 8, 8], strides = [1, 1, 1]} : vector<8x8x8xf32> to vector<1x8x8xf32>
    %394 = vector.shape_cast %393 : vector<1x8x8xf32> to vector<8x8xf32>
    %395 = vector.extract_strided_slice %372 {offsets = [5, 0, 0], sizes = [1, 8, 8], strides = [1, 1, 1]} : vector<8x8x8xf32> to vector<1x8x8xf32>
    %396 = vector.shape_cast %395 : vector<1x8x8xf32> to vector<8x8xf32>
    %397 = tpu.concatenate %394, %396 in 0 : vector<8x8xf32>, vector<8x8xf32> -> vector<16x8xf32>
    %c112 = arith.constant 112 : index
    %c0_115 = arith.constant 0 : index
    %398 = vector.load %arg6[%c112, %c0_115] : memref<448x128xbf16, #tpu.memory_space<vmem>>, vector<8x32xbf16>
    %399 = arith.truncf %397 : vector<16x8xf32> to vector<16x8xbf16>
    %cst_116 = arith.constant dense<0.000000e+00> : vector<16x32xf32>
    %400 = tpu.matmul %399, %398, %cst_116 {dimension_numbers = #tpu.dot_dimension_numbers<[1], [0], [0], [1], [0, 0, 1, 1], [], []>} : vector<16x8xbf16>, vector<8x32xbf16>, vector<16x32xf32> -> vector<16x32xf32>
    %401 = arith.addf %392, %400 : vector<16x32xf32>
    %402 = vector.extract_strided_slice %372 {offsets = [6, 0, 0], sizes = [1, 8, 8], strides = [1, 1, 1]} : vector<8x8x8xf32> to vector<1x8x8xf32>
    %403 = vector.shape_cast %402 : vector<1x8x8xf32> to vector<8x8xf32>
    %404 = vector.extract_strided_slice %372 {offsets = [7, 0, 0], sizes = [1, 8, 8], strides = [1, 1, 1]} : vector<8x8x8xf32> to vector<1x8x8xf32>
    %405 = vector.shape_cast %404 : vector<1x8x8xf32> to vector<8x8xf32>
    %406 = tpu.concatenate %403, %405 in 0 : vector<8x8xf32>, vector<8x8xf32> -> vector<16x8xf32>
    %c120 = arith.constant 120 : index
    %c0_117 = arith.constant 0 : index
    %407 = vector.load %arg6[%c120, %c0_117] : memref<448x128xbf16, #tpu.memory_space<vmem>>, vector<8x32xbf16>
    %408 = arith.truncf %406 : vector<16x8xf32> to vector<16x8xbf16>
    %cst_118 = arith.constant dense<0.000000e+00> : vector<16x32xf32>
    %409 = tpu.matmul %408, %407, %cst_118 {dimension_numbers = #tpu.dot_dimension_numbers<[1], [0], [0], [1], [0, 0, 1, 1], [], []>} : vector<16x8xbf16>, vector<8x32xbf16>, vector<16x32xf32> -> vector<16x32xf32>
    %410 = arith.addf %401, %409 : vector<16x32xf32>
    %411 = arith.addf %265, %410 : vector<16x32xf32>
    %c13 = arith.constant 13 : index
    %c0_119 = arith.constant 0 : index
    %412 = vector.load %arg7[%c13, %c0_119] : memref<32x128xf32, #tpu.memory_space<vmem>>, vector<1x32xf32>
    %c14 = arith.constant 14 : index
    %c0_120 = arith.constant 0 : index
    %413 = vector.load %arg7[%c14, %c0_120] : memref<32x128xf32, #tpu.memory_space<vmem>>, vector<1x32xf32>
    %cst_121 = arith.constant dense<0.000000e+00> : vector<16xf32>
    %414 = vector.multi_reduction <add>, %411, %cst_121 [1] : vector<16x32xf32> to vector<16xf32>
    %415 = vector.shape_cast %414 : vector<16xf32> to vector<16x1xf32>
    %cst_122 = arith.constant 3.200000e+01 : f32
    %416 = vector.broadcast %cst_122 : f32 to vector<16x1xf32>
    %417 = arith.divf %415, %416 : vector<16x1xf32>
    %418 = vector.broadcast %417 : vector<16x1xf32> to vector<16x32xf32>
    %419 = arith.subf %411, %418 : vector<16x32xf32>
    %420 = arith.mulf %419, %419 : vector<16x32xf32>
    %cst_123 = arith.constant dense<0.000000e+00> : vector<16xf32>
    %421 = vector.multi_reduction <add>, %420, %cst_123 [1] : vector<16x32xf32> to vector<16xf32>
    %422 = vector.shape_cast %421 : vector<16xf32> to vector<16x1xf32>
    %cst_124 = arith.constant 3.200000e+01 : f32
    %423 = vector.broadcast %cst_124 : f32 to vector<16x1xf32>
    %424 = arith.divf %422, %423 : vector<16x1xf32>
    %425 = vector.broadcast %417 : vector<16x1xf32> to vector<16x32xf32>
    %426 = arith.subf %411, %425 : vector<16x32xf32>
    %cst_125 = arith.constant 9.99999974E-6 : f32
    %427 = vector.broadcast %cst_125 : f32 to vector<16x1xf32>
    %428 = arith.addf %424, %427 : vector<16x1xf32>
    %429 = math.rsqrt %428 : vector<16x1xf32>
    %430 = vector.broadcast %429 : vector<16x1xf32> to vector<16x32xf32>
    %431 = arith.mulf %426, %430 : vector<16x32xf32>
    %432 = vector.broadcast %412 : vector<1x32xf32> to vector<16x32xf32>
    %433 = arith.mulf %431, %432 : vector<16x32xf32>
    %434 = vector.broadcast %413 : vector<1x32xf32> to vector<16x32xf32>
    %435 = arith.addf %433, %434 : vector<16x32xf32>
    %c128_126 = arith.constant 128 : index
    %c0_127 = arith.constant 0 : index
    %436 = vector.load %arg6[%c128_126, %c0_127] : memref<448x128xbf16, #tpu.memory_space<vmem>>, vector<32x64xbf16>
    %c160_128 = arith.constant 160 : index
    %c0_129 = arith.constant 0 : index
    %437 = vector.load %arg6[%c160_128, %c0_129] : memref<448x128xbf16, #tpu.memory_space<vmem>>, vector<64x32xbf16>
    %438 = arith.truncf %435 : vector<16x32xf32> to vector<16x32xbf16>
    %cst_130 = arith.constant dense<0.000000e+00> : vector<16x64xf32>
    %439 = tpu.matmul %438, %436, %cst_130 {dimension_numbers = #tpu.dot_dimension_numbers<[1], [0], [0], [1], [0, 0, 1, 1], [], []>} : vector<16x32xbf16>, vector<32x64xbf16>, vector<16x64xf32> -> vector<16x64xf32>
    %c7 = arith.constant 7 : index
    %c0_131 = arith.constant 0 : index
    %440 = vector.load %arg7[%c7, %c0_131] : memref<32x128xf32, #tpu.memory_space<vmem>>, vector<1x64xf32>
    %441 = vector.broadcast %440 : vector<1x64xf32> to vector<16x64xf32>
    %442 = arith.addf %439, %441 : vector<16x64xf32>
    %cst_132 = arith.constant 0.000000e+00 : f32
    %443 = vector.broadcast %cst_132 : f32 to vector<16x64xf32>
    %444 = arith.maximumf %442, %443 : vector<16x64xf32>
    %445 = arith.truncf %444 : vector<16x64xf32> to vector<16x64xbf16>
    %cst_133 = arith.constant dense<0.000000e+00> : vector<16x32xf32>
    %446 = tpu.matmul %445, %437, %cst_133 {dimension_numbers = #tpu.dot_dimension_numbers<[1], [0], [0], [1], [0, 0, 1, 1], [], []>} : vector<16x64xbf16>, vector<64x32xbf16>, vector<16x32xf32> -> vector<16x32xf32>
    %447 = arith.addf %411, %446 : vector<16x32xf32>
    %c8 = arith.constant 8 : index
    %c0_134 = arith.constant 0 : index
    %448 = vector.load %arg7[%c8, %c0_134] : memref<32x128xf32, #tpu.memory_space<vmem>>, vector<1x32xf32>
    %449 = vector.broadcast %448 : vector<1x32xf32> to vector<16x32xf32>
    %450 = arith.addf %447, %449 : vector<16x32xf32>
    %c21 = arith.constant 21 : index
    %c0_135 = arith.constant 0 : index
    %451 = vector.load %arg7[%c21, %c0_135] : memref<32x128xf32, #tpu.memory_space<vmem>>, vector<1x32xf32>
    %c22 = arith.constant 22 : index
    %c0_136 = arith.constant 0 : index
    %452 = vector.load %arg7[%c22, %c0_136] : memref<32x128xf32, #tpu.memory_space<vmem>>, vector<1x32xf32>
    %cst_137 = arith.constant dense<0.000000e+00> : vector<16xf32>
    %453 = vector.multi_reduction <add>, %450, %cst_137 [1] : vector<16x32xf32> to vector<16xf32>
    %454 = vector.shape_cast %453 : vector<16xf32> to vector<16x1xf32>
    %cst_138 = arith.constant 3.200000e+01 : f32
    %455 = vector.broadcast %cst_138 : f32 to vector<16x1xf32>
    %456 = arith.divf %454, %455 : vector<16x1xf32>
    %457 = vector.broadcast %456 : vector<16x1xf32> to vector<16x32xf32>
    %458 = arith.subf %450, %457 : vector<16x32xf32>
    %459 = arith.mulf %458, %458 : vector<16x32xf32>
    %cst_139 = arith.constant dense<0.000000e+00> : vector<16xf32>
    %460 = vector.multi_reduction <add>, %459, %cst_139 [1] : vector<16x32xf32> to vector<16xf32>
    %461 = vector.shape_cast %460 : vector<16xf32> to vector<16x1xf32>
    %cst_140 = arith.constant 3.200000e+01 : f32
    %462 = vector.broadcast %cst_140 : f32 to vector<16x1xf32>
    %463 = arith.divf %461, %462 : vector<16x1xf32>
    %464 = vector.broadcast %456 : vector<16x1xf32> to vector<16x32xf32>
    %465 = arith.subf %450, %464 : vector<16x32xf32>
    %cst_141 = arith.constant 9.99999974E-6 : f32
    %466 = vector.broadcast %cst_141 : f32 to vector<16x1xf32>
    %467 = arith.addf %463, %466 : vector<16x1xf32>
    %468 = math.rsqrt %467 : vector<16x1xf32>
    %469 = vector.broadcast %468 : vector<16x1xf32> to vector<16x32xf32>
    %470 = arith.mulf %465, %469 : vector<16x32xf32>
    %471 = vector.broadcast %451 : vector<1x32xf32> to vector<16x32xf32>
    %472 = arith.mulf %470, %471 : vector<16x32xf32>
    %473 = vector.broadcast %452 : vector<1x32xf32> to vector<16x32xf32>
    %474 = arith.addf %472, %473 : vector<16x32xf32>
    %c224_142 = arith.constant 224 : index
    %c0_143 = arith.constant 0 : index
    %475 = vector.load %arg6[%c224_142, %c0_143] : memref<448x128xbf16, #tpu.memory_space<vmem>>, vector<32x96xbf16>
    %476 = arith.truncf %474 : vector<16x32xf32> to vector<16x32xbf16>
    %cst_144 = arith.constant dense<0.000000e+00> : vector<16x96xf32>
    %477 = tpu.matmul %476, %475, %cst_144 {dimension_numbers = #tpu.dot_dimension_numbers<[1], [0], [0], [1], [0, 0, 1, 1], [], []>} : vector<16x32xbf16>, vector<32x96xbf16>, vector<16x96xf32> -> vector<16x96xf32>
    %c15 = arith.constant 15 : index
    %c0_145 = arith.constant 0 : index
    %478 = vector.load %arg7[%c15, %c0_145] : memref<32x128xf32, #tpu.memory_space<vmem>>, vector<1x96xf32>
    %479 = vector.broadcast %478 : vector<1x96xf32> to vector<16x96xf32>
    %480 = arith.addf %477, %479 : vector<16x96xf32>
    %481 = vector.extract_strided_slice %480 {offsets = [0, 0], sizes = [8, 8], strides = [1, 1]} : vector<16x96xf32> to vector<8x8xf32>
    %482 = vector.extract_strided_slice %480 {offsets = [8, 0], sizes = [8, 8], strides = [1, 1]} : vector<16x96xf32> to vector<8x8xf32>
    %483 = vector.extract_strided_slice %480 {offsets = [0, 8], sizes = [8, 8], strides = [1, 1]} : vector<16x96xf32> to vector<8x8xf32>
    %484 = vector.extract_strided_slice %480 {offsets = [8, 8], sizes = [8, 8], strides = [1, 1]} : vector<16x96xf32> to vector<8x8xf32>
    %485 = vector.extract_strided_slice %480 {offsets = [0, 16], sizes = [8, 8], strides = [1, 1]} : vector<16x96xf32> to vector<8x8xf32>
    %486 = vector.extract_strided_slice %480 {offsets = [8, 16], sizes = [8, 8], strides = [1, 1]} : vector<16x96xf32> to vector<8x8xf32>
    %487 = vector.extract_strided_slice %480 {offsets = [0, 24], sizes = [8, 8], strides = [1, 1]} : vector<16x96xf32> to vector<8x8xf32>
    %488 = vector.extract_strided_slice %480 {offsets = [8, 24], sizes = [8, 8], strides = [1, 1]} : vector<16x96xf32> to vector<8x8xf32>
    %489 = vector.shape_cast %481 : vector<8x8xf32> to vector<1x8x8xf32>
    %490 = vector.shape_cast %482 : vector<8x8xf32> to vector<1x8x8xf32>
    %491 = vector.shape_cast %483 : vector<8x8xf32> to vector<1x8x8xf32>
    %492 = vector.shape_cast %484 : vector<8x8xf32> to vector<1x8x8xf32>
    %493 = vector.shape_cast %485 : vector<8x8xf32> to vector<1x8x8xf32>
    %494 = vector.shape_cast %486 : vector<8x8xf32> to vector<1x8x8xf32>
    %495 = vector.shape_cast %487 : vector<8x8xf32> to vector<1x8x8xf32>
    %496 = vector.shape_cast %488 : vector<8x8xf32> to vector<1x8x8xf32>
    %497 = tpu.concatenate %489, %490, %491, %492, %493, %494, %495, %496 in 0 : vector<1x8x8xf32>, vector<1x8x8xf32>, vector<1x8x8xf32>, vector<1x8x8xf32>, vector<1x8x8xf32>, vector<1x8x8xf32>, vector<1x8x8xf32>, vector<1x8x8xf32> -> vector<8x8x8xf32>
    %498 = vector.extract_strided_slice %480 {offsets = [0, 32], sizes = [8, 8], strides = [1, 1]} : vector<16x96xf32> to vector<8x8xf32>
    %499 = vector.extract_strided_slice %480 {offsets = [8, 32], sizes = [8, 8], strides = [1, 1]} : vector<16x96xf32> to vector<8x8xf32>
    %500 = vector.extract_strided_slice %480 {offsets = [0, 40], sizes = [8, 8], strides = [1, 1]} : vector<16x96xf32> to vector<8x8xf32>
    %501 = vector.extract_strided_slice %480 {offsets = [8, 40], sizes = [8, 8], strides = [1, 1]} : vector<16x96xf32> to vector<8x8xf32>
    %502 = vector.extract_strided_slice %480 {offsets = [0, 48], sizes = [8, 8], strides = [1, 1]} : vector<16x96xf32> to vector<8x8xf32>
    %503 = vector.extract_strided_slice %480 {offsets = [8, 48], sizes = [8, 8], strides = [1, 1]} : vector<16x96xf32> to vector<8x8xf32>
    %504 = vector.extract_strided_slice %480 {offsets = [0, 56], sizes = [8, 8], strides = [1, 1]} : vector<16x96xf32> to vector<8x8xf32>
    %505 = vector.extract_strided_slice %480 {offsets = [8, 56], sizes = [8, 8], strides = [1, 1]} : vector<16x96xf32> to vector<8x8xf32>
    %506 = vector.shape_cast %498 : vector<8x8xf32> to vector<1x8x8xf32>
    %507 = vector.shape_cast %499 : vector<8x8xf32> to vector<1x8x8xf32>
    %508 = vector.shape_cast %500 : vector<8x8xf32> to vector<1x8x8xf32>
    %509 = vector.shape_cast %501 : vector<8x8xf32> to vector<1x8x8xf32>
    %510 = vector.shape_cast %502 : vector<8x8xf32> to vector<1x8x8xf32>
    %511 = vector.shape_cast %503 : vector<8x8xf32> to vector<1x8x8xf32>
    %512 = vector.shape_cast %504 : vector<8x8xf32> to vector<1x8x8xf32>
    %513 = vector.shape_cast %505 : vector<8x8xf32> to vector<1x8x8xf32>
    %514 = tpu.concatenate %506, %507, %508, %509, %510, %511, %512, %513 in 0 : vector<1x8x8xf32>, vector<1x8x8xf32>, vector<1x8x8xf32>, vector<1x8x8xf32>, vector<1x8x8xf32>, vector<1x8x8xf32>, vector<1x8x8xf32>, vector<1x8x8xf32> -> vector<8x8x8xf32>
    %515 = vector.extract_strided_slice %480 {offsets = [0, 64], sizes = [8, 8], strides = [1, 1]} : vector<16x96xf32> to vector<8x8xf32>
    %516 = vector.extract_strided_slice %480 {offsets = [8, 64], sizes = [8, 8], strides = [1, 1]} : vector<16x96xf32> to vector<8x8xf32>
    %517 = vector.extract_strided_slice %480 {offsets = [0, 72], sizes = [8, 8], strides = [1, 1]} : vector<16x96xf32> to vector<8x8xf32>
    %518 = vector.extract_strided_slice %480 {offsets = [8, 72], sizes = [8, 8], strides = [1, 1]} : vector<16x96xf32> to vector<8x8xf32>
    %519 = vector.extract_strided_slice %480 {offsets = [0, 80], sizes = [8, 8], strides = [1, 1]} : vector<16x96xf32> to vector<8x8xf32>
    %520 = vector.extract_strided_slice %480 {offsets = [8, 80], sizes = [8, 8], strides = [1, 1]} : vector<16x96xf32> to vector<8x8xf32>
    %521 = vector.extract_strided_slice %480 {offsets = [0, 88], sizes = [8, 8], strides = [1, 1]} : vector<16x96xf32> to vector<8x8xf32>
    %522 = vector.extract_strided_slice %480 {offsets = [8, 88], sizes = [8, 8], strides = [1, 1]} : vector<16x96xf32> to vector<8x8xf32>
    %523 = vector.shape_cast %515 : vector<8x8xf32> to vector<1x8x8xf32>
    %524 = vector.shape_cast %516 : vector<8x8xf32> to vector<1x8x8xf32>
    %525 = vector.shape_cast %517 : vector<8x8xf32> to vector<1x8x8xf32>
    %526 = vector.shape_cast %518 : vector<8x8xf32> to vector<1x8x8xf32>
    %527 = vector.shape_cast %519 : vector<8x8xf32> to vector<1x8x8xf32>
    %528 = vector.shape_cast %520 : vector<8x8xf32> to vector<1x8x8xf32>
    %529 = vector.shape_cast %521 : vector<8x8xf32> to vector<1x8x8xf32>
    %530 = vector.shape_cast %522 : vector<8x8xf32> to vector<1x8x8xf32>
    %531 = tpu.concatenate %523, %524, %525, %526, %527, %528, %529, %530 in 0 : vector<1x8x8xf32>, vector<1x8x8xf32>, vector<1x8x8xf32>, vector<1x8x8xf32>, vector<1x8x8xf32>, vector<1x8x8xf32>, vector<1x8x8xf32>, vector<1x8x8xf32> -> vector<8x8x8xf32>
    %532 = arith.truncf %497 : vector<8x8x8xf32> to vector<8x8x8xbf16>
    %533 = arith.truncf %514 : vector<8x8x8xf32> to vector<8x8x8xbf16>
    "tpu.trace_start"() <{level = 10 : i32, message = "zqd,zkd->zqk"}> : () -> ()
    %cst_146 = arith.constant dense<0.000000e+00> : vector<8x8x8xf32>
    %534 = tpu.matmul %532, %533, %cst_146 {dimension_numbers = #tpu.dot_dimension_numbers<[2], [2], [1], [1], [0, 0, 0, 1, 1, 1], [0], [0]>} : vector<8x8x8xbf16>, vector<8x8x8xbf16>, vector<8x8x8xf32> -> vector<8x8x8xf32>
    "tpu.trace_stop"() : () -> ()
    %cst_147 = arith.constant 0.353553385 : f32
    %535 = vector.broadcast %cst_147 : f32 to vector<8x8x8xf32>
    %536 = arith.mulf %534, %535 : vector<8x8x8xf32>
    %537 = arith.addf %536, %125 : vector<8x8x8xf32>
    %cst_148 = arith.constant dense<0xFF800000> : vector<8x8xf32>
    %538 = vector.multi_reduction <maximumf>, %537, %cst_148 [2] : vector<8x8x8xf32> to vector<8x8xf32>
    %539 = vector.shape_cast %538 : vector<8x8xf32> to vector<8x8x1xf32>
    %540 = vector.broadcast %539 : vector<8x8x1xf32> to vector<8x8x8xf32>
    %541 = arith.subf %537, %540 : vector<8x8x8xf32>
    %542 = math.exp %541 : vector<8x8x8xf32>
    %cst_149 = arith.constant dense<0.000000e+00> : vector<8x8xf32>
    %543 = vector.multi_reduction <add>, %542, %cst_149 [2] : vector<8x8x8xf32> to vector<8x8xf32>
    %544 = vector.shape_cast %543 : vector<8x8xf32> to vector<8x8x1xf32>
    %545 = tpu.reciprocal %544 {approx = true} : vector<8x8x1xf32> -> vector<8x8x1xf32>
    %546 = vector.broadcast %545 : vector<8x8x1xf32> to vector<8x8x8xf32>
    %547 = arith.mulf %542, %546 : vector<8x8x8xf32>
    %548 = arith.truncf %547 : vector<8x8x8xf32> to vector<8x8x8xbf16>
    %549 = arith.truncf %531 : vector<8x8x8xf32> to vector<8x8x8xbf16>
    "tpu.trace_start"() <{level = 10 : i32, message = "zqk,zkd->zqd"}> : () -> ()
    %cst_150 = arith.constant dense<0.000000e+00> : vector<8x8x8xf32>
    %550 = tpu.matmul %548, %549, %cst_150 {dimension_numbers = #tpu.dot_dimension_numbers<[2], [1], [1], [2], [0, 0, 0, 1, 1, 2], [0], [0]>} : vector<8x8x8xbf16>, vector<8x8x8xbf16>, vector<8x8x8xf32> -> vector<8x8x8xf32>
    "tpu.trace_stop"() : () -> ()
    %c16_151 = arith.constant 16 : index
    %c0_152 = arith.constant 0 : index
    %551 = vector.load %arg7[%c16_151, %c0_152] : memref<32x128xf32, #tpu.memory_space<vmem>>, vector<1x32xf32>
    %552 = vector.extract_strided_slice %550 {offsets = [0, 0, 0], sizes = [1, 8, 8], strides = [1, 1, 1]} : vector<8x8x8xf32> to vector<1x8x8xf32>
    %553 = vector.shape_cast %552 : vector<1x8x8xf32> to vector<8x8xf32>
    %554 = vector.extract_strided_slice %550 {offsets = [1, 0, 0], sizes = [1, 8, 8], strides = [1, 1, 1]} : vector<8x8x8xf32> to vector<1x8x8xf32>
    %555 = vector.shape_cast %554 : vector<1x8x8xf32> to vector<8x8xf32>
    %556 = tpu.concatenate %553, %555 in 0 : vector<8x8xf32>, vector<8x8xf32> -> vector<16x8xf32>
    %c256_153 = arith.constant 256 : index
    %c0_154 = arith.constant 0 : index
    %557 = vector.load %arg6[%c256_153, %c0_154] : memref<448x128xbf16, #tpu.memory_space<vmem>>, vector<8x32xbf16>
    %558 = arith.truncf %556 : vector<16x8xf32> to vector<16x8xbf16>
    %cst_155 = arith.constant dense<0.000000e+00> : vector<16x32xf32>
    %559 = tpu.matmul %558, %557, %cst_155 {dimension_numbers = #tpu.dot_dimension_numbers<[1], [0], [0], [1], [0, 0, 1, 1], [], []>} : vector<16x8xbf16>, vector<8x32xbf16>, vector<16x32xf32> -> vector<16x32xf32>
    %560 = vector.broadcast %551 : vector<1x32xf32> to vector<16x32xf32>
    %561 = arith.addf %560, %559 : vector<16x32xf32>
    %562 = vector.extract_strided_slice %550 {offsets = [2, 0, 0], sizes = [1, 8, 8], strides = [1, 1, 1]} : vector<8x8x8xf32> to vector<1x8x8xf32>
    %563 = vector.shape_cast %562 : vector<1x8x8xf32> to vector<8x8xf32>
    %564 = vector.extract_strided_slice %550 {offsets = [3, 0, 0], sizes = [1, 8, 8], strides = [1, 1, 1]} : vector<8x8x8xf32> to vector<1x8x8xf32>
    %565 = vector.shape_cast %564 : vector<1x8x8xf32> to vector<8x8xf32>
    %566 = tpu.concatenate %563, %565 in 0 : vector<8x8xf32>, vector<8x8xf32> -> vector<16x8xf32>
    %c264 = arith.constant 264 : index
    %c0_156 = arith.constant 0 : index
    %567 = vector.load %arg6[%c264, %c0_156] : memref<448x128xbf16, #tpu.memory_space<vmem>>, vector<8x32xbf16>
    %568 = arith.truncf %566 : vector<16x8xf32> to vector<16x8xbf16>
    %cst_157 = arith.constant dense<0.000000e+00> : vector<16x32xf32>
    %569 = tpu.matmul %568, %567, %cst_157 {dimension_numbers = #tpu.dot_dimension_numbers<[1], [0], [0], [1], [0, 0, 1, 1], [], []>} : vector<16x8xbf16>, vector<8x32xbf16>, vector<16x32xf32> -> vector<16x32xf32>
    %570 = arith.addf %561, %569 : vector<16x32xf32>
    %571 = vector.extract_strided_slice %550 {offsets = [4, 0, 0], sizes = [1, 8, 8], strides = [1, 1, 1]} : vector<8x8x8xf32> to vector<1x8x8xf32>
    %572 = vector.shape_cast %571 : vector<1x8x8xf32> to vector<8x8xf32>
    %573 = vector.extract_strided_slice %550 {offsets = [5, 0, 0], sizes = [1, 8, 8], strides = [1, 1, 1]} : vector<8x8x8xf32> to vector<1x8x8xf32>
    %574 = vector.shape_cast %573 : vector<1x8x8xf32> to vector<8x8xf32>
    %575 = tpu.concatenate %572, %574 in 0 : vector<8x8xf32>, vector<8x8xf32> -> vector<16x8xf32>
    %c272 = arith.constant 272 : index
    %c0_158 = arith.constant 0 : index
    %576 = vector.load %arg6[%c272, %c0_158] : memref<448x128xbf16, #tpu.memory_space<vmem>>, vector<8x32xbf16>
    %577 = arith.truncf %575 : vector<16x8xf32> to vector<16x8xbf16>
    %cst_159 = arith.constant dense<0.000000e+00> : vector<16x32xf32>
    %578 = tpu.matmul %577, %576, %cst_159 {dimension_numbers = #tpu.dot_dimension_numbers<[1], [0], [0], [1], [0, 0, 1, 1], [], []>} : vector<16x8xbf16>, vector<8x32xbf16>, vector<16x32xf32> -> vector<16x32xf32>
    %579 = arith.addf %570, %578 : vector<16x32xf32>
    %580 = vector.extract_strided_slice %550 {offsets = [6, 0, 0], sizes = [1, 8, 8], strides = [1, 1, 1]} : vector<8x8x8xf32> to vector<1x8x8xf32>
    %581 = vector.shape_cast %580 : vector<1x8x8xf32> to vector<8x8xf32>
    %582 = vector.extract_strided_slice %550 {offsets = [7, 0, 0], sizes = [1, 8, 8], strides = [1, 1, 1]} : vector<8x8x8xf32> to vector<1x8x8xf32>
    %583 = vector.shape_cast %582 : vector<1x8x8xf32> to vector<8x8xf32>
    %584 = tpu.concatenate %581, %583 in 0 : vector<8x8xf32>, vector<8x8xf32> -> vector<16x8xf32>
    %c280 = arith.constant 280 : index
    %c0_160 = arith.constant 0 : index
    %585 = vector.load %arg6[%c280, %c0_160] : memref<448x128xbf16, #tpu.memory_space<vmem>>, vector<8x32xbf16>
    %586 = arith.truncf %584 : vector<16x8xf32> to vector<16x8xbf16>
    %cst_161 = arith.constant dense<0.000000e+00> : vector<16x32xf32>
    %587 = tpu.matmul %586, %585, %cst_161 {dimension_numbers = #tpu.dot_dimension_numbers<[1], [0], [0], [1], [0, 0, 1, 1], [], []>} : vector<16x8xbf16>, vector<8x32xbf16>, vector<16x32xf32> -> vector<16x32xf32>
    %588 = arith.addf %579, %587 : vector<16x32xf32>
    %589 = arith.addf %450, %588 : vector<16x32xf32>
    %c23 = arith.constant 23 : index
    %c0_162 = arith.constant 0 : index
    %590 = vector.load %arg7[%c23, %c0_162] : memref<32x128xf32, #tpu.memory_space<vmem>>, vector<1x32xf32>
    %c24 = arith.constant 24 : index
    %c0_163 = arith.constant 0 : index
    %591 = vector.load %arg7[%c24, %c0_163] : memref<32x128xf32, #tpu.memory_space<vmem>>, vector<1x32xf32>
    %cst_164 = arith.constant dense<0.000000e+00> : vector<16xf32>
    %592 = vector.multi_reduction <add>, %589, %cst_164 [1] : vector<16x32xf32> to vector<16xf32>
    %593 = vector.shape_cast %592 : vector<16xf32> to vector<16x1xf32>
    %cst_165 = arith.constant 3.200000e+01 : f32
    %594 = vector.broadcast %cst_165 : f32 to vector<16x1xf32>
    %595 = arith.divf %593, %594 : vector<16x1xf32>
    %596 = vector.broadcast %595 : vector<16x1xf32> to vector<16x32xf32>
    %597 = arith.subf %589, %596 : vector<16x32xf32>
    %598 = arith.mulf %597, %597 : vector<16x32xf32>
    %cst_166 = arith.constant dense<0.000000e+00> : vector<16xf32>
    %599 = vector.multi_reduction <add>, %598, %cst_166 [1] : vector<16x32xf32> to vector<16xf32>
    %600 = vector.shape_cast %599 : vector<16xf32> to vector<16x1xf32>
    %cst_167 = arith.constant 3.200000e+01 : f32
    %601 = vector.broadcast %cst_167 : f32 to vector<16x1xf32>
    %602 = arith.divf %600, %601 : vector<16x1xf32>
    %603 = vector.broadcast %595 : vector<16x1xf32> to vector<16x32xf32>
    %604 = arith.subf %589, %603 : vector<16x32xf32>
    %cst_168 = arith.constant 9.99999974E-6 : f32
    %605 = vector.broadcast %cst_168 : f32 to vector<16x1xf32>
    %606 = arith.addf %602, %605 : vector<16x1xf32>
    %607 = math.rsqrt %606 : vector<16x1xf32>
    %608 = vector.broadcast %607 : vector<16x1xf32> to vector<16x32xf32>
    %609 = arith.mulf %604, %608 : vector<16x32xf32>
    %610 = vector.broadcast %590 : vector<1x32xf32> to vector<16x32xf32>
    %611 = arith.mulf %609, %610 : vector<16x32xf32>
    %612 = vector.broadcast %591 : vector<1x32xf32> to vector<16x32xf32>
    %613 = arith.addf %611, %612 : vector<16x32xf32>
    %c288_169 = arith.constant 288 : index
    %c0_170 = arith.constant 0 : index
    %614 = vector.load %arg6[%c288_169, %c0_170] : memref<448x128xbf16, #tpu.memory_space<vmem>>, vector<32x96xbf16>
    %c17 = arith.constant 17 : index
    %c0_171 = arith.constant 0 : index
    %615 = vector.load %arg7[%c17, %c0_171] : memref<32x128xf32, #tpu.memory_space<vmem>>, vector<1x96xf32>
    %616 = vector.extract_strided_slice %614 {offsets = [0, 0], sizes = [32, 32], strides = [1, 1]} : vector<32x96xbf16> to vector<32x32xbf16>
    %617 = arith.truncf %613 : vector<16x32xf32> to vector<16x32xbf16>
    %cst_172 = arith.constant dense<0.000000e+00> : vector<16x32xf32>
    %618 = tpu.matmul %617, %616, %cst_172 {dimension_numbers = #tpu.dot_dimension_numbers<[1], [0], [0], [1], [0, 0, 1, 1], [], []>} : vector<16x32xbf16>, vector<32x32xbf16>, vector<16x32xf32> -> vector<16x32xf32>
    %619 = vector.extract_strided_slice %615 {offsets = [0, 0], sizes = [1, 32], strides = [1, 1]} : vector<1x96xf32> to vector<1x32xf32>
    %620 = vector.broadcast %619 : vector<1x32xf32> to vector<16x32xf32>
    %621 = arith.addf %618, %620 : vector<16x32xf32>
    %622 = vector.extract_strided_slice %614 {offsets = [0, 32], sizes = [32, 64], strides = [1, 1]} : vector<32x96xbf16> to vector<32x64xbf16>
    %623 = arith.truncf %116 : vector<32x32xf32> to vector<32x32xbf16>
    %cst_173 = arith.constant dense<0.000000e+00> : vector<32x64xf32>
    %624 = tpu.matmul %623, %622, %cst_173 {dimension_numbers = #tpu.dot_dimension_numbers<[1], [0], [0], [1], [0, 0, 1, 1], [], []>} : vector<32x32xbf16>, vector<32x64xbf16>, vector<32x64xf32> -> vector<32x64xf32>
    %625 = vector.extract_strided_slice %615 {offsets = [0, 32], sizes = [1, 64], strides = [1, 1]} : vector<1x96xf32> to vector<1x64xf32>
    %626 = vector.broadcast %625 : vector<1x64xf32> to vector<32x64xf32>
    %627 = arith.addf %624, %626 : vector<32x64xf32>
    %628 = vector.extract_strided_slice %621 {offsets = [0, 0], sizes = [8, 8], strides = [1, 1]} : vector<16x32xf32> to vector<8x8xf32>
    %629 = vector.extract_strided_slice %621 {offsets = [8, 0], sizes = [8, 8], strides = [1, 1]} : vector<16x32xf32> to vector<8x8xf32>
    %630 = vector.extract_strided_slice %621 {offsets = [0, 8], sizes = [8, 8], strides = [1, 1]} : vector<16x32xf32> to vector<8x8xf32>
    %631 = vector.extract_strided_slice %621 {offsets = [8, 8], sizes = [8, 8], strides = [1, 1]} : vector<16x32xf32> to vector<8x8xf32>
    %632 = vector.extract_strided_slice %621 {offsets = [0, 16], sizes = [8, 8], strides = [1, 1]} : vector<16x32xf32> to vector<8x8xf32>
    %633 = vector.extract_strided_slice %621 {offsets = [8, 16], sizes = [8, 8], strides = [1, 1]} : vector<16x32xf32> to vector<8x8xf32>
    %634 = vector.extract_strided_slice %621 {offsets = [0, 24], sizes = [8, 8], strides = [1, 1]} : vector<16x32xf32> to vector<8x8xf32>
    %635 = vector.extract_strided_slice %621 {offsets = [8, 24], sizes = [8, 8], strides = [1, 1]} : vector<16x32xf32> to vector<8x8xf32>
    %636 = vector.shape_cast %628 : vector<8x8xf32> to vector<1x8x8xf32>
    %637 = vector.shape_cast %629 : vector<8x8xf32> to vector<1x8x8xf32>
    %638 = vector.shape_cast %630 : vector<8x8xf32> to vector<1x8x8xf32>
    %639 = vector.shape_cast %631 : vector<8x8xf32> to vector<1x8x8xf32>
    %640 = vector.shape_cast %632 : vector<8x8xf32> to vector<1x8x8xf32>
    %641 = vector.shape_cast %633 : vector<8x8xf32> to vector<1x8x8xf32>
    %642 = vector.shape_cast %634 : vector<8x8xf32> to vector<1x8x8xf32>
    %643 = vector.shape_cast %635 : vector<8x8xf32> to vector<1x8x8xf32>
    %644 = tpu.concatenate %636, %637, %638, %639, %640, %641, %642, %643 in 0 : vector<1x8x8xf32>, vector<1x8x8xf32>, vector<1x8x8xf32>, vector<1x8x8xf32>, vector<1x8x8xf32>, vector<1x8x8xf32>, vector<1x8x8xf32>, vector<1x8x8xf32> -> vector<8x8x8xf32>
    %645 = vector.extract_strided_slice %627 {offsets = [0, 0], sizes = [16, 8], strides = [1, 1]} : vector<32x64xf32> to vector<16x8xf32>
    %646 = vector.extract_strided_slice %627 {offsets = [16, 0], sizes = [16, 8], strides = [1, 1]} : vector<32x64xf32> to vector<16x8xf32>
    %647 = vector.extract_strided_slice %627 {offsets = [0, 8], sizes = [16, 8], strides = [1, 1]} : vector<32x64xf32> to vector<16x8xf32>
    %648 = vector.extract_strided_slice %627 {offsets = [16, 8], sizes = [16, 8], strides = [1, 1]} : vector<32x64xf32> to vector<16x8xf32>
    %649 = vector.extract_strided_slice %627 {offsets = [0, 16], sizes = [16, 8], strides = [1, 1]} : vector<32x64xf32> to vector<16x8xf32>
    %650 = vector.extract_strided_slice %627 {offsets = [16, 16], sizes = [16, 8], strides = [1, 1]} : vector<32x64xf32> to vector<16x8xf32>
    %651 = vector.extract_strided_slice %627 {offsets = [0, 24], sizes = [16, 8], strides = [1, 1]} : vector<32x64xf32> to vector<16x8xf32>
    %652 = vector.extract_strided_slice %627 {offsets = [16, 24], sizes = [16, 8], strides = [1, 1]} : vector<32x64xf32> to vector<16x8xf32>
    %653 = vector.shape_cast %645 : vector<16x8xf32> to vector<1x16x8xf32>
    %654 = vector.shape_cast %646 : vector<16x8xf32> to vector<1x16x8xf32>
    %655 = vector.shape_cast %647 : vector<16x8xf32> to vector<1x16x8xf32>
    %656 = vector.shape_cast %648 : vector<16x8xf32> to vector<1x16x8xf32>
    %657 = vector.shape_cast %649 : vector<16x8xf32> to vector<1x16x8xf32>
    %658 = vector.shape_cast %650 : vector<16x8xf32> to vector<1x16x8xf32>
    %659 = vector.shape_cast %651 : vector<16x8xf32> to vector<1x16x8xf32>
    %660 = vector.shape_cast %652 : vector<16x8xf32> to vector<1x16x8xf32>
    %661 = tpu.concatenate %653, %654, %655, %656, %657, %658, %659, %660 in 0 : vector<1x16x8xf32>, vector<1x16x8xf32>, vector<1x16x8xf32>, vector<1x16x8xf32>, vector<1x16x8xf32>, vector<1x16x8xf32>, vector<1x16x8xf32>, vector<1x16x8xf32> -> vector<8x16x8xf32>
    %662 = vector.extract_strided_slice %627 {offsets = [0, 32], sizes = [16, 8], strides = [1, 1]} : vector<32x64xf32> to vector<16x8xf32>
    %663 = vector.extract_strided_slice %627 {offsets = [16, 32], sizes = [16, 8], strides = [1, 1]} : vector<32x64xf32> to vector<16x8xf32>
    %664 = vector.extract_strided_slice %627 {offsets = [0, 40], sizes = [16, 8], strides = [1, 1]} : vector<32x64xf32> to vector<16x8xf32>
    %665 = vector.extract_strided_slice %627 {offsets = [16, 40], sizes = [16, 8], strides = [1, 1]} : vector<32x64xf32> to vector<16x8xf32>
    %666 = vector.extract_strided_slice %627 {offsets = [0, 48], sizes = [16, 8], strides = [1, 1]} : vector<32x64xf32> to vector<16x8xf32>
    %667 = vector.extract_strided_slice %627 {offsets = [16, 48], sizes = [16, 8], strides = [1, 1]} : vector<32x64xf32> to vector<16x8xf32>
    %668 = vector.extract_strided_slice %627 {offsets = [0, 56], sizes = [16, 8], strides = [1, 1]} : vector<32x64xf32> to vector<16x8xf32>
    %669 = vector.extract_strided_slice %627 {offsets = [16, 56], sizes = [16, 8], strides = [1, 1]} : vector<32x64xf32> to vector<16x8xf32>
    %670 = vector.shape_cast %662 : vector<16x8xf32> to vector<1x16x8xf32>
    %671 = vector.shape_cast %663 : vector<16x8xf32> to vector<1x16x8xf32>
    %672 = vector.shape_cast %664 : vector<16x8xf32> to vector<1x16x8xf32>
    %673 = vector.shape_cast %665 : vector<16x8xf32> to vector<1x16x8xf32>
    %674 = vector.shape_cast %666 : vector<16x8xf32> to vector<1x16x8xf32>
    %675 = vector.shape_cast %667 : vector<16x8xf32> to vector<1x16x8xf32>
    %676 = vector.shape_cast %668 : vector<16x8xf32> to vector<1x16x8xf32>
    %677 = vector.shape_cast %669 : vector<16x8xf32> to vector<1x16x8xf32>
    %678 = tpu.concatenate %670, %671, %672, %673, %674, %675, %676, %677 in 0 : vector<1x16x8xf32>, vector<1x16x8xf32>, vector<1x16x8xf32>, vector<1x16x8xf32>, vector<1x16x8xf32>, vector<1x16x8xf32>, vector<1x16x8xf32>, vector<1x16x8xf32> -> vector<8x16x8xf32>
    %679 = arith.truncf %644 : vector<8x8x8xf32> to vector<8x8x8xbf16>
    %680 = arith.truncf %661 : vector<8x16x8xf32> to vector<8x16x8xbf16>
    "tpu.trace_start"() <{level = 10 : i32, message = "zqd,zkd->zqk"}> : () -> ()
    %cst_174 = arith.constant dense<0.000000e+00> : vector<8x8x16xf32>
    %681 = tpu.matmul %679, %680, %cst_174 {dimension_numbers = #tpu.dot_dimension_numbers<[2], [2], [1], [1], [0, 0, 0, 1, 1, 1], [0], [0]>} : vector<8x8x8xbf16>, vector<8x16x8xbf16>, vector<8x8x16xf32> -> vector<8x8x16xf32>
    "tpu.trace_stop"() : () -> ()
    %cst_175 = arith.constant 0.353553385 : f32
    %682 = vector.broadcast %cst_175 : f32 to vector<8x8x16xf32>
    %683 = arith.mulf %681, %682 : vector<8x8x16xf32>
    %cst_176 = arith.constant dense<0xFF800000> : vector<8x8xf32>
    %684 = vector.multi_reduction <maximumf>, %683, %cst_176 [2] : vector<8x8x16xf32> to vector<8x8xf32>
    %685 = vector.shape_cast %684 : vector<8x8xf32> to vector<8x8x1xf32>
    %686 = vector.broadcast %685 : vector<8x8x1xf32> to vector<8x8x16xf32>
    %687 = arith.subf %683, %686 : vector<8x8x16xf32>
    %688 = math.exp %687 : vector<8x8x16xf32>
    %cst_177 = arith.constant dense<0.000000e+00> : vector<8x8xf32>
    %689 = vector.multi_reduction <add>, %688, %cst_177 [2] : vector<8x8x16xf32> to vector<8x8xf32>
    %690 = vector.shape_cast %689 : vector<8x8xf32> to vector<8x8x1xf32>
    %691 = tpu.reciprocal %690 {approx = true} : vector<8x8x1xf32> -> vector<8x8x1xf32>
    %692 = vector.broadcast %691 : vector<8x8x1xf32> to vector<8x8x16xf32>
    %693 = arith.mulf %688, %692 : vector<8x8x16xf32>
    %694 = arith.truncf %693 : vector<8x8x16xf32> to vector<8x8x16xbf16>
    %695 = arith.truncf %678 : vector<8x16x8xf32> to vector<8x16x8xbf16>
    "tpu.trace_start"() <{level = 10 : i32, message = "zqk,zkd->zqd"}> : () -> ()
    %cst_178 = arith.constant dense<0.000000e+00> : vector<8x8x8xf32>
    %696 = tpu.matmul %694, %695, %cst_178 {dimension_numbers = #tpu.dot_dimension_numbers<[2], [1], [1], [2], [0, 0, 0, 1, 1, 2], [0], [0]>} : vector<8x8x16xbf16>, vector<8x16x8xbf16>, vector<8x8x8xf32> -> vector<8x8x8xf32>
    "tpu.trace_stop"() : () -> ()
    %c18 = arith.constant 18 : index
    %c0_179 = arith.constant 0 : index
    %697 = vector.load %arg7[%c18, %c0_179] : memref<32x128xf32, #tpu.memory_space<vmem>>, vector<1x32xf32>
    %698 = vector.extract_strided_slice %696 {offsets = [0, 0, 0], sizes = [1, 8, 8], strides = [1, 1, 1]} : vector<8x8x8xf32> to vector<1x8x8xf32>
    %699 = vector.shape_cast %698 : vector<1x8x8xf32> to vector<8x8xf32>
    %700 = vector.extract_strided_slice %696 {offsets = [1, 0, 0], sizes = [1, 8, 8], strides = [1, 1, 1]} : vector<8x8x8xf32> to vector<1x8x8xf32>
    %701 = vector.shape_cast %700 : vector<1x8x8xf32> to vector<8x8xf32>
    %702 = tpu.concatenate %699, %701 in 0 : vector<8x8xf32>, vector<8x8xf32> -> vector<16x8xf32>
    %c320 = arith.constant 320 : index
    %c0_180 = arith.constant 0 : index
    %703 = vector.load %arg6[%c320, %c0_180] : memref<448x128xbf16, #tpu.memory_space<vmem>>, vector<8x32xbf16>
    %704 = arith.truncf %702 : vector<16x8xf32> to vector<16x8xbf16>
    %cst_181 = arith.constant dense<0.000000e+00> : vector<16x32xf32>
    %705 = tpu.matmul %704, %703, %cst_181 {dimension_numbers = #tpu.dot_dimension_numbers<[1], [0], [0], [1], [0, 0, 1, 1], [], []>} : vector<16x8xbf16>, vector<8x32xbf16>, vector<16x32xf32> -> vector<16x32xf32>
    %706 = vector.broadcast %697 : vector<1x32xf32> to vector<16x32xf32>
    %707 = arith.addf %706, %705 : vector<16x32xf32>
    %708 = vector.extract_strided_slice %696 {offsets = [2, 0, 0], sizes = [1, 8, 8], strides = [1, 1, 1]} : vector<8x8x8xf32> to vector<1x8x8xf32>
    %709 = vector.shape_cast %708 : vector<1x8x8xf32> to vector<8x8xf32>
    %710 = vector.extract_strided_slice %696 {offsets = [3, 0, 0], sizes = [1, 8, 8], strides = [1, 1, 1]} : vector<8x8x8xf32> to vector<1x8x8xf32>
    %711 = vector.shape_cast %710 : vector<1x8x8xf32> to vector<8x8xf32>
    %712 = tpu.concatenate %709, %711 in 0 : vector<8x8xf32>, vector<8x8xf32> -> vector<16x8xf32>
    %c328 = arith.constant 328 : index
    %c0_182 = arith.constant 0 : index
    %713 = vector.load %arg6[%c328, %c0_182] : memref<448x128xbf16, #tpu.memory_space<vmem>>, vector<8x32xbf16>
    %714 = arith.truncf %712 : vector<16x8xf32> to vector<16x8xbf16>
    %cst_183 = arith.constant dense<0.000000e+00> : vector<16x32xf32>
    %715 = tpu.matmul %714, %713, %cst_183 {dimension_numbers = #tpu.dot_dimension_numbers<[1], [0], [0], [1], [0, 0, 1, 1], [], []>} : vector<16x8xbf16>, vector<8x32xbf16>, vector<16x32xf32> -> vector<16x32xf32>
    %716 = arith.addf %707, %715 : vector<16x32xf32>
    %717 = vector.extract_strided_slice %696 {offsets = [4, 0, 0], sizes = [1, 8, 8], strides = [1, 1, 1]} : vector<8x8x8xf32> to vector<1x8x8xf32>
    %718 = vector.shape_cast %717 : vector<1x8x8xf32> to vector<8x8xf32>
    %719 = vector.extract_strided_slice %696 {offsets = [5, 0, 0], sizes = [1, 8, 8], strides = [1, 1, 1]} : vector<8x8x8xf32> to vector<1x8x8xf32>
    %720 = vector.shape_cast %719 : vector<1x8x8xf32> to vector<8x8xf32>
    %721 = tpu.concatenate %718, %720 in 0 : vector<8x8xf32>, vector<8x8xf32> -> vector<16x8xf32>
    %c336 = arith.constant 336 : index
    %c0_184 = arith.constant 0 : index
    %722 = vector.load %arg6[%c336, %c0_184] : memref<448x128xbf16, #tpu.memory_space<vmem>>, vector<8x32xbf16>
    %723 = arith.truncf %721 : vector<16x8xf32> to vector<16x8xbf16>
    %cst_185 = arith.constant dense<0.000000e+00> : vector<16x32xf32>
    %724 = tpu.matmul %723, %722, %cst_185 {dimension_numbers = #tpu.dot_dimension_numbers<[1], [0], [0], [1], [0, 0, 1, 1], [], []>} : vector<16x8xbf16>, vector<8x32xbf16>, vector<16x32xf32> -> vector<16x32xf32>
    %725 = arith.addf %716, %724 : vector<16x32xf32>
    %726 = vector.extract_strided_slice %696 {offsets = [6, 0, 0], sizes = [1, 8, 8], strides = [1, 1, 1]} : vector<8x8x8xf32> to vector<1x8x8xf32>
    %727 = vector.shape_cast %726 : vector<1x8x8xf32> to vector<8x8xf32>
    %728 = vector.extract_strided_slice %696 {offsets = [7, 0, 0], sizes = [1, 8, 8], strides = [1, 1, 1]} : vector<8x8x8xf32> to vector<1x8x8xf32>
    %729 = vector.shape_cast %728 : vector<1x8x8xf32> to vector<8x8xf32>
    %730 = tpu.concatenate %727, %729 in 0 : vector<8x8xf32>, vector<8x8xf32> -> vector<16x8xf32>
    %c344 = arith.constant 344 : index
    %c0_186 = arith.constant 0 : index
    %731 = vector.load %arg6[%c344, %c0_186] : memref<448x128xbf16, #tpu.memory_space<vmem>>, vector<8x32xbf16>
    %732 = arith.truncf %730 : vector<16x8xf32> to vector<16x8xbf16>
    %cst_187 = arith.constant dense<0.000000e+00> : vector<16x32xf32>
    %733 = tpu.matmul %732, %731, %cst_187 {dimension_numbers = #tpu.dot_dimension_numbers<[1], [0], [0], [1], [0, 0, 1, 1], [], []>} : vector<16x8xbf16>, vector<8x32xbf16>, vector<16x32xf32> -> vector<16x32xf32>
    %734 = arith.addf %725, %733 : vector<16x32xf32>
    %735 = arith.addf %589, %734 : vector<16x32xf32>
    %c25 = arith.constant 25 : index
    %c0_188 = arith.constant 0 : index
    %736 = vector.load %arg7[%c25, %c0_188] : memref<32x128xf32, #tpu.memory_space<vmem>>, vector<1x32xf32>
    %c26 = arith.constant 26 : index
    %c0_189 = arith.constant 0 : index
    %737 = vector.load %arg7[%c26, %c0_189] : memref<32x128xf32, #tpu.memory_space<vmem>>, vector<1x32xf32>
    %cst_190 = arith.constant dense<0.000000e+00> : vector<16xf32>
    %738 = vector.multi_reduction <add>, %735, %cst_190 [1] : vector<16x32xf32> to vector<16xf32>
    %739 = vector.shape_cast %738 : vector<16xf32> to vector<16x1xf32>
    %cst_191 = arith.constant 3.200000e+01 : f32
    %740 = vector.broadcast %cst_191 : f32 to vector<16x1xf32>
    %741 = arith.divf %739, %740 : vector<16x1xf32>
    %742 = vector.broadcast %741 : vector<16x1xf32> to vector<16x32xf32>
    %743 = arith.subf %735, %742 : vector<16x32xf32>
    %744 = arith.mulf %743, %743 : vector<16x32xf32>
    %cst_192 = arith.constant dense<0.000000e+00> : vector<16xf32>
    %745 = vector.multi_reduction <add>, %744, %cst_192 [1] : vector<16x32xf32> to vector<16xf32>
    %746 = vector.shape_cast %745 : vector<16xf32> to vector<16x1xf32>
    %cst_193 = arith.constant 3.200000e+01 : f32
    %747 = vector.broadcast %cst_193 : f32 to vector<16x1xf32>
    %748 = arith.divf %746, %747 : vector<16x1xf32>
    %749 = vector.broadcast %741 : vector<16x1xf32> to vector<16x32xf32>
    %750 = arith.subf %735, %749 : vector<16x32xf32>
    %cst_194 = arith.constant 9.99999974E-6 : f32
    %751 = vector.broadcast %cst_194 : f32 to vector<16x1xf32>
    %752 = arith.addf %748, %751 : vector<16x1xf32>
    %753 = math.rsqrt %752 : vector<16x1xf32>
    %754 = vector.broadcast %753 : vector<16x1xf32> to vector<16x32xf32>
    %755 = arith.mulf %750, %754 : vector<16x32xf32>
    %756 = vector.broadcast %736 : vector<1x32xf32> to vector<16x32xf32>
    %757 = arith.mulf %755, %756 : vector<16x32xf32>
    %758 = vector.broadcast %737 : vector<1x32xf32> to vector<16x32xf32>
    %759 = arith.addf %757, %758 : vector<16x32xf32>
    %c352 = arith.constant 352 : index
    %c0_195 = arith.constant 0 : index
    %760 = vector.load %arg6[%c352, %c0_195] : memref<448x128xbf16, #tpu.memory_space<vmem>>, vector<32x64xbf16>
    %c384 = arith.constant 384 : index
    %c0_196 = arith.constant 0 : index
    %761 = vector.load %arg6[%c384, %c0_196] : memref<448x128xbf16, #tpu.memory_space<vmem>>, vector<64x32xbf16>
    %762 = arith.truncf %759 : vector<16x32xf32> to vector<16x32xbf16>
    %cst_197 = arith.constant dense<0.000000e+00> : vector<16x64xf32>
    %763 = tpu.matmul %762, %760, %cst_197 {dimension_numbers = #tpu.dot_dimension_numbers<[1], [0], [0], [1], [0, 0, 1, 1], [], []>} : vector<16x32xbf16>, vector<32x64xbf16>, vector<16x64xf32> -> vector<16x64xf32>
    %c19 = arith.constant 19 : index
    %c0_198 = arith.constant 0 : index
    %764 = vector.load %arg7[%c19, %c0_198] : memref<32x128xf32, #tpu.memory_space<vmem>>, vector<1x64xf32>
    %765 = vector.broadcast %764 : vector<1x64xf32> to vector<16x64xf32>
    %766 = arith.addf %763, %765 : vector<16x64xf32>
    %cst_199 = arith.constant 0.000000e+00 : f32
    %767 = vector.broadcast %cst_199 : f32 to vector<16x64xf32>
    %768 = arith.maximumf %766, %767 : vector<16x64xf32>
    %769 = arith.truncf %768 : vector<16x64xf32> to vector<16x64xbf16>
    %cst_200 = arith.constant dense<0.000000e+00> : vector<16x32xf32>
    %770 = tpu.matmul %769, %761, %cst_200 {dimension_numbers = #tpu.dot_dimension_numbers<[1], [0], [0], [1], [0, 0, 1, 1], [], []>} : vector<16x64xbf16>, vector<64x32xbf16>, vector<16x32xf32> -> vector<16x32xf32>
    %771 = arith.addf %735, %770 : vector<16x32xf32>
    %c20 = arith.constant 20 : index
    %c0_201 = arith.constant 0 : index
    %772 = vector.load %arg7[%c20, %c0_201] : memref<32x128xf32, #tpu.memory_space<vmem>>, vector<1x32xf32>
    %773 = vector.broadcast %772 : vector<1x32xf32> to vector<16x32xf32>
    %774 = arith.addf %771, %773 : vector<16x32xf32>
    %c0_202 = arith.constant 0 : index
    %c0_203 = arith.constant 0 : index
    %775 = vector.load %arg8[%c0_202, %c0_203] : memref<32x128xbf16, #tpu.memory_space<vmem>>, vector<32x128xbf16>
    %776 = arith.truncf %774 : vector<16x32xf32> to vector<16x32xbf16>
    %cst_204 = arith.constant dense<0.000000e+00> : vector<16x128xf32>
    %777 = tpu.matmul %776, %775, %cst_204 {dimension_numbers = #tpu.dot_dimension_numbers<[1], [0], [0], [1], [0, 0, 1, 1], [], []>} : vector<16x32xbf16>, vector<32x128xbf16>, vector<16x128xf32> -> vector<16x128xf32>
    %c2 = arith.constant 2 : index
    %c0_205 = arith.constant 0 : index
    %778 = vector.load %arg7[%c2, %c0_205] : memref<32x128xf32, #tpu.memory_space<vmem>>, vector<1x128xf32>
    %779 = vector.broadcast %778 : vector<1x128xf32> to vector<16x128xf32>
    %780 = arith.addf %777, %779 : vector<16x128xf32>
    %c0_206 = arith.constant 0 : index
    %c0_207 = arith.constant 0 : index
    %781 = vector.load %arg9[%c0_206, %c0_207] : memref<16x128xf32, #tpu.memory_space<vmem>>, vector<16x128xf32>
    tpu.vector_store %arg9[%c0_206, %c0_207], %780 {strides = array<i32>} : memref<16x128xf32, #tpu.memory_space<vmem>>, vector<16x128xf32>,
    %cst_208 = arith.constant dense<0xFF800000> : vector<16xf32>
    %782 = vector.multi_reduction <maximumf>, %780, %cst_208 [1] : vector<16x128xf32> to vector<16xf32>
    %783 = vector.shape_cast %782 : vector<16xf32> to vector<16x1xf32>
    %784 = vector.broadcast %783 : vector<16x1xf32> to vector<16x128xf32>
    %785 = arith.subf %780, %784 : vector<16x128xf32>
    %786 = math.exp %785 : vector<16x128xf32>
    %cst_209 = arith.constant dense<0.000000e+00> : vector<16xf32>
    %787 = vector.multi_reduction <add>, %786, %cst_209 [1] : vector<16x128xf32> to vector<16xf32>
    %788 = vector.shape_cast %787 : vector<16xf32> to vector<16x1xf32>
    %789 = math.log %788 : vector<16x1xf32>
    %790 = arith.addf %783, %789 : vector<16x1xf32>
    %c0_210 = arith.constant 0 : index
    %c0_211 = arith.constant 0 : index
    %791 = vector.load %arg5[%c0_210, %c0_211] : memref<16x1xi32, #tpu.memory_space<vmem>>, vector<16x1xi32>
    %792 = tpu.iota {dimensions = array<i32: 1>} : vector<16x128xi32>
    %793 = vector.broadcast %791 : vector<16x1xi32> to vector<16x128xi32>
    %794 = arith.cmpi eq, %792, %793 : vector<16x128xi32>
    %cst_212 = arith.constant 0.000000e+00 : f32
    %795 = vector.broadcast %cst_212 : f32 to vector<16x128xf32>
    %796 = arith.select %794, %780, %795 : vector<16x128xi1>, vector<16x128xf32>
    %cst_213 = arith.constant dense<0.000000e+00> : vector<16xf32>
    %797 = vector.multi_reduction <add>, %796, %cst_213 [1] : vector<16x128xf32> to vector<16xf32>
    %798 = vector.shape_cast %797 : vector<16xf32> to vector<16x1xf32>
    %c0_i32 = arith.constant 0 : i32
    %799 = vector.broadcast %c0_i32 : i32 to vector<16x1xi32>
    %800 = arith.cmpi ne, %791, %799 : vector<16x1xi32>
    %801 = arith.extui %800 : vector<16x1xi1> to vector<16x1xi32>
    %802 = arith.sitofp %801 : vector<16x1xi32> to vector<16x1xf32>
    %803 = arith.subf %790, %798 : vector<16x1xf32>
    %804 = arith.mulf %803, %802 : vector<16x1xf32>
    %cst_214 = arith.constant dense<0.000000e+00> : vector<1xf32>
    %805 = vector.multi_reduction <add>, %804, %cst_214 [0] : vector<16x1xf32> to vector<1xf32>
    %806 = vector.shape_cast %805 : vector<1xf32> to vector<1x1xf32>
    %cst_215 = arith.constant dense<0.000000e+00> : vector<1xf32>
    %807 = vector.multi_reduction <add>, %802, %cst_215 [0] : vector<16x1xf32> to vector<1xf32>
    %808 = vector.shape_cast %807 : vector<1xf32> to vector<1x1xf32>
    %cst_216 = arith.constant 1.000000e+00 : f32
    %809 = vector.broadcast %cst_216 : f32 to vector<1x1xf32>
    %810 = arith.maximumf %808, %809 : vector<1x1xf32>
    %811 = arith.divf %806, %810 : vector<1x1xf32>
    %c0_217 = arith.constant 0 : index
    %c0_218 = arith.constant 0 : index
    %812 = vector.load %arg10[%c0_217, %c0_218] : memref<1x1xf32, #tpu.memory_space<vmem>>, vector<1x1xf32>
    tpu.vector_store %arg10[%c0_217, %c0_218], %811 {strides = array<i32>} : memref<1x1xf32, #tpu.memory_space<vmem>>, vector<1x1xf32>,
    return
  }
}

</mosaic_0001>

<bundles_post_ra>
// kernel: forward.1
= control target key start
LH: loop header
LB: loop body
LE: loop exit
PB: predicated region body
PF: predicated region fallthrough
CT: control target
= control target key end

     0   :  { %vm78_vm0 = vcmask 261120   ;;  %s6365_s0 = inlined_call_operand.vmem [shape: f32[128,32], index: 0, kind: input, shape index: {}]   ;;  %s6366_s1 = inlined_call_operand.vmem [shape: bf16[320,32], index: 1, kind: input, shape index: {}]   ;;  %s6367_s2 = inlined_call_operand.vmem [shape: bf16[144,64], index: 2, kind: input, shape index: {}]   ;;  %s6368_s3 = inlined_call_operand.vmem [shape: f32[32,32], index: 3, kind: input, shape index: {}]   ;;  %s6369_s4 = inlined_call_operand.vmem [shape: f32[8,1,8], index: 4, kind: input, shape index: {}]   ;;  %s6370_s5 = inlined_call_operand.vmem [shape: s32[16,1], index: 5, kind: input, shape index: {}]   ;;  %s6371_s6 = inlined_call_operand.vmem [shape: bf16[448,128], index: 6, kind: input, shape index: {}]   ;;  %s6372_s7 = inlined_call_operand.vmem [shape: f32[32,128], index: 7, kind: input, shape index: {}]   ;;  %s6373_s8 = inlined_call_operand.vmem [shape: bf16[32,128], index: 8, kind: input, shape index: {}]   ;;  %s6374_s9 = inlined_call_operand.vmem [shape: f32[16,128], index: 9, kind: output, shape index: {0}]   ;;  %s6375_s10 = inlined_call_operand.hbm [shape: f32[1,1], index: 10, kind: output, shape index: {1}]  }
   0x1   :  { %v4608_v0 = vld [vmem:[%s6366_s1 + $0x8] sm:$0xff]  ;;  %v4607_v1 = vld [vmem:[%s6366_s1] sm:$0xff] }
   0x2   :  { %109 = vmatpush.bf16.msra.mxu0 %v4608_v0  ;;  %v36_v2 = vld [vmem:[%s6365_s0] sm:$0xff]  ;;  %v37_v3 = vld [vmem:[%s6365_s0 + $0x8] sm:$0xff] }
   0x3   :  { %v56_v4 = vpack.c.bf16 %v37_v3, %v36_v2 }
   0x6   :  { %110 = vmatpush.bf16.msra.mxu0 %v4607_v1 }
   0x9   :  { %4272 = vmatmul.msk.bf16.vlgmr.msra.gmra.mxu0 %vm78_vm0, %v56_v4 }
   0xa   :  { %16 = vsyncpa [#allocation3], 0  ;;  %v38_v5 = vld [vmem:[%s6365_s0 + $0x10] sm:$0xff]  ;;  %v39_v6 = vld [vmem:[%s6365_s0 + $0x18] sm:$0xff]  ;;  %vm238_vm1 = vcmask 523264   ;;  %s4989_s15 = smov 120  }
   0xb   :  { %v57_v7 = vpack.c.bf16 %v39_v6, %v38_v5  ;;  %v40_v8 = vld [vmem:[%s6365_s0 + $0x20] sm:$0xff]  ;;  %v41_v9 = vld [vmem:[%s6365_s0 + $0x28] sm:$0xff]  ;;  %v42_v11 = vld [vmem:[%s6365_s0 + $0x30] sm:$0xff]  ;;  %s4990_s16 = smov 104   ;;  %s4991_s17 = smov 112   ;;  %vm1067_vm9 = vcmask 64512  }
   0xc   :  { %v58_v10 = vpack.c.bf16 %v41_v9, %v40_v8  ;;  %v43_v12 = vld [vmem:[%s6365_s0 + $0x38] sm:$0xff]  ;;  %v5090_v21 = vld [vmem:[%s6372_s7] ss:$0 sm:$0xff]  ;;  %v45_v33 = vld [vmem:[%s6365_s0 + $0x48] sm:$0xff]  ;;  %s4992_s18 = smov 96   ;;  %vm1372_vm11 = vcmask 1043456  }
   0xd   :  { %v59_v13 = vpack.c.bf16 %v43_v12, %v42_v11  ;;  %v44_v32 = vld [vmem:[%s6365_s0 + $0x40] sm:$0xff]  ;;  %v46_v47 = vld [vmem:[%s6365_s0 + $0x50] sm:$0xff]  ;;  %v47_v48 = vld [vmem:[%s6365_s0 + $0x58] sm:$0xff]  ;;  %s4253_s19 = sshll.u32 %s6375_s10, 4  ;;  %s4254_s19 = int_to_ptr.hbm [resolvable:$true] %s4253_s19 }
   0xe   :  { %v60_v36 = vpack.c.bf16 %v45_v33, %v44_v32  ;;  %v5110_v46 = vld [vmem:[%s6367_s2] sm:$0xff]  ;;  %v61_v49 = vpack.c.bf16 %v47_v48, %v46_v47  ;;  %v5124_v50 = vld [vmem:[%s6367_s2 + $0x8] sm:$0xff]  ;;  %v5138_v54 = vld [vmem:[%s6367_s2 + $0x10] sm:$0xff] }
   0xf   :  { %v48_v51 = vld [vmem:[%s6365_s0 + $0x60] sm:$0xff]  ;;  %v49_v52 = vld [vmem:[%s6365_s0 + $0x68] sm:$0xff]  ;;  %v50_v55 = vld [vmem:[%s6365_s0 + $0x70] sm:$0xff] }
  0x10   :  { %v62_v53 = vpack.c.bf16 %v49_v52, %v48_v51  ;;  %v51_v56 = vld [vmem:[%s6365_s0 + $0x78] sm:$0xff]  ;;  %v5159_v59 = vld [vmem:[%s6368_s3 + $0x10] sm:$0xff]  ;;  %v5166_v61 = vld [vmem:[%s6367_s2 + $0x20] sm:$0xff] }
  0x11   :  { %v63_v57 = vpack.c.bf16 %v51_v56, %v50_v55  ;;  %v5152_v58 = vld [vmem:[%s6367_s2 + $0x18] sm:$0xff]  ;;  %v941_v60 = vsel %vm78_vm0, %v5159_v59, 0.0  ;;  %v5180_v0 = vld [vmem:[%s6367_s2 + $0x28] sm:$0xff]  ;;  %v5187_v1 = vld [vmem:[%s6367_s2 + $0x30] sm:$0xff] }
  0x12   :  { %942 = vadd.xlane.f32.xlu0 %v941_v60  ;;  %v5173_v62 = vld [vmem:[%s6368_s3 + $0x18] sm:$0xff]  ;;  %v5200_v3 = vld [vmem:[%s6366_s1 + $0x10] sm:$0xff]  ;;  %v5211_v5 = vld [vmem:[%s6366_s1 + $0x28] sm:$0xff] }
  0x13   :  { %v944_v63 = vsel %vm78_vm0, %v5173_v62, 0.0  ;;  %v5192_v2 = vld [vmem:[%s6366_s1 + $0x18] sm:$0xff]  ;;  %383 = vmatpush.bf16.msra.mxu3 %v5211_v5  ;;  %v5219_v6 = vld [vmem:[%s6366_s1 + $0x20] sm:$0xff] }
  0x14   :  { %346 = vmatpush.bf16.msra.mxu2 %v5192_v2  ;;  %v5206_v4 = vld [vmem:[%s6367_s2 + $0x38] sm:$0xff] }
  0x15   :  { %v5230_v9 = vld [vmem:[%s6366_s1 + $0x38] sm:$0xff] }
  0x16   :  { %v5302_v60 = vld [vmem:[%s6366_s1 + $0x78] sm:$0xff] }
  0x17   :  { %384 = vmatpush.bf16.msra.mxu3 %v5219_v6 }
  0x18   :  { %347 = vmatpush.bf16.msra.mxu2 %v5200_v3 }
  0x19   :  { %4273 = vmatmul.msk.bf16.gmra.mxu0 %vm78_vm0, %v57_v7  ;;  %v5225_v7 = vld [vmem:[%s6367_s2 + $0x40] sm:$0xff] }
  0x1a   :  { %945 = vadd.xlane.f32.xlu0 %v944_v63 }
  0x1c   :  { %419 = vmatpush.bf16.msrb.mxu2 %v5230_v9 }
  0x29   :  { %4274 = vmatmul.msk.bf16.gmra.mxu0 %vm78_vm0, %v58_v10  ;;  %v5238_v10 = vld [vmem:[%s6366_s1 + $0x30] sm:$0xff] }
  0x2a   :  { %420 = vmatpush.bf16.msrb.mxu2 %v5238_v10 }
  0x39   :  { %4275 = vmatmul.msk.bf16.gmra.mxu0 %vm78_vm0, %v59_v13 }
  0x49   :  { %4276 = vmatmul.msk.bf16.gmra.mxu0 %vm78_vm0, %v60_v36 }
  0x59   :  { %4277 = vmatmul.msk.bf16.gmra.mxu0 %vm78_vm0, %v61_v49 }
  0x69   :  { %4278 = vmatmul.msk.bf16.gmra.mxu0 %vm78_vm0, %v62_v53 }
  0x79   :  { %4279 = vmatmul.msk.bf16.gmra.mxu0 %vm78_vm0, %v63_v57 }
  0x86   :  { %v112_v14 = vpop.f32.mrf.mxu0 }
  0x87   :  { %v113_v40 = vadd.f32 %v5090_v21, %v112_v14 }
  0x89   :  { %v152_v44 = vmax.f32 %v113_v40, 0.0 }
  0x8e   :  { %v114_v15 = vpop.f32.mrf.mxu0 }
  0x8f   :  { %v115_v37 = vadd.f32 %v5090_v21, %v114_v15  ;;  %v4625_v15 = vld [vmem:[%s6366_s1 + $0x48] sm:$0xff] }
  0x90   :  { %455 = vmatpush.bf16.msrb.mxu3 %v4625_v15  ;;  %777 = vmatpush.bf16.msrb.mxu0 %v4625_v15 }
  0x91   :  { %v153_v42 = vmax.f32 %v115_v37, 0.0  ;;  %v943_v37 = vpop.xlane.xlu0 %942 }
  0x93   :  { %v189_v45 = vpack.c.bf16 %v153_v42, %v152_v44 }
  0x96   :  { %v117_v16 = vpop.f32.mrf.mxu0 }
  0x97   :  { %v118_v34 = vadd.f32 %v5090_v21, %v117_v16 }
  0x99   :  { %v154_v41 = vmax.f32 %v118_v34, 0.0  ;;  %v4629_v34 = vld [vmem:[%s6366_s1 + $0x68] sm:$0xff]  ;;  %v946_v51 = vpop.xlane.xlu0 %945 }
  0x9e   :  { %v119_v17 = vpop.f32.mrf.mxu0 }
  0x9f   :  { %v120_v29 = vadd.f32 %v5090_v21, %v119_v17  ;;  %v4624_v17 = vld [vmem:[%s6366_s1 + $0x40] sm:$0xff] }
  0xa0   :  { %456 = vmatpush.bf16.msrb.mxu3 %v4624_v17  ;;  %778 = vmatpush.bf16.msrb.mxu0 %v4624_v17 }
  0xa1   :  { %v155_v38 = vmax.f32 %v120_v29, 0.0 }
  0xa3   :  { %v190_v43 = vpack.c.bf16 %v155_v38, %v154_v41  ;;  %v4633_v38 = vld [vmem:[%s6366_s1 + $0x88] sm:$0xff] }
  0xa4   :  { %817 = vmatpush.bf16.msra.mxu0 %v4629_v34 }
  0xa6   :  { %v122_v18 = vpop.f32.mrf.mxu0 }
  0xa7   :  { %v123_v26 = vadd.f32 %v5090_v21, %v122_v18 }
  0xa9   :  { %v156_v35 = vmax.f32 %v123_v26, 0.0  ;;  %v5266_v26 = vld [vmem:[%s6366_s1 + $0x50] sm:$0xff] }
  0xae   :  { %v124_v19 = vpop.f32.mrf.mxu0 }
  0xaf   :  { %v125_v24 = vadd.f32 %v5090_v21, %v124_v19 }
  0xb1   :  { %v157_v30 = vmax.f32 %v125_v24, 0.0  ;;  %v4988_v24 = vmov 32.0  }
  0xb2   :  { %4795 = vrcp.f32 %v4988_v24 }
  0xb3   :  { %v191_v39 = vpack.c.bf16 %v157_v30, %v156_v35 }
  0xb6   :  { %v127_v20 = vpop.f32.mrf.mxu0 }
  0xb7   :  { %v128_v22 = vadd.f32 %v5090_v21, %v127_v20 }
  0xb9   :  { %v158_v27 = vmax.f32 %v128_v22, 0.0 }
  0xbe   :  { %v129_v23 = vpop.f32.mrf.mxu0 }
  0xbf   :  { %v130_v25 = vadd.f32 %v5090_v21, %v129_v23  ;;  %v5258_v23 = vld [vmem:[%s6366_s1 + $0x58] sm:$0xff] }
  0xc1   :  { %v159_v28 = vmax.f32 %v130_v25, 0.0 }
  0xc3   :  { %v192_v31 = vpack.c.bf16 %v159_v28, %v158_v27  ;;  %v4796_v28 = vpop.eup %4795 }
  0xc4   :  { %v948_v30 = vmul.f32 32.0, %v4796_v28  ;;  %vm952_vm2 = vweird.f32 %v4796_v28 }
  0xc5   :  { %270 = vmatpush.bf16.msra.mxu1 %v192_v31 }
  0xc6   :  { %v5240_v11 = vpop.f32.mrf.mxu0  ;;  %v949_v31 = vsub.f32 1.0, %v948_v30 }
  0xc8   :  { %v950_v32 = vmul.f32 %v4796_v28, %v949_v31 }
  0xc9   :  { %271 = vmatpush.bf16.msra.mxu1 %v191_v39  ;;  %v4628_v39 = vld [vmem:[%s6366_s1 + $0x60] sm:$0xff] }
  0xca   :  { %v951_v36 = vadd.f32 %v4796_v28, %v950_v32  ;;  %818 = vmatpush.bf16.msra.mxu0 %v4628_v39 }
  0xcc   :  { %v5279_v40 = vsel %vm952_vm2, %v4796_v28, %v951_v36 }
  0xcd   :  { %272 = vmatpush.bf16.msra.mxu1 %v190_v43  ;;  %v954_v41 = vmul.f32 %v5279_v40, %v943_v37  ;;  %v955_v52 = vmul.f32 %v5279_v40, %v946_v51 }
  0xce   :  { %v5247_v16 = vpop.f32.mrf.mxu0 }
  0xcf   :  { %v5283_v42 = vsub.f32 %v5159_v59, %v954_v41  ;;  %v5294_v53 = vsub.f32 %v5173_v62, %v955_v52  ;;  %v5308_v62 = vld [vmem:[%s6366_s1 + $0x70] sm:$0xff] }
  0xd1   :  { %273 = vmatpush.bf16.msra.mxu1 %v189_v45  ;;  %v958_v43 = vmul.f32 %v5283_v42, %v5283_v42  ;;  %v4632_v45 = vld [vmem:[%s6366_s1 + $0x80] sm:$0xff]  ;;  %v959_v56 = vmul.f32 %v5294_v53, %v5294_v53 }
  0xd3   :  { %v960_v49 = vsel %vm78_vm0, %v958_v43, 0.0  ;;  %v963_v57 = vsel %vm78_vm0, %v959_v56, 0.0 }
  0xd4   :  { %4316 = vmatmul.msk.bf16.vlgmr.msra.gmra.mxu1 %vm238_vm1, %v5110_v46  ;;  %961 = vadd.xlane.f32.xlu1 %v960_v49 }
  0xd5   :  { %857 = vmatpush.bf16.msrb.mxu1 %v4633_v38 }
  0xd6   :  { %v5253_v20 = vpop.f32.mrf.mxu0 }
  0xd7   :  { %v138_v31 = vadd.f32 %v5090_v21, %v5253_v20  ;;  %v5328_v20 = vld [vmem:[%s6366_s1 + $0x98] sm:$0xff] }
  0xd9   :  { %858 = vmatpush.bf16.msrb.mxu1 %v4632_v45  ;;  %v162_v36 = vmax.f32 %v138_v31, 0.0 }
  0xdc   :  { %964 = vadd.xlane.f32.xlu1 %v963_v57 }
  0xde   :  { %v5261_v25 = vpop.f32.mrf.mxu0 }
  0xdf   :  { %v140_v32 = vadd.f32 %v5090_v21, %v5261_v25 }
  0xe1   :  { %v163_v37 = vmax.f32 %v140_v32, 0.0 }
  0xe3   :  { %v650_v41 = vpack.c.bf16 %v163_v37, %v162_v36 }
  0xe4   :  { %4317 = vmatmul.msk.bf16.gmra.mxu1 %vm238_vm1, %v5124_v50 }
  0xe6   :  { %v142_v33 = vpop.f32.mrf.mxu0 }
  0xe7   :  { %v143_v17 = vadd.f32 %v5090_v21, %v142_v33  ;;  %v133_v33 = vadd.f32 %v5090_v21, %v5240_v11 }
  0xe9   :  { %v164_v24 = vmax.f32 %v143_v17, 0.0  ;;  %v160_v25 = vmax.f32 %v133_v33, 0.0 }
  0xee   :  { %v144_v48 = vpop.f32.mrf.mxu0 }
  0xf4   :  { %4318 = vmatmul.msk.bf16.gmra.mxu1 %vm238_vm1, %v5138_v54 }
  0xf6   :  { %v147_v59 = vpop.f32.mrf.mxu0 }
 0x104   :  { %4319 = vmatmul.msk.bf16.gmra.mxu1 %vm238_vm1, %v5152_v58 }
 0x114   :  { %4320 = vmatmul.msk.bf16.gmra.mxu1 %vm238_vm1, %v5166_v61 }
 0x124   :  { %4321 = vmatmul.msk.bf16.gmra.mxu1 %vm238_vm1, %v5180_v0 }
 0x134   :  { %4322 = vmatmul.msk.bf16.gmra.mxu1 %vm238_vm1, %v5187_v1 }
 0x144   :  { %4323 = vmatmul.msk.bf16.gmra.mxu1 %vm238_vm1, %v5206_v4 }
 0x151   :  { %v275_v8 = vpop.f32.mrf.mxu1 }
 0x154   :  { %4324 = vmatmul.msk.bf16.gmra.mxu1 %vm238_vm1, %v5225_v7 }
 0x159   :  { %v277_v12 = vpop.f32.mrf.mxu1 }
 0x15a   :  { %v324_v13 = vpack.c.bf16 %v277_v12, %v275_v8  ;;  %v149_v12 = vpop.f32.mrf.mxu0 }
 0x15b   :  { %v150_v15 = vadd.f32 %v5090_v21, %v149_v12 }
 0x15c   :  { %4333 = vmatmul.msk.bf16.vlgmr.msra.gmra.mxu2 %vm78_vm0, %v324_v13  ;;  %v148_v13 = vadd.f32 %v5090_v21, %v147_v59 }
 0x15d   :  { %491 = vmatpush.bf16.msra.mxu2 %v5258_v23 }
 0x161   :  { %v280_v14 = vpop.f32.mrf.mxu1  ;;  %492 = vmatpush.bf16.msra.mxu2 %v5266_v26 }
 0x169   :  { %v282_v18 = vpop.f32.mrf.mxu1 }
 0x16a   :  { %v361_v19 = vpack.c.bf16 %v282_v18, %v280_v14  ;;  %v145_v18 = vadd.f32 %v5090_v21, %v144_v48 }
 0x16c   :  { %4342 = vmatmul.msk.bf16.vlgmr.msra.gmra.mxu3 %vm78_vm0, %v361_v19  ;;  %v166_v19 = vmax.f32 %v148_v13, 0.0 }
 0x16d   :  { %527 = vmatpush.bf16.msra.mxu3 %v4629_v34 }
 0x171   :  { %v285_v22 = vpop.f32.mrf.mxu1  ;;  %528 = vmatpush.bf16.msra.mxu3 %v4628_v39 }
 0x179   :  { %v287_v27 = vpop.f32.mrf.mxu1 }
 0x17a   :  { %v397_v29 = vpack.c.bf16 %v287_v27, %v285_v22  ;;  %v167_v22 = vmax.f32 %v150_v15, 0.0  ;;  %v165_v27 = vmax.f32 %v145_v18, 0.0 }
 0x17c   :  { %4351 = vmatmul.msk.bf16.vlgmr.msrb.gmra.mxu2 %vm78_vm0, %v397_v29  ;;  %v652_v28 = vpack.c.bf16 %v167_v22, %v166_v19  ;;  %v651_v34 = vpack.c.bf16 %v165_v27, %v164_v24 }
 0x17d   :  { %563 = vmatpush.bf16.msrb.mxu2 %v5302_v60 }
 0x181   :  { %v290_v35 = vpop.f32.mrf.mxu1  ;;  %564 = vmatpush.bf16.msrb.mxu2 %v5308_v62 }
 0x189   :  { %v292_v44 = vpop.f32.mrf.mxu1 }
 0x18a   :  { %v433_v47 = vpack.c.bf16 %v292_v44, %v290_v35  ;;  %v135_v35 = vadd.f32 %v5090_v21, %v5247_v16  ;;  %v5334_v21 = vld [vmem:[%s6366_s1 + $0x90] sm:$0xff] }
 0x18c   :  { %4360 = vmatmul.msk.bf16.vlgmr.msrb.gmra.mxu3 %vm78_vm0, %v433_v47  ;;  %v161_v39 = vmax.f32 %v135_v35, 0.0 }
 0x18d   :  { %599 = vmatpush.bf16.msrb.mxu3 %v4633_v38 }
 0x18e   :  { %v649_v43 = vpack.c.bf16 %v161_v39, %v160_v25 }
 0x191   :  { %v295_v55 = vpop.f32.mrf.mxu1  ;;  %600 = vmatpush.bf16.msrb.mxu3 %v4632_v45 }
 0x199   :  { %v297_v63 = vpop.f32.mrf.mxu1 }
 0x19a   :  { %v469_v8 = vpack.c.bf16 %v297_v63, %v295_v55 }
 0x19c   :  { %4369 = vmatmul.msk.bf16.vlgmr.msra.gmra.mxu2 %vm78_vm0, %v469_v8 }
 0x19d   :  { %635 = vmatpush.bf16.msra.mxu2 %v5328_v20 }
 0x1a1   :  { %v300_v14 = vpop.f32.mrf.mxu1  ;;  %636 = vmatpush.bf16.msra.mxu2 %v5334_v21 }
 0x1a9   :  { %v302_v29 = vpop.f32.mrf.mxu1 }
 0x1aa   :  { %v505_v30 = vpack.c.bf16 %v302_v29, %v300_v14 }
 0x1ac   :  { %4378 = vmatmul.msk.bf16.vlgmr.msra.gmra.mxu3 %vm78_vm0, %v505_v30 }
 0x1ad   :  { %657 = vmatpush.bf16.msra.mxu3 %v652_v28 }
 0x1b1   :  { %658 = vmatpush.bf16.msra.mxu3 %v651_v34  ;;  %v305_v38 = vpop.f32.mrf.mxu1 }
 0x1b5   :  { %659 = vmatpush.bf16.msra.mxu3 %v650_v41 }
 0x1b9   :  { %660 = vmatpush.bf16.msra.mxu3 %v649_v43  ;;  %v307_v11 = vpop.f32.mrf.mxu1 }
 0x1ba   :  { %v541_v16 = vpack.c.bf16 %v307_v11, %v305_v38 }
 0x1bc   :  { %4387 = vmatmul.msk.bf16.vlgmr.msrb.gmra.mxu2 %vm78_vm0, %v541_v16  ;;  %v4636_v16 = vld [vmem:[%s6371_s6] sm:$0xff] }
 0x1bd   :  { %717 = vmatpush.bf16.msrb.mxu2 %v5192_v2  ;;  %v5349_v2 = vld [vmem:[%s6372_s7 + $0x1] ss:$0 sm:$0xff] }
 0x1c1   :  { %v310_v44 = vpop.f32.mrf.mxu1  ;;  %718 = vmatpush.bf16.msrb.mxu2 %v5200_v3 }
 0x1c9   :  { %v312_v45 = vpop.f32.mrf.mxu1 }
 0x1ca   :  { %v577_v47 = vpack.c.bf16 %v312_v45, %v310_v44 }
 0x1cc   :  { %4396 = vmatmul.msk.bf16.vlgmr.msrb.gmra.mxu3 %vm78_vm0, %v577_v47 }
 0x1d1   :  { %v315_v48 = vpop.f32.mrf.mxu1 }
 0x1d9   :  { %v317_v49 = vpop.f32.mrf.mxu1 }
 0x1da   :  { %v613_v51 = vpack.c.bf16 %v317_v49, %v315_v48 }
 0x1dc   :  { %4405 = vmatmul.msk.bf16.vlgmr.msra.gmra.mxu2 %vm78_vm0, %v613_v51  ;;  %4406 = vmatmul.msk.bf16.vlgmr.msra.gmra.mxu3 %vm238_vm1, %v5110_v46 }
 0x1dd   :  { %737 = vmatpush.bf16.msra.mxu2 %v5211_v5 }
 0x1df   :  { %v349_v3 = vpop.f32.mrf.mxu2 }
 0x1e0   :  { %v355_v52 = vadd.f32 %v5349_v2, %v349_v3 }
 0x1e1   :  { %738 = vmatpush.bf16.msra.mxu2 %v5219_v6 }
 0x1e7   :  { %v5354_v57 = vpop.f32.mrf.mxu2 }
 0x1ec   :  { %4407 = vmatmul.msk.bf16.gmra.mxu3 %vm238_vm1, %v5124_v50 }
 0x1ef   :  { %v386_v55 = vpop.f32.mrf.mxu3 }
 0x1f0   :  { %v391_v56 = vadd.f32 %v386_v55, %v355_v52 }
 0x1f7   :  { %v5358_v6 = vpop.f32.mrf.mxu3 }
 0x1fc   :  { %4408 = vmatmul.msk.bf16.gmra.mxu3 %vm238_vm1, %v5138_v54 }
 0x1ff   :  { %v422_v46 = vpop.f32.mrf.mxu2 }
 0x200   :  { %v427_v5 = vadd.f32 %v422_v46, %v391_v56 }
 0x207   :  { %v5362_v8 = vpop.f32.mrf.mxu2 }
 0x20c   :  { %4409 = vmatmul.msk.bf16.gmra.mxu3 %vm238_vm1, %v5152_v58 }
 0x20f   :  { %v458_v59 = vpop.f32.mrf.mxu3 }
 0x210   :  { %v463_v63 = vadd.f32 %v458_v59, %v427_v5 }
 0x217   :  { %v5366_v13 = vpop.f32.mrf.mxu3 }
 0x21c   :  { %4410 = vmatmul.msk.bf16.gmra.mxu3 %vm238_vm1, %v5166_v61 }
 0x21f   :  { %v494_v50 = vpop.f32.mrf.mxu2 }
 0x220   :  { %v499_v12 = vadd.f32 %v494_v50, %v463_v63 }
 0x227   :  { %v5370_v15 = vpop.f32.mrf.mxu2 }
 0x22c   :  { %4411 = vmatmul.msk.bf16.gmra.mxu3 %vm238_vm1, %v5180_v0 }
 0x22f   :  { %v530_v54 = vpop.f32.mrf.mxu3 }
 0x230   :  { %v535_v14 = vadd.f32 %v530_v54, %v499_v12  ;;  %v4762_v12 = vld [vmem:[%s6372_s7 + $0x9] ss:$0 sm:$0xff] }
 0x237   :  { %v5374_v18 = vpop.f32.mrf.mxu3 }
 0x23c   :  { %4412 = vmatmul.msk.bf16.gmra.mxu3 %vm238_vm1, %v5187_v1 }
 0x23f   :  { %v566_v58 = vpop.f32.mrf.mxu2 }
 0x240   :  { %v571_v17 = vadd.f32 %v566_v58, %v535_v14 }
 0x247   :  { %v5378_v22 = vpop.f32.mrf.mxu2 }
 0x24c   :  { %4413 = vmatmul.msk.bf16.gmra.mxu3 %vm238_vm1, %v5206_v4 }
 0x24f   :  { %v602_v61 = vpop.f32.mrf.mxu3 }
 0x250   :  { %v607_v19 = vadd.f32 %v602_v61, %v571_v17 }
 0x257   :  { %v5380_v24 = vpop.f32.mrf.mxu3 }
 0x25c   :  { %4414 = vmatmul.msk.bf16.gmra.mxu3 %vm238_vm1, %v5225_v7 }
 0x25f   :  { %v638_v0 = vpop.f32.mrf.mxu2  ;;  %v662_v27 = vpop.f32.mrf.mxu3 }
 0x260   :  { %v5384_v28 = vadd.f32 %v638_v0, %v607_v19  ;;  %v4763_v19 = vld [vmem:[%s6372_s7 + $0xa] ss:$0 sm:$0xff] }
 0x267   :  { %v664_v1 = vpop.f32.mrf.mxu3 }
 0x268   :  { %v707_v29 = vpack.c.bf16 %v664_v1, %v662_v27 }
 0x26a   :  { %4415 = vmatmul.msk.bf16.vlgmr.msrb.gmra.mxu2 %vm78_vm0, %v707_v29 }
 0x26b   :  { %757 = vmatpush.bf16.msrb.mxu2 %v5230_v9  ;;  %v962_v9 = vpop.xlane.xlu1 %961 }
 0x26c   :  { %v966_v36 = vmul.f32 %v962_v9, %v5279_v40 }
 0x26e   :  { %v968_v38 = vadd.f32 1e-05, %v966_v36 }
 0x26f   :  { %v667_v4 = vpop.f32.mrf.mxu3  ;;  %758 = vmatpush.bf16.msrb.mxu2 %v5238_v10 }
 0x270   :  { %4797 = vrsqrt.f32 %v968_v38  ;;  %vm976_vm3 = vweird.f32 %v968_v38 }
 0x276   :  { %v4798_v41 = vpop.eup %4797 }
 0x277   :  { %v669_v30 = vpop.f32.mrf.mxu3  ;;  %vm977_vm4 = vweird.f32 %v4798_v41 }
 0x278   :  { %v727_v31 = vpack.c.bf16 %v669_v30, %v667_v4  ;;  %vm978_vm7 = vmor %vm976_vm3, %vm977_vm4  ;;  %vm2045_vm4 = vcmask 130048  }
 0x27a   :  { %4416 = vmatmul.msk.bf16.vlgmr.msra.gmra.mxu2 %vm78_vm0, %v727_v31 }
 0x27b   :  { %797 = vmatpush.bf16.msra.mxu2 %v5258_v23 }
 0x27f   :  { %v672_v7 = vpop.f32.mrf.mxu3  ;;  %798 = vmatpush.bf16.msra.mxu2 %v5266_v26  ;;  %v965_v26 = vpop.xlane.xlu1 %964 }
 0x280   :  { %v967_v37 = vmul.f32 %v965_v26, %v5279_v40 }
 0x282   :  { %v969_v25 = vadd.f32 1e-05, %v967_v37 }
 0x284   :  { %4799 = vrsqrt.f32 %v969_v25  ;;  %vm986_vm5 = vweird.f32 %v969_v25 }
 0x287   :  { %v674_v32 = vpop.f32.mrf.mxu3 }
 0x288   :  { %v747_v34 = vpack.c.bf16 %v674_v32, %v672_v7 }
 0x28a   :  { %4417 = vmatmul.msk.bf16.vlgmr.msrb.gmra.mxu2 %vm78_vm0, %v747_v34  ;;  %v4800_v43 = vpop.eup %4799 }
 0x28b   :  { %837 = vmatpush.bf16.msrb.mxu2 %v5302_v60  ;;  %v981_v11 = vmul.f32 %v4800_v43, %v969_v25  ;;  %vm987_vm6 = vweird.f32 %v4800_v43 }
 0x28c   :  { %vm988_vm8 = vmor %vm986_vm5, %vm987_vm6 }
 0x28d   :  { %v982_v48 = vmul.f32 %v4800_v43, %v981_v11 }
 0x28f   :  { %v677_v33 = vpop.f32.mrf.mxu3  ;;  %838 = vmatpush.bf16.msrb.mxu2 %v5308_v62  ;;  %v983_v51 = vmul.f32 0.5, %v982_v48 }
 0x291   :  { %v984_v55 = vsub.f32 1.5, %v983_v51 }
 0x293   :  { %v985_v46 = vmul.f32 %v4800_v43, %v984_v55 }
 0x295   :  { %v989_v50 = vsel %vm988_vm8, %v4800_v43, %v985_v46 }
 0x296   :  { %v991_v14 = vmul.f32 %v989_v50, %v5294_v53 }
 0x297   :  { %v679_v10 = vpop.f32.mrf.mxu3 }
 0x298   :  { %v767_v35 = vpack.c.bf16 %v679_v10, %v677_v33  ;;  %v994_v61 = vmul.f32 %v4762_v12, %v991_v14 }
 0x29a   :  { %4418 = vmatmul.msk.bf16.vlgmr.msrb.gmra.mxu0 %vm78_vm0, %v767_v35  ;;  %v997_v27 = vadd.f32 %v4763_v19, %v994_v61 }
 0x29b   :  { %877 = vmatpush.bf16.msrb.mxu0 %v5328_v20  ;;  %v4637_v20 = vld [vmem:[%s6371_s6 + $0x8] sm:$0xff] }
 0x29f   :  { %v682_v23 = vpop.f32.mrf.mxu3  ;;  %878 = vmatpush.bf16.msrb.mxu0 %v5334_v21  ;;  %v971_v21 = vmul.f32 %v4798_v41, %v968_v38 }
 0x2a1   :  { %v972_v47 = vmul.f32 %v4798_v41, %v971_v21 }
 0x2a3   :  { %v973_v49 = vmul.f32 0.5, %v972_v47 }
 0x2a5   :  { %v974_v52 = vsub.f32 1.5, %v973_v49 }
 0x2a7   :  { %v684_v60 = vpop.f32.mrf.mxu3  ;;  %v975_v56 = vmul.f32 %v4798_v41, %v974_v52 }
 0x2a8   :  { %v787_v39 = vpack.c.bf16 %v684_v60, %v682_v23 }
 0x2a9   :  { %v979_v63 = vsel %vm978_vm7, %v4798_v41, %v975_v56 }
 0x2aa   :  { %4419 = vmatmul.msk.bf16.vlgmr.msra.gmra.mxu2 %vm78_vm0, %v787_v39  ;;  %v990_v54 = vmul.f32 %v979_v63, %v5283_v42  ;;  %v5419_v42 = vpop.f32.mrf.mxu2 }
 0x2ab   :  { %1026 = vmatpush.bf16.msra.mxu2 %v4637_v20 }
 0x2ac   :  { %v993_v17 = vmul.f32 %v4762_v12, %v990_v54 }
 0x2ae   :  { %v996_v0 = vadd.f32 %v4763_v19, %v993_v17 }
 0x2af   :  { %v687_v62 = vpop.f32.mrf.mxu3  ;;  %1027 = vmatpush.bf16.msra.mxu2 %v4636_v16  ;;  %v4764_v16 = vld [vmem:[%s6372_s7 + $0x3] ss:$0 sm:$0xff] }
 0x2b0   :  { %v1002_v4 = vpack.c.bf16 %v997_v27, %v996_v0 }
 0x2b7   :  { %v689_v44 = vpop.f32.mrf.mxu3 }
 0x2b8   :  { %v807_v45 = vpack.c.bf16 %v689_v44, %v687_v62 }
 0x2ba   :  { %4420 = vmatmul.msk.bf16.vlgmr.msra.gmra.mxu0 %vm78_vm0, %v807_v45 }
 0x2bf   :  { %v692_v3 = vpop.f32.mrf.mxu3 }
 0x2c7   :  { %v694_v5 = vpop.f32.mrf.mxu3 }
 0x2c8   :  { %v827_v59 = vpack.c.bf16 %v694_v5, %v692_v3 }
 0x2ca   :  { %4421 = vmatmul.msk.bf16.vlgmr.msrb.gmra.mxu2 %vm78_vm0, %v827_v59 }
 0x2cf   :  { %v697_v58 = vpop.f32.mrf.mxu3 }
 0x2d7   :  { %v699_v1 = vpop.f32.mrf.mxu3 }
 0x2d8   :  { %v847_v29 = vpack.c.bf16 %v699_v1, %v697_v58 }
 0x2da   :  { %4422 = vmatmul.msk.bf16.vlgmr.msrb.gmra.mxu1 %vm78_vm0, %v847_v29  ;;  %4432 = vmatmul.msk.bf16.vlgmr.msra.gmra.mxu2 %vm78_vm0, %v1002_v4 }
 0x2df   :  { %v702_v30 = vpop.f32.mrf.mxu3 }
 0x2e7   :  { %v704_v53 = vpop.f32.mrf.mxu3 }
 0x2e8   :  { %v867_v31 = vpack.c.bf16 %v704_v53, %v702_v30 }
 0x2ea   :  { %4423 = vmatmul.msk.bf16.vlgmr.msrb.gmra.mxu0 %vm78_vm0, %v867_v31 }
 0x2ed   :  { %v720_v7 = vpop.f32.mrf.mxu2 }
 0x2ee   :  { %v725_v34 = vadd.f32 %v5349_v2, %v720_v7 }
 0x2f5   :  { %v5422_v32 = vpop.f32.mrf.mxu2 }
 0x2fd   :  { %v740_v33 = vpop.f32.mrf.mxu2 }
 0x2fe   :  { %v745_v9 = vadd.f32 %v740_v33, %v725_v34 }
 0x305   :  { %v5425_v10 = vpop.f32.mrf.mxu2 }
 0x30d   :  { %v760_v35 = vpop.f32.mrf.mxu2 }
 0x30e   :  { %v765_v23 = vadd.f32 %v760_v35, %v745_v9 }
 0x315   :  { %v5427_v37 = vpop.f32.mrf.mxu2 }
 0x317   :  { %v780_v26 = vpop.f32.mrf.mxu0 }
 0x318   :  { %v785_v36 = vadd.f32 %v780_v26, %v765_v23 }
 0x31f   :  { %v5429_v25 = vpop.f32.mrf.mxu0 }
 0x32d   :  { %v800_v38 = vpop.f32.mrf.mxu2 }
 0x32e   :  { %v805_v60 = vadd.f32 %v800_v38, %v785_v36 }
 0x335   :  { %v5431_v20 = vpop.f32.mrf.mxu2 }
 0x337   :  { %v820_v39 = vpop.f32.mrf.mxu0 }
 0x338   :  { %v825_v62 = vadd.f32 %v820_v39, %v805_v60 }
 0x33f   :  { %v5438_v47 = vpop.f32.mrf.mxu0 }
 0x34d   :  { %v840_v41 = vpop.f32.mrf.mxu2 }
 0x34e   :  { %v845_v2 = vadd.f32 %v840_v41, %v825_v62 }
 0x355   :  { %v5433_v43 = vpop.f32.mrf.mxu2 }
 0x357   :  { %v860_v21 = vpop.f32.mrf.mxu1 }
 0x358   :  { %v865_v11 = vadd.f32 %v860_v21, %v845_v2 }
 0x35d   :  { %v1029_v44 = vpop.f32.mrf.mxu2 }
 0x35e   :  { %v1030_v45 = vadd.f32 %v4764_v16, %v1029_v44 }
 0x360   :  { %1035 = vrot.lane.b32.xlu2 %v1030_v45, %s4989_s15  ;;  %v1054_v51 = vpack.c.bf16 %v1030_v45, %v1030_v45 }
 0x362   :  { %v1063_v56 = vunpack.c.l.b16 %v1054_v51 }
 0x364   :  { %v5446_v46 = vpack.c.b16 %v1063_v56, %v1063_v56 }
 0x365   :  { %v1031_v48 = vpop.f32.mrf.mxu2 }
 0x366   :  { %v1032_v49 = vadd.f32 %v4764_v16, %v1031_v48 }
 0x367   :  { %v880_v3 = vpop.f32.mrf.mxu0 }
 0x368   :  { %v5441_v52 = vadd.f32 %v880_v3, %v865_v11  ;;  %1039 = vrot.lane.b32.xlu2 %v1032_v49, %s4989_s15  ;;  %v4673_v55 = vpack.i.bf16 %v1032_v49, %v1030_v45  ;;  %v1055_v5 = vpack.c.bf16 %v1032_v49, %v1032_v49  ;;  %v891_v49 = vlaneseq }
 0x36a   :  { %4674 = vrot.lane.b32.xlu1 %v4673_v55, %s4990_s16  ;;  %4669 = vrot.lane.b32.xlu0 %v4673_v55, %s4991_s17  ;;  %v1088_v59 = vunpack.c.l.b16 %v1055_v5  ;;  %v5490_v3 = vand.u32 127, %v891_v49  ;;  %v5492_v55 = vpop.f32.mrf.mxu1 }
 0x36c   :  { %v5450_v63 = vpack.c.b16 %v1088_v59, %v1088_v59  ;;  %v4765_v59 = vld [vmem:[%s6369_s4] ss:$0 sm:$0xff] }
 0x370   :  { %1065 = vrot.lane.b32.xlu2 %v5446_v46, %s4992_s18 }
 0x378   :  { %1090 = vrot.lane.b32.xlu2 %v5450_v63, %s4992_s18 }
 0x3ba   :  { %v1036_v50 = vpop.permute.xlu2 %1035 }
 0x3bb   :  { %v1056_v12 = vpack.c.bf16 %v1036_v50, %v1036_v50  ;;  %v4993_v50 = vmov -1e+30  }
 0x3bd   :  { %v1112_v54 = vunpack.c.l.b16 %v1056_v12 }
 0x3bf   :  { %v5454_v14 = vpack.c.b16 %v1112_v54, %v1112_v54 }
 0x3c1   :  { %1114 = vrot.lane.b32.xlu2 %v5454_v14, %s4992_s18 }
 0x3c2   :  { %v1040_v58 = vpop.permute.xlu2 %1039 }
 0x3c3   :  { %v1057_v17 = vpack.c.bf16 %v1040_v58, %v1040_v58  ;;  %v5505_v58 = vpop.f32.mrf.mxu0 }
 0x3c5   :  { %v1136_v61 = vunpack.c.l.b16 %v1057_v17 }
 0x3c7   :  { %v5458_v19 = vpack.c.b16 %v1136_v61, %v1136_v61 }
 0x3c9   :  { %1138 = vrot.lane.b32.xlu0 %v5458_v19, %s4992_s18 }
 0x3ca   :  { %v1066_v0 = vpop.permute.xlu2 %1065 }
 0x3cb   :  { %v1072_v27 = vsel %vm1067_vm9, %v1066_v0, 0 }
 0x3cc   :  { %1081 = vmatpush.bf16.xpose.msra.mxu1 %v1072_v27  ;;  %v4766_v27 = vld [vmem:[%s6369_s4 + $0x1] ss:$0 sm:$0xff] }
 0x3d2   :  { %v1091_v1 = vpop.permute.xlu2 %1090 }
 0x3d3   :  { %v1096_v29 = vsel %vm1067_vm9, %v1091_v1, 0  ;;  %4433 = vmatmul.msk.bf16.vlgmr.msra.gmra.mxu1 %vm1067_vm9, %v1054_v51  ;;  %v892_v51 = vshrl.u32 %v891_v49, 7  ;;  %v4769_v49 = vld [vmem:[%s6369_s4 + $0x4] ss:$0 sm:$0xff] }
 0x3d4   :  { %1105 = vmatpush.bf16.xpose.msra.mxu0 %v1096_v29 }
 0x3d5   :  { %vm895_vm10 = vcmp.le.s32.totalorder %v5490_v3, %v892_v51 }
 0x3db   :  { %4434 = vmatmul.msk.bf16.vlgmr.msra.gmra.mxu0 %vm1067_vm9, %v1055_v5 }
 0x3dc   :  { %v4675_v4 = vpop.permute.xlu1 %4674  ;;  %v4670_v30 = vpop.permute.xlu0 %4669 }
 0x3dd   :  { %v4676_v53 = vunpack.i.l.bf16 %v4675_v4  ;;  %v4672_v31 = vunpack.i.h.bf16 %v4670_v30  ;;  %v4671_v7 = vunpack.i.l.bf16 %v4670_v30  ;;  %v4677_v35 = vunpack.i.h.bf16 %v4675_v4 }
 0x3df   :  { %v5466_v34 = vpack.c.bf16 %v4676_v53, %v4676_v53  ;;  %v1059_v33 = vpack.c.bf16 %v4672_v31, %v4672_v31  ;;  %v1058_v9 = vpack.c.bf16 %v4671_v7, %v4671_v7  ;;  %v1061_v62 = vpack.c.bf16 %v4677_v35, %v4677_v35 }
 0x3e1   :  { %v1184_v23 = vunpack.c.l.b16 %v1059_v33  ;;  %v1208_v26 = vunpack.c.l.b16 %v5466_v34  ;;  %v1160_v36 = vunpack.c.l.b16 %v1058_v9  ;;  %v1232_v41 = vunpack.c.l.b16 %v1061_v62 }
 0x3e3   :  { %v5469_v38 = vpack.c.b16 %v1184_v23, %v1184_v23  ;;  %v5471_v60 = vpack.c.b16 %v1208_v26, %v1208_v26  ;;  %v5473_v39 = vpack.c.b16 %v1160_v36, %v1160_v36  ;;  %v5481_v2 = vpack.c.b16 %v1232_v41, %v1232_v41  ;;  %v4767_v41 = vld [vmem:[%s6369_s4 + $0x2] ss:$0 sm:$0xff] }
 0x3e5   :  { %1186 = vrot.lane.b32.xlu1 %v5469_v38, %s4992_s18  ;;  %1210 = vrot.lane.b32.xlu0 %v5471_v60, %s4992_s18 }
 0x3e6   :  { %1162 = vrot.lane.b32.xlu2 %v5473_v39, %s4992_s18 }
 0x3ee   :  { %1234 = vrot.lane.b32.xlu2 %v5481_v2, %s4992_s18 }
 0x41b   :  { %v1115_v21 = vpop.permute.xlu2 %1114 }
 0x41c   :  { %v1120_v11 = vsel %vm1067_vm9, %v1115_v21, 0 }
 0x41d   :  { %1129 = vmatpush.bf16.xpose.msrb.mxu2 %v1120_v11 }
 0x424   :  { %4435 = vmatmul.msk.bf16.vlgmr.msrb.gmra.mxu2 %vm1067_vm9, %v1056_v12  ;;  %v5500_v12 = vsel %vm895_vm10, 0.0, %v4993_v50 }
 0x425   :  { %v5503_v54 = vadd.f32 %v4765_v59, %v5500_v12  ;;  %v5513_v30 = vadd.f32 %v4766_v27, %v5500_v12  ;;  %v5527_v21 = vadd.f32 %v4767_v41, %v5500_v12 }
 0x43b   :  { %v1139_v16 = vpop.permute.xlu0 %1138 }
 0x43c   :  { %v1144_v44 = vsel %vm1067_vm9, %v1139_v16, 0 }
 0x43d   :  { %1153 = vmatpush.bf16.xpose.msrb.mxu1 %v1144_v44 }
 0x440   :  { %v1163_v45 = vpop.permute.xlu2 %1162 }
 0x441   :  { %v1168_v48 = vsel %vm1067_vm9, %v1163_v45, 0 }
 0x442   :  { %1177 = vmatpush.bf16.xpose.msrb.mxu0 %v1168_v48 }
 0x444   :  { %4436 = vmatmul.msk.bf16.vlgmr.msrb.gmra.mxu1 %vm1067_vm9, %v1057_v17 }
 0x448   :  { %v1235_v56 = vpop.permute.xlu2 %1234 }
 0x449   :  { %v1240_v5 = vsel %vm1067_vm9, %v1235_v56, 0  ;;  %4437 = vmatmul.msk.bf16.vlgmr.msrb.gmra.mxu0 %vm1067_vm9, %v1058_v9 }
 0x44a   :  { %1249 = vmatpush.bf16.xpose.msra.mxu0 %v1240_v5  ;;  %v5547_v5 = vadd.f32 %v4769_v49, %v5500_v12 }
 0x450   :  { %v1083_v17 = vpop.f32.mrf.mxu1 }
 0x451   :  { %v1255_v61 = vmul.f32 0.35355338, %v1083_v17 }
 0x453   :  { %v1263_v0 = vadd.f32 %v1255_v61, %v5503_v54 }
 0x455   :  { %v1271_v1 = vsel %vm1067_vm9, %v1263_v0, -inf }
 0x456   :  { %1272 = vmax.xlane.f32.xlu1 %v1271_v1 }
 0x457   :  { %v1187_v29 = vpop.permute.xlu1 %1186  ;;  %v1211_v4 = vpop.permute.xlu0 %1210 }
 0x458   :  { %v1192_v53 = vsel %vm1067_vm9, %v1187_v29, 0  ;;  %v1216_v31 = vsel %vm1067_vm9, %v1211_v4, 0  ;;  %v1085_v7 = vpop.f32.mrf.mxu1  ;;  %v1107_v9 = vpop.f32.mrf.mxu0 }
 0x459   :  { %v1256_v35 = vmul.f32 0.35355338, %v1107_v9  ;;  %4440 = vmatmul.msk.bf16.vlgmr.msra.gmra.mxu0 %vm1067_vm9, %v1061_v62  ;;  %1201 = vmatpush.bf16.xpose.msra.mxu2 %v1192_v53  ;;  %v4770_v9 = vld [vmem:[%s6369_s4 + $0x7] ss:$0 sm:$0xff] }
 0x45a   :  { %1225 = vmatpush.bf16.xpose.msra.mxu1 %v1216_v31 }
 0x45b   :  { %v1264_v23 = vadd.f32 %v1256_v35, %v5513_v30 }
 0x45d   :  { %v1274_v26 = vsel %vm1067_vm9, %v1264_v23, -inf }
 0x45e   :  { %1275 = vmax.xlane.f32.xlu0 %v1274_v26 }
 0x460   :  { %v1109_v36 = vpop.f32.mrf.mxu0  ;;  %4438 = vmatmul.msk.bf16.vlgmr.msra.gmra.mxu2 %vm1067_vm9, %v1059_v33 }
 0x461   :  { %4439 = vmatmul.msk.bf16.vlgmr.msra.gmra.mxu1 %vm1067_vm9, %v5466_v34  ;;  %v4768_v34 = vld [vmem:[%s6369_s4 + $0x3] ss:$0 sm:$0xff] }
 0x462   :  { %v5538_v45 = vadd.f32 %v4768_v34, %v5500_v12 }
 0x4a7   :  { %v1131_v62 = vpop.f32.mrf.mxu2 }
 0x4a8   :  { %v1257_v11 = vmul.f32 0.35355338, %v1131_v62 }
 0x4aa   :  { %v5530_v16 = vadd.f32 %v1257_v11, %v5527_v21 }
 0x4ac   :  { %v1277_v44 = vsel %vm1067_vm9, %v5530_v16, -inf }
 0x4ad   :  { %1278 = vmax.xlane.f32.xlu2 %v1277_v44 }
 0x4af   :  { %v1133_v33 = vpop.f32.mrf.mxu2 }
 0x4b0   :  { %v4771_v33 = vld [vmem:[%s6369_s4 + $0x6] ss:$0 sm:$0xff] }
 0x4b1   :  { %v5570_v49 = vadd.f32 %v4771_v33, %v5500_v12 }
 0x4c1   :  { %v1155_v48 = vpop.f32.mrf.mxu1 }
 0x4c2   :  { %v1258_v51 = vmul.f32 0.35355338, %v1155_v48 }
 0x4c4   :  { %v5544_v56 = vadd.f32 %v1258_v51, %v5538_v45 }
 0x4c6   :  { %v1179_v59 = vpop.f32.mrf.mxu0  ;;  %v1280_v50 = vsel %vm1067_vm9, %v5544_v56, -inf }
 0x4c7   :  { %v1259_v17 = vmul.f32 0.35355338, %v1179_v59  ;;  %1281 = vmax.xlane.f32.xlu1 %v1280_v50  ;;  %v4772_v50 = vld [vmem:[%s6369_s4 + $0x5] ss:$0 sm:$0xff]  ;;  %s4994_s4 = smov 64  }
 0x4c9   :  { %v1273_v61 = vpop.xlane.xlu1 %1272  ;;  %v1157_v27 = vpop.f32.mrf.mxu1  ;;  %v1267_v1 = vadd.f32 %v1259_v17, %v5547_v5 }
 0x4ca   :  { %v1295_v29 = vsub.f32 %v1263_v0, %v1273_v61  ;;  %v5561_v0 = vadd.f32 %v4770_v9, %v5500_v12  ;;  %v5577_v27 = vadd.f32 %v4772_v50, %v5500_v12 }
 0x4cb   :  { %v1283_v4 = vsel %vm1067_vm9, %v1267_v1, -inf }
 0x4cc   :  { %v1303_v53 = vmul.f32 1.442695, %v1295_v29  ;;  %1284 = vmax.xlane.f32.xlu0 %v1283_v4 }
 0x4ce   :  { %4801 = vpow2.f32 %v1303_v53  ;;  %v1181_v31 = vpop.f32.mrf.mxu0 }
 0x4d1   :  { %v1276_v7 = vpop.xlane.xlu0 %1275 }
 0x4d2   :  { %v1296_v35 = vsub.f32 %v1264_v23, %v1276_v7 }
 0x4d4   :  { %v5556_v26 = vpop.eup %4801  ;;  %v1305_v36 = vmul.f32 1.442695, %v1296_v35 }
 0x4d5   :  { %v1319_v41 = vsel %vm1067_vm9, %v5556_v26, 0.0 }
 0x4d6   :  { %4803 = vpow2.f32 %v1305_v36  ;;  %v1251_v62 = vpop.f32.mrf.mxu0  ;;  %1320 = vadd.xlane.f32.xlu2 %v1319_v41 }
 0x4d7   :  { %v1262_v11 = vmul.f32 0.35355338, %v1251_v62 }
 0x4d9   :  { %v1270_v44 = vadd.f32 %v1262_v11, %v5561_v0 }
 0x4db   :  { %v1292_v23 = vsel %vm1067_vm9, %v1270_v44, -inf }
 0x4dc   :  { %v4804_v34 = vpop.eup %4803  ;;  %1293 = vmax.xlane.f32.xlu0 %v1292_v23 }
 0x4dd   :  { %v1322_v48 = vsel %vm1067_vm9, %v4804_v34, 0.0 }
 0x4de   :  { %v1227_v51 = vpop.f32.mrf.mxu1  ;;  %v1253_v59 = vpop.f32.mrf.mxu0  ;;  %1323 = vadd.xlane.f32.xlu1 %v1322_v48 }
 0x4df   :  { %v1261_v17 = vmul.f32 0.35355338, %v1227_v51 }
 0x4e1   :  { %v1269_v61 = vadd.f32 %v1261_v17, %v5570_v49 }
 0x4e3   :  { %v1203_v29 = vpop.f32.mrf.mxu2  ;;  %v1289_v53 = vsel %vm1067_vm9, %v1269_v61, -inf }
 0x4e4   :  { %v1260_v4 = vmul.f32 0.35355338, %v1203_v29 }
 0x4e6   :  { %v1229_v31 = vpop.f32.mrf.mxu1  ;;  %1290 = vmax.xlane.f32.xlu1 %v1289_v53  ;;  %v5581_v7 = vadd.f32 %v1260_v4, %v5577_v27 }
 0x4e8   :  { %v1286_v9 = vsel %vm1067_vm9, %v5581_v7, -inf }
 0x4e9   :  { %1287 = vmax.xlane.f32.xlu2 %v1286_v9 }
 0x4eb   :  { %v1205_v35 = vpop.f32.mrf.mxu2 }
 0x4f0   :  { %1389 = vrot.lane.b32.xlu0 %v5450_v63, %s4994_s4 }
 0x4ff   :  { %1367 = vrot.lane.b32.xlu1 %v5446_v46, %s4994_s4 }
 0x501   :  { %1410 = vrot.lane.b32.xlu2 %v5454_v14, %s4994_s4 }
 0x520   :  { %v1279_v12 = vpop.xlane.xlu2 %1278 }
 0x521   :  { %v1297_v36 = vsub.f32 %v5530_v16, %v1279_v12 }
 0x523   :  { %v1307_v41 = vmul.f32 1.442695, %v1297_v36 }
 0x525   :  { %4805 = vpow2.f32 %v1307_v41 }
 0x52b   :  { %v5592_v62 = vpop.eup %4805 }
 0x52c   :  { %v1325_v11 = vsel %vm1067_vm9, %v5592_v62, 0.0 }
 0x52d   :  { %1326 = vadd.xlane.f32.xlu0 %v1325_v11 }
 0x53a   :  { %v1282_v33 = vpop.xlane.xlu1 %1281 }
 0x53b   :  { %v1298_v46 = vsub.f32 %v5544_v56, %v1282_v33 }
 0x53d   :  { %v1309_v48 = vmul.f32 1.442695, %v1298_v46 }
 0x53f   :  { %v1285_v23 = vpop.xlane.xlu0 %1284 }
 0x540   :  { %v1299_v63 = vsub.f32 %v1267_v1, %v1285_v23 }
 0x541   :  { %1431 = vrot.lane.b32.xlu0 %v5458_v19, %s4994_s4 }
 0x542   :  { %v1311_v14 = vmul.f32 1.442695, %v1299_v63 }
 0x544   :  { %4807 = vpow2.f32 %v1311_v14 }
 0x545   :  { %4809 = vpow2.f32 %v1309_v48 }
 0x549   :  { %v1321_v17 = vpop.xlane.xlu2 %1320 }
 0x54a   :  { %v5599_v16 = vpop.eup %4807 }
 0x54b   :  { %v1331_v51 = vsel %vm1067_vm9, %v5599_v16, 0.0  ;;  %v5603_v59 = vpop.eup %4809 }
 0x54c   :  { %1332 = vadd.xlane.f32.xlu2 %v1331_v51  ;;  %v1328_v1 = vsel %vm1067_vm9, %v5603_v59, 0.0 }
 0x54f   :  { %v1294_v19 = vpop.xlane.xlu0 %1293 }
 0x550   :  { %v1302_v56 = vsub.f32 %v1270_v44, %v1294_v19 }
 0x551   :  { %v1324_v50 = vpop.xlane.xlu1 %1323 }
 0x552   :  { %4811 = vrcp.f32 %v1324_v50  ;;  %v1317_v9 = vmul.f32 1.442695, %v1302_v56 }
 0x554   :  { %1329 = vadd.xlane.f32.xlu2 %v1328_v1 }
 0x558   :  { %v4812_v35 = vpop.eup %4811 }
 0x559   :  { %v1291_v29 = vpop.xlane.xlu1 %1290  ;;  %v1352_v12 = vmul.f32 %v4812_v35, %v4804_v34 }
 0x55a   :  { %v1301_v4 = vsub.f32 %v1269_v61, %v1291_v29 }
 0x55b   :  { %v1360_v23 = vpack.c.bf16 %v1352_v12, %v1352_v12 }
 0x55c   :  { %v1315_v53 = vmul.f32 1.442695, %v1301_v4  ;;  %v1288_v31 = vpop.xlane.xlu2 %1287 }
 0x55d   :  { %v1300_v1 = vsub.f32 %v5581_v7, %v1288_v31 }
 0x55e   :  { %4813 = vpow2.f32 %v1315_v53 }
 0x55f   :  { %4815 = vpow2.f32 %v1317_v9 }
 0x560   :  { %4817 = vrcp.f32 %v1321_v17  ;;  %v1313_v17 = vmul.f32 1.442695, %v1300_v1 }
 0x562   :  { %v1390_v36 = vpop.permute.xlu0 %1389  ;;  %4819 = vpow2.f32 %v1313_v17 }
 0x563   :  { %v1395_v41 = vsel %vm1372_vm11, %v1390_v36, 0 }
 0x564   :  { %v5608_v11 = vpop.eup %4813  ;;  %1404 = vmatpush.bf16.msrb.mxu3 %v1395_v41  ;;  %v1411_v33 = vpop.permute.xlu2 %1410 }
 0x565   :  { %v1416_v44 = vsel %vm1372_vm11, %v1411_v33, 0  ;;  %v1337_v61 = vsel %vm1067_vm9, %v5608_v11, 0.0  ;;  %v4816_v63 = vpop.eup %4815 }
 0x566   :  { %1338 = vadd.xlane.f32.xlu1 %v1337_v61  ;;  %1425 = vmatpush.bf16.msrb.mxu1 %v1416_v44  ;;  %v1340_v34 = vsel %vm1067_vm9, %v4816_v63, 0.0  ;;  %v4818_v46 = vpop.eup %4817  ;;  %v1537_v44 = vld [vmem:[%s6371_s6 + $0x10] sm:$0xf] }
 0x567   :  { %4442 = vmatmul.msk.bf16.vlgmr.msrb.gmra.mxu3 %vm1067_vm9, %v1360_v23  ;;  %v1351_v14 = vmul.f32 %v4818_v46, %v5556_v26 }
 0x569   :  { %v1359_v50 = vpack.c.bf16 %v1351_v14, %v1351_v14 }
 0x56b   :  { %1341 = vadd.xlane.f32.xlu0 %v1340_v34 }
 0x56c   :  { %1452 = vrot.lane.b32.xlu2 %v5473_v39, %s4994_s4  ;;  %v4820_v39 = vpop.eup %4819 }
 0x56d   :  { %v1334_v26 = vsel %vm1067_vm9, %v4820_v39, 0.0 }
 0x571   :  { %v1368_v48 = vpop.permute.xlu1 %1367 }
 0x572   :  { %v1374_v51 = vsel %vm1372_vm11, %v1368_v48, 0 }
 0x573   :  { %1383 = vmatpush.bf16.msrb.mxu2 %v1374_v51 }
 0x574   :  { %1473 = vrot.lane.b32.xlu2 %v5469_v38, %s4994_s4 }
 0x576   :  { %4441 = vmatmul.msk.bf16.vlgmr.msrb.gmra.mxu2 %vm1067_vm9, %v1359_v50 }
 0x57f   :  { %1515 = vrot.lane.b32.xlu1 %v5481_v2, %s4994_s4 }
 0x59d   :  { %1335 = vadd.xlane.f32.xlu2 %v1334_v26 }
 0x5a0   :  { %v1327_v19 = vpop.xlane.xlu0 %1326 }
 0x5a1   :  { %4821 = vrcp.f32 %v1327_v19 }
 0x5a7   :  { %v4822_v56 = vpop.eup %4821 }
 0x5a8   :  { %v1353_v29 = vmul.f32 %v4822_v56, %v5592_v62 }
 0x5aa   :  { %v1361_v4 = vpack.c.bf16 %v1353_v29, %v1353_v29 }
 0x5ac   :  { %4443 = vmatmul.msk.bf16.vlgmr.msrb.gmra.mxu1 %vm1067_vm9, %v1361_v4 }
 0x5b3   :  { %v1432_v38 = vpop.permute.xlu0 %1431 }
 0x5b4   :  { %v1437_v53 = vsel %vm1372_vm11, %v1432_v38, 0 }
 0x5b5   :  { %1494 = vrot.lane.b32.xlu2 %v5471_v60, %s4994_s4  ;;  %1446 = vmatpush.bf16.msrb.mxu0 %v1437_v53 }
 0x5bf   :  { %v1333_v2 = vpop.xlane.xlu2 %1332 }
 0x5c0   :  { %4823 = vrcp.f32 %v1333_v2 }
 0x5c6   :  { %v4824_v31 = vpop.eup %4823 }
 0x5c7   :  { %v1330_v7 = vpop.xlane.xlu2 %1329  ;;  %v1355_v35 = vmul.f32 %v4824_v31, %v5599_v16  ;;  %v1543_v16 = vsel %vm1372_vm11, %v1537_v44, 0 }
 0x5c8   :  { %4825 = vrcp.f32 %v1330_v7 }
 0x5c9   :  { %v1363_v33 = vpack.c.bf16 %v1355_v35, %v1355_v35  ;;  %v1562_v35 = vld [vmem:[%s6371_s6 + $0x14] sm:$0xf] }
 0x5ce   :  { %v4826_v9 = vpop.eup %4825 }
 0x5cf   :  { %v1354_v62 = vmul.f32 %v4826_v9, %v5603_v59  ;;  %v1453_v12 = vpop.permute.xlu2 %1452 }
 0x5d0   :  { %v1458_v36 = vsel %vm1372_vm11, %v1453_v12, 0 }
 0x5d1   :  { %v1362_v41 = vpack.c.bf16 %v1354_v62, %v1354_v62  ;;  %1467 = vmatpush.bf16.msra.mxu2 %v1458_v36  ;;  %v1568_v62 = vsel %vm1372_vm11, %v1562_v35, 0 }
 0x5d3   :  { %4444 = vmatmul.msk.bf16.vlgmr.msrb.gmra.mxu0 %vm1067_vm9, %v1362_v41 }
 0x5d4   :  { %4445 = vmatmul.msk.bf16.vlgmr.msra.gmra.mxu2 %vm1067_vm9, %v1363_v33 }
 0x5d5   :  { %1552 = vmatpush.bf16.msrb.mxu2 %v1543_v16 }
 0x5d7   :  { %v1474_v60 = vpop.permute.xlu2 %1473 }
 0x5d8   :  { %v1479_v23 = vsel %vm1372_vm11, %v1474_v60, 0 }
 0x5d9   :  { %1488 = vmatpush.bf16.msra.mxu3 %v1479_v23  ;;  %v1339_v61 = vpop.xlane.xlu1 %1338  ;;  %v1610_v23 = vld [vmem:[%s6371_s6 + $0x1c] sm:$0xf] }
 0x5da   :  { %v1616_v44 = vsel %vm1372_vm11, %v1610_v23, 0  ;;  %v4639_v23 = vld [vmem:[%s6371_s6 + $0x28] sm:$0xff] }
 0x5db   :  { %1728 = vrot.lane.b32.xlu1 %v4639_v23, %s4992_s18  ;;  %1716 = vmatpush.bf16.msra.mxu2 %v4639_v23 }
 0x5dd   :  { %1577 = vmatpush.bf16.msrb.mxu3 %v1568_v62 }
 0x5de   :  { %v1342_v59 = vpop.xlane.xlu0 %1341 }
 0x5df   :  { %4827 = vrcp.f32 %v1342_v59  ;;  %v1586_v59 = vld [vmem:[%s6371_s6 + $0x18] sm:$0xf] }
 0x5e0   :  { %4829 = vrcp.f32 %v1339_v61  ;;  %v1592_v61 = vsel %vm1372_vm11, %v1586_v59, 0 }
 0x5e5   :  { %v4828_v46 = vpop.eup %4827 }
 0x5e6   :  { %v1358_v14 = vmul.f32 %v4828_v46, %v4816_v63  ;;  %v4830_v29 = vpop.eup %4829 }
 0x5e7   :  { %v1357_v63 = vmul.f32 %v4830_v29, %v5608_v11 }
 0x5e8   :  { %v1366_v1 = vpack.c.bf16 %v1358_v14, %v1358_v14 }
 0x5e9   :  { %v1365_v31 = vpack.c.bf16 %v1357_v63, %v1357_v63 }
 0x5ea   :  { %v1406_v34 = vpop.f32.mrf.mxu3 }
 0x5f1   :  { %v1516_v48 = vpop.permute.xlu1 %1515 }
 0x5f2   :  { %v1521_v51 = vsel %vm1372_vm11, %v1516_v48, 0  ;;  %v1408_v50 = vpop.f32.mrf.mxu3 }
 0x5f3   :  { %1530 = vmatpush.bf16.msra.mxu0 %v1521_v51 }
 0x5f6   :  { %4448 = vmatmul.msk.bf16.vlgmr.msra.gmra.mxu0 %vm1067_vm9, %v1366_v1 }
 0x5f7   :  { %1625 = vmatpush.bf16.msrb.mxu0 %v1616_v44  ;;  %v4638_v44 = vld [vmem:[%s6371_s6 + $0x20] sm:$0xff] }
 0x5f8   :  { %1717 = vmatpush.bf16.msra.mxu2 %v4638_v44 }
 0x5f9   :  { %v1385_v17 = vpop.f32.mrf.mxu2 }
 0x5fa   :  { %v1538_v26 = vpack.c.bf16 %v1406_v34, %v1385_v17  ;;  %v4773_v17 = vld [vmem:[%s6372_s7 + $0x4] ss:$0 sm:$0xff] }
 0x5fc   :  { %4449 = vmatmul.msk.bf16.vlgmr.msrb.gmra.mxu2 %vm1067_vm9, %v1538_v26 }
 0x601   :  { %v1387_v19 = vpop.f32.mrf.mxu2 }
 0x610   :  { %v1336_v56 = vpop.xlane.xlu2 %1335 }
 0x611   :  { %4831 = vrcp.f32 %v1336_v56 }
 0x617   :  { %v4832_v4 = vpop.eup %4831 }
 0x618   :  { %v1356_v38 = vmul.f32 %v4832_v4, %v4820_v39  ;;  %v1495_v53 = vpop.permute.xlu2 %1494 }
 0x619   :  { %v1500_v2 = vsel %vm1372_vm11, %v1495_v53, 0 }
 0x61a   :  { %v1364_v7 = vpack.c.bf16 %v1356_v38, %v1356_v38  ;;  %1509 = vmatpush.bf16.msra.mxu1 %v1500_v2 }
 0x61c   :  { %4446 = vmatmul.msk.bf16.vlgmr.msra.gmra.mxu3 %vm1067_vm9, %v1364_v7 }
 0x61d   :  { %4447 = vmatmul.msk.bf16.vlgmr.msra.gmra.mxu1 %vm1067_vm9, %v1365_v31  ;;  %v4959_v31 = vld [vmem:[%s6368_s3 + $0x10] sm:$0xff] }
 0x61e   :  { %1601 = vmatpush.bf16.msrb.mxu1 %v1592_v61 }
 0x629   :  { %v1427_v9 = vpop.f32.mrf.mxu1 }
 0x631   :  { %v1429_v11 = vpop.f32.mrf.mxu1 }
 0x650   :  { %v1448_v39 = vpop.f32.mrf.mxu0 }
 0x651   :  { %v1563_v12 = vpack.c.bf16 %v1448_v39, %v1427_v9 }
 0x653   :  { %4450 = vmatmul.msk.bf16.vlgmr.msrb.gmra.mxu3 %vm1067_vm9, %v1563_v12 }
 0x657   :  { %v1469_v36 = vpop.f32.mrf.mxu2 }
 0x658   :  { %v1450_v41 = vpop.f32.mrf.mxu0 }
 0x659   :  { %v4960_v41 = vld [vmem:[%s6368_s3 + $0x18] sm:$0xff] }
 0x65f   :  { %v1471_v33 = vpop.f32.mrf.mxu2 }
 0x673   :  { %v1532_v60 = vpop.f32.mrf.mxu0 }
 0x67b   :  { %v1534_v16 = vpop.f32.mrf.mxu0 }
 0x67f   :  { %v1554_v1 = vpop.f32.mrf.mxu2 }
 0x680   :  { %v1560_v19 = vadd.f32 %v4773_v17, %v1554_v1 }
 0x687   :  { %v1556_v38 = vpop.f32.mrf.mxu2 }
 0x688   :  { %v1561_v7 = vadd.f32 %v4773_v17, %v1556_v38  ;;  %v1729_v17 = vpop.permute.xlu1 %1728 }
 0x689   :  { %1748 = vmatpush.bf16.msra.mxu3 %v1729_v17 }
 0x69a   :  { %v1511_v34 = vpop.f32.mrf.mxu1 }
 0x69b   :  { %v1611_v46 = vpack.c.bf16 %v1532_v60, %v1511_v34 }
 0x69d   :  { %4452 = vmatmul.msk.bf16.vlgmr.msrb.gmra.mxu0 %vm1067_vm9, %v1611_v46 }
 0x69f   :  { %v1490_v14 = vpop.f32.mrf.mxu3 }
 0x6a0   :  { %v1587_v48 = vpack.c.bf16 %v1490_v14, %v1469_v36 }
 0x6a2   :  { %v1513_v51 = vpop.f32.mrf.mxu1  ;;  %4451 = vmatmul.msk.bf16.vlgmr.msrb.gmra.mxu1 %vm1067_vm9, %v1587_v48 }
 0x6a7   :  { %v1492_v50 = vpop.f32.mrf.mxu3 }
 0x6d6   :  { %v1579_v26 = vpop.f32.mrf.mxu3 }
 0x6d7   :  { %v1584_v56 = vadd.f32 %v1579_v26, %v1560_v19  ;;  %v4961_v19 = vld [vmem:[%s6372_s7 + $0x1] ss:$0 sm:$0xff] }
 0x6de   :  { %v1581_v2 = vpop.f32.mrf.mxu3 }
 0x6df   :  { %v1585_v35 = vadd.f32 %v1581_v2, %v1561_v7 }
 0x71a   :  { %v1627_v29 = vpop.f32.mrf.mxu0 }
 0x71f   :  { %v1603_v4 = vpop.f32.mrf.mxu1 }
 0x720   :  { %v1608_v63 = vadd.f32 %v1603_v4, %v1584_v56  ;;  %v356_v56 = vadd.f32 %v4961_v19, %v5354_v57 }
 0x722   :  { %v1632_v53 = vadd.f32 %v1627_v29, %v1608_v63  ;;  %v1629_v12 = vpop.f32.mrf.mxu0  ;;  %v392_v4 = vadd.f32 %v5358_v6, %v356_v56 }
 0x724   :  { %v5669_v9 = vadd.f32 %v4959_v31, %v1632_v53  ;;  %v428_v38 = vadd.f32 %v5362_v8, %v392_v4  ;;  %v5713_v8 = vld [vmem:[%s6372_s7 + $0x5] ss:$0 sm:$0xff] }
 0x725   :  { %1733 = vrot.lane.b32.xlu1 %v5713_v8, %s4992_s18 }
 0x726   :  { %v1638_v62 = vsel %vm78_vm0, %v5669_v9, 0.0  ;;  %v464_v53 = vadd.f32 %v5366_v13, %v428_v38 }
 0x727   :  { %1639 = vadd.xlane.f32.xlu2 %v1638_v62  ;;  %v1605_v11 = vpop.f32.mrf.mxu1 }
 0x728   :  { %v1609_v39 = vadd.f32 %v1605_v11, %v1585_v35  ;;  %v500_v7 = vadd.f32 %v5370_v15, %v464_v53 }
 0x72a   :  { %v1633_v36 = vadd.f32 %v1629_v12, %v1609_v39  ;;  %v536_v62 = vadd.f32 %v5374_v18, %v500_v7  ;;  %v726_v18 = vadd.f32 %v4961_v19, %v5422_v32 }
 0x72c   :  { %v5676_v33 = vadd.f32 %v4960_v41, %v1633_v36  ;;  %v572_v39 = vadd.f32 %v5378_v22, %v536_v62  ;;  %v746_v22 = vadd.f32 %v5425_v10, %v726_v18  ;;  %v186_v10 = vld [vmem:[%s6368_s3] sm:$0xff] }
 0x72e   :  { %v1641_v60 = vsel %vm78_vm0, %v5676_v33, 0.0  ;;  %v608_v13 = vadd.f32 %v5380_v24, %v572_v39  ;;  %v187_v24 = vld [vmem:[%s6368_s3 + $0x8] sm:$0xff] }
 0x72f   :  { %1642 = vadd.xlane.f32.xlu0 %v1641_v60 }
 0x730   :  { %v644_v15 = vadd.f32 %v5419_v42, %v608_v13  ;;  %v645_v42 = vmax.f32 %v5384_v28, 0.0  ;;  %v4774_v28 = vld [vmem:[%s6372_s7 + $0xb] ss:$0 sm:$0xff] }
 0x79a   :  { %v1640_v16 = vpop.xlane.xlu2 %1639 }
 0x79b   :  { %v1644_v59 = vmul.f32 %v1640_v16, %v5279_v40  ;;  %v766_v16 = vadd.f32 %v5427_v37, %v746_v22 }
 0x79d   :  { %v1646_v61 = vsub.f32 %v5669_v9, %v1644_v59  ;;  %v786_v32 = vadd.f32 %v5429_v25, %v766_v16 }
 0x79f   :  { %v1648_v34 = vmul.f32 %v1646_v61, %v1646_v61  ;;  %v806_v37 = vadd.f32 %v5431_v20, %v786_v32 }
 0x7a1   :  { %v1650_v46 = vsel %vm78_vm0, %v1648_v34, 0.0 }
 0x7a2   :  { %1651 = vadd.xlane.f32.xlu0 %v1650_v46  ;;  %v1643_v14 = vpop.xlane.xlu0 %1642 }
 0x7a3   :  { %v1645_v48 = vmul.f32 %v1643_v14, %v5279_v40 }
 0x7a5   :  { %v5692_v51 = vsub.f32 %v5676_v33, %v1645_v48 }
 0x7a7   :  { %v1649_v50 = vmul.f32 %v5692_v51, %v5692_v51 }
 0x7a9   :  { %v1653_v1 = vsel %vm78_vm0, %v1649_v50, 0.0  ;;  %v647_v50 = vadd.f32 %v645_v42, %v186_v10 }
 0x7aa   :  { %1654 = vadd.xlane.f32.xlu0 %v1653_v1  ;;  %v826_v1 = vadd.f32 %v5438_v47, %v806_v37  ;;  %v4775_v47 = vld [vmem:[%s6372_s7 + $0xc] ss:$0 sm:$0xff] }
 0x7ac   :  { %v846_v56 = vadd.f32 %v5433_v43, %v826_v1 }
 0x7be   :  { %1726 = vrot.lane.b32.xlu0 %v4638_v44, %s4992_s18  ;;  %v646_v44 = vmax.f32 %v644_v15, 0.0 }
 0x7c0   :  { %v648_v14 = vadd.f32 %v646_v44, %v187_v24 }
 0x7c2   :  { %v5735_v19 = vpack.c.bf16 %v648_v14, %v647_v50 }
 0x815   :  { %v1652_v26 = vpop.xlane.xlu0 %1651 }
 0x816   :  { %v1656_v29 = vmul.f32 %v1652_v26, %v5279_v40 }
 0x818   :  { %v1658_v63 = vadd.f32 1e-05, %v1656_v29  ;;  %v866_v29 = vadd.f32 %v5492_v55, %v846_v56 }
 0x81a   :  { %4833 = vrsqrt.f32 %v1658_v63  ;;  %vm1666_vm13 = vweird.f32 %v1658_v63 }
 0x81d   :  { %v1655_v2 = vpop.xlane.xlu0 %1654 }
 0x81e   :  { %v1657_v31 = vmul.f32 %v1655_v2, %v5279_v40 }
 0x820   :  { %v4834_v35 = vpop.eup %4833  ;;  %v1659_v11 = vadd.f32 1e-05, %v1657_v31  ;;  %v887_v31 = vmax.f32 %v5441_v52, 0.0 }
 0x821   :  { %v1661_v57 = vmul.f32 %v4834_v35, %v1658_v63  ;;  %vm1667_vm12 = vweird.f32 %v4834_v35 }
 0x822   :  { %4835 = vrsqrt.f32 %v1659_v11  ;;  %vm1668_vm14 = vmor %vm1666_vm13, %vm1667_vm12  ;;  %vm1676_vm2 = vweird.f32 %v1659_v11 }
 0x823   :  { %v1662_v6 = vmul.f32 %v4834_v35, %v1661_v57 }
 0x825   :  { %v1663_v12 = vmul.f32 0.5, %v1662_v6 }
 0x827   :  { %v1664_v36 = vsub.f32 1.5, %v1663_v12 }
 0x828   :  { %v4836_v41 = vpop.eup %4835 }
 0x829   :  { %v1665_v60 = vmul.f32 %v4834_v35, %v1664_v36  ;;  %v1671_v23 = vmul.f32 %v4836_v41, %v1659_v11  ;;  %vm1677_vm15 = vweird.f32 %v4836_v41  ;;  %v1734_v11 = vpop.permute.xlu1 %1733 }
 0x82a   :  { %vm1678_vm3 = vmor %vm1676_vm2, %vm1677_vm15 }
 0x82b   :  { %v1672_v59 = vmul.f32 %v4836_v41, %v1671_v23  ;;  %v1669_v34 = vsel %vm1668_vm14, %v4834_v35, %v1665_v60  ;;  %v889_v35 = vadd.f32 %v887_v31, %v186_v10 }
 0x82c   :  { %v1680_v25 = vmul.f32 %v1669_v34, %v1646_v61  ;;  %v886_v61 = vadd.f32 %v5505_v58, %v866_v29 }
 0x82d   :  { %v1673_v46 = vmul.f32 0.5, %v1672_v59 }
 0x82e   :  { %v1683_v4 = vmul.f32 %v4774_v28, %v1680_v25  ;;  %v888_v43 = vmax.f32 %v886_v61, 0.0 }
 0x82f   :  { %v1674_v48 = vsub.f32 1.5, %v1673_v46 }
 0x830   :  { %v1727_v17 = vpop.permute.xlu0 %1726  ;;  %v1686_v53 = vadd.f32 %v4775_v47, %v1683_v4  ;;  %v890_v55 = vadd.f32 %v888_v43, %v187_v24 }
 0x831   :  { %v1675_v26 = vmul.f32 %v4836_v41, %v1674_v48  ;;  %1749 = vmatpush.bf16.msra.mxu3 %v1727_v17 }
 0x832   :  { %v5748_v62 = vpack.c.bf16 %v890_v55, %v889_v35 }
 0x833   :  { %v1679_v20 = vsel %vm1678_vm3, %v4836_v41, %v1675_v26 }
 0x834   :  { %v1681_v63 = vmul.f32 %v1679_v20, %v5692_v51  ;;  %4462 = vmatmul.msk.bf16.vlgmr.msra.gmra.mxu3 %vm78_vm0, %v5735_v19 }
 0x836   :  { %v1684_v38 = vmul.f32 %v4774_v28, %v1681_v63 }
 0x838   :  { %v1687_v2 = vadd.f32 %v4775_v47, %v1684_v38 }
 0x83a   :  { %v1693_v7 = vpack.c.bf16 %v1687_v2, %v1686_v53 }
 0x83c   :  { %4461 = vmatmul.msk.bf16.vlgmr.msra.gmra.mxu2 %vm78_vm0, %v1693_v7 }
 0x844   :  { %4463 = vmatmul.msk.bf16.gmra.mxu3 %vm78_vm0, %v5748_v62 }
 0x8b7   :  { %v1751_v51 = vpop.f32.mrf.mxu3 }
 0x8b8   :  { %v1752_v57 = vadd.f32 %v1751_v51, %v1734_v11 }
 0x8ba   :  { %v1829_v6 = vpack.c.bf16 %v1752_v57, %v1752_v57 }
 0x8bc   :  { %v1847_v52 = vunpack.c.l.b16 %v1829_v6 }
 0x8bf   :  { %v1753_v58 = vpop.f32.mrf.mxu3  ;;  %v1719_v18 = vpop.f32.mrf.mxu2 }
 0x8c0   :  { %v1754_v39 = vadd.f32 %v1753_v58, %v1734_v11  ;;  %v1720_v22 = vadd.f32 %v5713_v8, %v1719_v18 }
 0x8c2   :  { %v4678_v13 = vpack.i.bf16 %v1754_v39, %v1752_v57  ;;  %v1830_v12 = vpack.c.bf16 %v1754_v39, %v1754_v39  ;;  %v1821_v16 = vpack.c.bf16 %v1720_v22, %v1720_v22 }
 0x8c4   :  { %4679 = vrot.lane.b32.xlu1 %v4678_v13, %s4989_s15  ;;  %v1848_v15 = vunpack.c.l.b16 %v1830_v12 }
 0x8c6   :  { %v5753_v36 = vpack.c.b16 %v1848_v15, %v1847_v52 }
 0x8c7   :  { %v1756_v41 = vpop.f32.mrf.mxu3  ;;  %v1721_v32 = vpop.f32.mrf.mxu2 }
 0x8c8   :  { %v1757_v60 = vadd.f32 %v1756_v41, %v1734_v11  ;;  %v1854_v23 = vsel %vm1067_vm9, %v5753_v36, 0  ;;  %v1722_v46 = vadd.f32 %v5713_v8, %v1721_v32 }
 0x8c9   :  { %1863 = vmatpush.bf16.xpose.msra.mxu1 %v1854_v23 }
 0x8ca   :  { %v4683_v44 = vpack.i.bf16 %v1757_v60, %v1720_v22  ;;  %v1831_v42 = vpack.c.bf16 %v1757_v60, %v1757_v60  ;;  %v4703_v1 = vpack.i.bf16 %v1752_v57, %v1722_v46  ;;  %v1822_v8 = vpack.c.bf16 %v1722_v46, %v1722_v46 }
 0x8cc   :  { %4684 = vrot.lane.b32.xlu2 %v4683_v44, %s4989_s15  ;;  %v1871_v14 = vunpack.c.l.b16 %v1831_v42 }
 0x8cf   :  { %v1758_v24 = vpop.f32.mrf.mxu3 }
 0x8d0   :  { %v1759_v59 = vadd.f32 %v1758_v24, %v1734_v11  ;;  %4464 = vmatmul.msk.bf16.vlgmr.msra.gmra.mxu1 %vm1067_vm9, %v1821_v16 }
 0x8d2   :  { %1793 = vrot.lane.b32.xlu0 %v1759_v59, %s4989_s15  ;;  %v4688_v10 = vpack.i.bf16 %v1759_v59, %v1757_v60  ;;  %v1832_v34 = vpack.c.bf16 %v1759_v59, %v1759_v59 }
 0x8d4   :  { %4699 = vrot.lane.b32.xlu2 %v4683_v44, %s4990_s16  ;;  %4689 = vrot.lane.b32.xlu1 %v4688_v10, %s4991_s17  ;;  %v1872_v37 = vunpack.c.l.b16 %v1832_v34 }
 0x8d6   :  { %v5764_v48 = vpack.c.b16 %v1872_v37, %v1871_v14 }
 0x8d8   :  { %v1878_v50 = vsel %vm1067_vm9, %v5764_v48, 0 }
 0x8d9   :  { %1887 = vmatpush.bf16.xpose.msra.mxu0 %v1878_v50 }
 0x8da   :  { %4704 = vrot.lane.b32.xlu0 %v4703_v1, %s4991_s17 }
 0x8dc   :  { %1778 = vrot.lane.b32.xlu2 %v1722_v46, %s4990_s16  ;;  %4694 = vrot.lane.b32.xlu1 %v4678_v13, %s4990_s16 }
 0x8e0   :  { %4465 = vmatmul.msk.bf16.vlgmr.msra.gmra.mxu0 %vm1067_vm9, %v1822_v8 }
 0x8e2   :  { %1766 = vrot.lane.b32.xlu0 %v1722_v46, %s4989_s15 }
 0x8e4   :  { %1799 = vrot.lane.b32.xlu1 %v1754_v39, %s4991_s17 }
 0x8ea   :  { %1769 = vrot.lane.b32.xlu0 %v1720_v22, %s4991_s17 }
 0x8ec   :  { %1817 = vrot.lane.b32.xlu1 %v1759_v59, %s4990_s16 }
 0x926   :  { %v4685_v47 = vpop.permute.xlu2 %4684 }
 0x927   :  { %v4687_v63 = vunpack.i.h.bf16 %v4685_v47  ;;  %v4686_v38 = vunpack.i.l.bf16 %v4685_v47 }
 0x929   :  { %v1835_v53 = vpack.c.bf16 %v4687_v63, %v4687_v63  ;;  %v1823_v43 = vpack.c.bf16 %v4686_v38, %v4686_v38 }
 0x92b   :  { %v1919_v55 = vunpack.c.l.b16 %v1835_v53 }
 0x92e   :  { %v4700_v8 = vpop.permute.xlu2 %4699 }
 0x936   :  { %v4680_v28 = vpop.permute.xlu1 %4679 }
 0x937   :  { %v4682_v25 = vunpack.i.h.bf16 %v4680_v28  ;;  %v4681_v17 = vunpack.i.l.bf16 %v4680_v28 }
 0x939   :  { %v1834_v26 = vpack.c.bf16 %v4682_v25, %v4682_v25  ;;  %v1833_v56 = vpack.c.bf16 %v4681_v17, %v4681_v17 }
 0x93b   :  { %v1896_v20 = vunpack.c.l.b16 %v1834_v26  ;;  %v1895_v29 = vunpack.c.l.b16 %v1833_v56  ;;  %v4702_v56 = vunpack.i.h.bf16 %v4700_v8 }
 0x93d   :  { %v5776_v4 = vpack.c.b16 %v1896_v20, %v1895_v29  ;;  %v4701_v20 = vunpack.i.l.bf16 %v4700_v8 }
 0x93f   :  { %v1902_v61 = vsel %vm1067_vm9, %v5776_v4, 0  ;;  %v1827_v38 = vpack.c.bf16 %v4701_v20, %v4701_v20 }
 0x940   :  { %1911 = vmatpush.bf16.xpose.msrb.mxu2 %v1902_v61  ;;  %v1843_v61 = vpack.c.bf16 %v4702_v56, %v4702_v56 }
 0x944   :  { %v1794_v2 = vpop.permute.xlu0 %1793 }
 0x945   :  { %v1836_v7 = vpack.c.bf16 %v1794_v2, %v1794_v2 }
 0x946   :  { %v4690_v31 = vpop.permute.xlu1 %4689 }
 0x947   :  { %v1920_v35 = vunpack.c.l.b16 %v1836_v7  ;;  %v4692_v51 = vunpack.i.h.bf16 %v4690_v31  ;;  %v4691_v11 = vunpack.i.l.bf16 %v4690_v31  ;;  %4466 = vmatmul.msk.bf16.vlgmr.msrb.gmra.mxu2 %vm1067_vm9, %v1823_v43 }
 0x949   :  { %v5781_v57 = vpack.c.b16 %v1920_v35, %v1919_v55  ;;  %v1840_v58 = vpack.c.bf16 %v4692_v51, %v4692_v51  ;;  %v1839_v39 = vpack.c.bf16 %v4691_v11, %v4691_v11  ;;  %v2015_v51 = vunpack.c.l.b16 %v1843_v61 }
 0x94b   :  { %v1968_v6 = vunpack.c.l.b16 %v1840_v58  ;;  %v1967_v13 = vunpack.c.l.b16 %v1839_v39  ;;  %v1926_v12 = vsel %vm1067_vm9, %v5781_v57, 0 }
 0x94c   :  { %v4705_v52 = vpop.permute.xlu0 %4704  ;;  %1935 = vmatpush.bf16.xpose.msrb.mxu1 %v1926_v12  ;;  %v1779_v12 = vpop.permute.xlu2 %1778 }
 0x94d   :  { %v5785_v15 = vpack.c.b16 %v1968_v6, %v1967_v13  ;;  %v1865_v18 = vpop.f32.mrf.mxu1  ;;  %v4707_v24 = vunpack.i.h.bf16 %v4705_v52  ;;  %v4706_v32 = vunpack.i.l.bf16 %v4705_v52  ;;  %v1828_v52 = vpack.c.bf16 %v1779_v12, %v1779_v12 }
 0x94e   :  { %v5787_v41 = vmul.f32 0.35355338, %v1865_v18  ;;  %v4695_v22 = vpop.permute.xlu1 %4694 }
 0x94f   :  { %v4697_v60 = vunpack.i.h.bf16 %v4695_v22  ;;  %v4696_v23 = vunpack.i.l.bf16 %v4695_v22  ;;  %v1974_v44 = vsel %vm1067_vm9, %v5785_v15, 0  ;;  %v1837_v14 = vpack.c.bf16 %v4707_v24, %v4707_v24 }
 0x950   :  { %v2046_v16 = vsel %vm2045_vm4, %v5787_v41, -inf  ;;  %1983 = vmatpush.bf16.xpose.msra.mxu2 %v1974_v44  ;;  %v1826_v28 = vpack.c.bf16 %v4706_v32, %v4706_v32 }
 0x951   :  { %v1842_v59 = vpack.c.bf16 %v4697_v60, %v4697_v60  ;;  %v1841_v42 = vpack.c.bf16 %v4696_v23, %v4696_v23  ;;  %2047 = vmax.xlane.f32.xlu0 %v2046_v16  ;;  %v1943_v29 = vunpack.c.l.b16 %v1837_v14 }
 0x953   :  { %v1992_v10 = vunpack.c.l.b16 %v1842_v59  ;;  %v1991_v34 = vunpack.c.l.b16 %v1841_v42 }
 0x954   :  { %v1767_v46 = vpop.permute.xlu0 %1766 }
 0x955   :  { %v5793_v37 = vpack.c.b16 %v1992_v10, %v1991_v34  ;;  %v1824_v50 = vpack.c.bf16 %v1767_v46, %v1767_v46  ;;  %v1867_v1 = vpop.f32.mrf.mxu1 }
 0x956   :  { %v1800_v25 = vpop.permute.xlu1 %1799 }
 0x957   :  { %v1838_v17 = vpack.c.bf16 %v1800_v25, %v1800_v25  ;;  %4467 = vmatmul.msk.bf16.vlgmr.msrb.gmra.mxu1 %vm1067_vm9, %v1824_v50  ;;  %v1998_v26 = vsel %vm1067_vm9, %v5793_v37, 0  ;;  %4469 = vmatmul.msk.bf16.vlgmr.msra.gmra.mxu2 %vm1067_vm9, %v1826_v28 }
 0x958   :  { %2007 = vmatpush.bf16.xpose.msrb.mxu3 %v1998_v26 }
 0x959   :  { %v1944_v47 = vunpack.c.l.b16 %v1838_v17 }
 0x95b   :  { %v5799_v63 = vpack.c.b16 %v1944_v47, %v1943_v29 }
 0x95c   :  { %v1770_v55 = vpop.permute.xlu0 %1769 }
 0x95d   :  { %v1889_v53 = vpop.f32.mrf.mxu0  ;;  %v1950_v2 = vsel %vm1067_vm9, %v5799_v63, 0  ;;  %v1825_v58 = vpack.c.bf16 %v1770_v55, %v1770_v55 }
 0x95e   :  { %v5803_v43 = vmul.f32 0.35355338, %v1889_v53  ;;  %1959 = vmatpush.bf16.xpose.msrb.mxu0 %v1950_v2  ;;  %v1818_v7 = vpop.permute.xlu1 %1817 }
 0x95f   :  { %v1844_v31 = vpack.c.bf16 %v1818_v7, %v1818_v7  ;;  %4470 = vmatmul.msk.bf16.vlgmr.msrb.gmra.mxu3 %vm1067_vm9, %v1827_v38 }
 0x960   :  { %v2049_v35 = vsel %vm2045_vm4, %v5803_v43, -inf }
 0x961   :  { %v2016_v11 = vunpack.c.l.b16 %v1844_v31  ;;  %2050 = vmax.xlane.f32.xlu1 %v2049_v35 }
 0x963   :  { %v5808_v39 = vpack.c.b16 %v2016_v11, %v2015_v51 }
 0x965   :  { %v1891_v6 = vpop.f32.mrf.mxu0  ;;  %4468 = vmatmul.msk.bf16.vlgmr.msrb.gmra.mxu0 %vm1067_vm9, %v1825_v58  ;;  %2142 = vrot.lane.b32.xlu0 %v5753_v36, %s4992_s18  ;;  %v2022_v13 = vsel %vm1067_vm9, %v5808_v39, 0 }
 0x966   :  { %2031 = vmatpush.bf16.xpose.msra.mxu1 %v2022_v13 }
 0x96d   :  { %4471 = vmatmul.msk.bf16.vlgmr.msra.gmra.mxu1 %vm1067_vm9, %v1828_v52 }
 0x97a   :  { %2180 = vrot.lane.b32.xlu1 %v5776_v4, %s4992_s18 }
 0x9c4   :  { %v2048_v22 = vpop.xlane.xlu0 %2047 }
 0x9c5   :  { %v2070_v4 = vsub.f32 %v5787_v41, %v2048_v22 }
 0x9c7   :  { %v2078_v8 = vmul.f32 1.442695, %v2070_v4 }
 0x9c9   :  { %4837 = vpow2.f32 %v2078_v8 }
 0x9ca   :  { %v1913_v18 = vpop.f32.mrf.mxu2 }
 0x9cb   :  { %v2039_v28 = vmul.f32 0.35355338, %v1913_v18 }
 0x9cd   :  { %v2052_v29 = vsel %vm2045_vm4, %v2039_v28, -inf }
 0x9cf   :  { %v4838_v47 = vpop.eup %4837 }
 0x9d0   :  { %v2094_v38 = vsel %vm2045_vm4, %v4838_v47, 0.0 }
 0x9d2   :  { %v1915_v60 = vpop.f32.mrf.mxu2 }
 0x9d4   :  { %v1937_v23 = vpop.f32.mrf.mxu1  ;;  %v2051_v14 = vpop.xlane.xlu1 %2050 }
 0x9d5   :  { %v2040_v25 = vmul.f32 0.35355338, %v1937_v23  ;;  %v2071_v7 = vsub.f32 %v5803_v43, %v2051_v14 }
 0x9d7   :  { %v2143_v44 = vpop.permute.xlu0 %2142  ;;  %v2055_v41 = vsel %vm2045_vm4, %v2040_v25, -inf  ;;  %v2080_v31 = vmul.f32 1.442695, %v2071_v7 }
 0x9d8   :  { %2155 = vmatpush.bf16.msra.mxu0 %v2143_v44 }
 0x9d9   :  { %4839 = vpow2.f32 %v2080_v31 }
 0x9da   :  { %v1985_v16 = vpop.f32.mrf.mxu2 }
 0x9db   :  { %v5818_v24 = vmul.f32 0.35355338, %v1985_v16 }
 0x9dc   :  { %v1939_v36 = vpop.f32.mrf.mxu1 }
 0x9dd   :  { %v2061_v59 = vsel %vm2045_vm4, %v5818_v24, -inf }
 0x9de   :  { %2062 = vmax.xlane.f32.xlu0 %v2061_v59 }
 0x9df   :  { %v4840_v55 = vpop.eup %4839 }
 0x9e2   :  { %v1961_v42 = vpop.f32.mrf.mxu0  ;;  %v2009_v32 = vpop.f32.mrf.mxu3 }
 0x9e3   :  { %v2041_v10 = vmul.f32 0.35355338, %v1961_v42  ;;  %v1987_v34 = vpop.f32.mrf.mxu2  ;;  %v2043_v46 = vmul.f32 0.35355338, %v2009_v32 }
 0x9e5   :  { %v2058_v50 = vsel %vm2045_vm4, %v2041_v10, -inf  ;;  %v2064_v1 = vsel %vm2045_vm4, %v2043_v46, -inf }
 0x9e6   :  { %2059 = vmax.xlane.f32.xlu2 %v2058_v50  ;;  %2065 = vmax.xlane.f32.xlu1 %v2064_v1 }
 0x9ea   :  { %v1963_v17 = vpop.f32.mrf.mxu0  ;;  %v2011_v26 = vpop.f32.mrf.mxu3 }
 0x9eb   :  { %v2033_v56 = vpop.f32.mrf.mxu1 }
 0x9ec   :  { %v2181_v20 = vpop.permute.xlu1 %2180  ;;  %v5832_v53 = vmul.f32 0.35355338, %v2033_v56 }
 0x9ed   :  { %2193 = vmatpush.bf16.msra.mxu3 %v2181_v20 }
 0x9ee   :  { %2053 = vmax.xlane.f32.xlu2 %v2052_v29  ;;  %2056 = vmax.xlane.f32.xlu1 %v2055_v41  ;;  %v2067_v2 = vsel %vm2045_vm4, %v5832_v53, -inf }
 0x9f2   :  { %2199 = vrot.lane.b32.xlu0 %v5781_v57, %s4992_s18  ;;  %v2097_v57 = vsel %vm2045_vm4, %v4840_v55, 0.0 }
 0x9f3   :  { %v2035_v61 = vpop.f32.mrf.mxu1 }
 0x9f6   :  { %2095 = vadd.xlane.f32.xlu1 %v2094_v38 }
 0xa06   :  { %2161 = vrot.lane.b32.xlu2 %v5764_v48, %s4992_s18 }
 0xa1c   :  { %2068 = vmax.xlane.f32.xlu0 %v2067_v2 }
 0xa2f   :  { %2098 = vadd.xlane.f32.xlu2 %v2097_v57 }
 0xa51   :  { %v2063_v6 = vpop.xlane.xlu0 %2062 }
 0xa52   :  { %v2075_v23 = vsub.f32 %v5818_v24, %v2063_v6 }
 0xa54   :  { %v2088_v59 = vmul.f32 1.442695, %v2075_v23 }
 0xa59   :  { %v2060_v35 = vpop.xlane.xlu2 %2059  ;;  %v2066_v51 = vpop.xlane.xlu1 %2065 }
 0xa5a   :  { %v2074_v11 = vsub.f32 %v2041_v10, %v2060_v35  ;;  %v2076_v22 = vsub.f32 %v2043_v46, %v2066_v51 }
 0xa5c   :  { %v2086_v58 = vmul.f32 1.442695, %v2074_v11  ;;  %v2090_v36 = vmul.f32 1.442695, %v2076_v22 }
 0xa5e   :  { %4841 = vpow2.f32 %v2086_v58 }
 0xa61   :  { %v2054_v48 = vpop.xlane.xlu2 %2053  ;;  %v2057_v13 = vpop.xlane.xlu1 %2056 }
 0xa62   :  { %v2072_v12 = vsub.f32 %v2039_v28, %v2054_v48  ;;  %v2073_v52 = vsub.f32 %v2040_v25, %v2057_v13 }
 0xa64   :  { %v4842_v18 = vpop.eup %4841  ;;  %v2082_v43 = vmul.f32 1.442695, %v2072_v12  ;;  %v2084_v60 = vmul.f32 1.442695, %v2073_v52  ;;  %v2200_v44 = vpop.permute.xlu0 %2199 }
 0xa65   :  { %v2106_v16 = vsel %vm2045_vm4, %v4842_v18, 0.0  ;;  %2212 = vmatpush.bf16.msrb.mxu1 %v2200_v44 }
 0xa66   :  { %4843 = vpow2.f32 %v2082_v43  ;;  %2107 = vadd.xlane.f32.xlu2 %v2106_v16 }
 0xa67   :  { %4845 = vpow2.f32 %v2084_v60 }
 0xa69   :  { %v2162_v42 = vpop.permute.xlu2 %2161  ;;  %v2096_v32 = vpop.xlane.xlu1 %2095 }
 0xa6a   :  { %4847 = vrcp.f32 %v2096_v32  ;;  %2174 = vmatpush.bf16.msrb.mxu2 %v2162_v42 }
 0xa6b   :  { %4849 = vpow2.f32 %v2090_v36  ;;  %v2295_v36 = vld [vmem:[%s6371_s6 + $0x30] sm:$0xf] }
 0xa6c   :  { %v4844_v10 = vpop.eup %4843  ;;  %4851 = vpow2.f32 %v2088_v59  ;;  %v2301_v59 = vsel %vm1372_vm11, %v2295_v36, 0 }
 0xa6d   :  { %v4846_v34 = vpop.eup %4845  ;;  %v2100_v46 = vsel %vm2045_vm4, %v4844_v10, 0.0 }
 0xa6e   :  { %v2103_v24 = vsel %vm2045_vm4, %v4846_v34, 0.0  ;;  %2101 = vadd.xlane.f32.xlu0 %v2100_v46 }
 0xa6f   :  { %2104 = vadd.xlane.f32.xlu1 %v2103_v24 }
 0xa70   :  { %v4848_v4 = vpop.eup %4847 }
 0xa71   :  { %v2126_v14 = vmul.f32 %v4848_v4, %v4838_v47  ;;  %v4850_v50 = vpop.eup %4849 }
 0xa72   :  { %v4852_v1 = vpop.eup %4851  ;;  %v2112_v28 = vsel %vm2045_vm4, %v4850_v50, 0.0 }
 0xa73   :  { %v2134_v8 = vpack.c.bf16 %v2126_v14, %v2126_v14  ;;  %v2109_v25 = vsel %vm2045_vm4, %v4852_v1, 0.0  ;;  %v2320_v14 = vld [vmem:[%s6371_s6 + $0x34] sm:$0xf] }
 0xa75   :  { %4472 = vmatmul.msk.bf16.vlgmr.msra.gmra.mxu0 %vm2045_vm4, %v2134_v8  ;;  %v2344_v8 = vld [vmem:[%s6371_s6 + $0x38] sm:$0xf] }
 0xa76   :  { %2113 = vadd.xlane.f32.xlu0 %v2112_v28  ;;  %v2350_v28 = vsel %vm1372_vm11, %v2344_v8, 0  ;;  %v4640_v8 = vld [vmem:[%s6371_s6 + $0x40] sm:$0xff] }
 0xa77   :  { %2110 = vadd.xlane.f32.xlu1 %v2109_v25 }
 0xa7e   :  { %2218 = vrot.lane.b32.xlu2 %v5799_v63, %s4992_s18 }
 0xa86   :  { %2275 = vrot.lane.b32.xlu2 %v5808_v39, %s4992_s18 }
 0xa8a   :  { %2256 = vrot.lane.b32.xlu0 %v5793_v37, %s4992_s18 }
 0xa8f   :  { %v2069_v26 = vpop.xlane.xlu0 %2068 }
 0xa90   :  { %2237 = vrot.lane.b32.xlu1 %v5785_v15, %s4992_s18  ;;  %v2077_v56 = vsub.f32 %v5832_v53, %v2069_v26 }
 0xa92   :  { %v2092_v41 = vmul.f32 1.442695, %v2077_v56 }
 0xaa2   :  { %v2099_v17 = vpop.xlane.xlu2 %2098 }
 0xaa3   :  { %4853 = vrcp.f32 %v2099_v17 }
 0xaa4   :  { %4855 = vpow2.f32 %v2092_v41 }
 0xaa9   :  { %v4854_v20 = vpop.eup %4853 }
 0xaaa   :  { %v2127_v29 = vmul.f32 %v4854_v20, %v4840_v55  ;;  %v4856_v63 = vpop.eup %4855 }
 0xaab   :  { %v2115_v39 = vsel %vm2045_vm4, %v4856_v63, 0.0 }
 0xaac   :  { %v2135_v47 = vpack.c.bf16 %v2127_v29, %v2127_v29 }
 0xaae   :  { %4473 = vmatmul.msk.bf16.vlgmr.msrb.gmra.mxu2 %vm2045_vm4, %v2135_v47 }
 0xaba   :  { %2116 = vadd.xlane.f32.xlu1 %v2115_v39 }
 0xad9   :  { %v2108_v37 = vpop.xlane.xlu2 %2107 }
 0xada   :  { %4857 = vrcp.f32 %v2108_v37 }
 0xae0   :  { %v4858_v61 = vpop.eup %4857 }
 0xae1   :  { %v2130_v15 = vmul.f32 %v4858_v61, %v4842_v18  ;;  %v2219_v38 = vpop.permute.xlu2 %2218  ;;  %v2102_v2 = vpop.xlane.xlu0 %2101  ;;  %v2368_v61 = vld [vmem:[%s6371_s6 + $0x3c] sm:$0xf] }
 0xae2   :  { %v2105_v7 = vpop.xlane.xlu1 %2104  ;;  %4859 = vrcp.f32 %v2102_v2  ;;  %2231 = vmatpush.bf16.msrb.mxu0 %v2219_v38 }
 0xae3   :  { %v2138_v53 = vpack.c.bf16 %v2130_v15, %v2130_v15  ;;  %4861 = vrcp.f32 %v2105_v7  ;;  %v2374_v15 = vsel %vm1372_vm11, %v2368_v61, 0 }
 0xae5   :  { %4476 = vmatmul.msk.bf16.vlgmr.msrb.gmra.mxu0 %vm2045_vm4, %v2138_v53 }
 0xae6   :  { %2310 = vmatpush.bf16.msra.mxu0 %v2301_v59 }
 0xae8   :  { %v4860_v31 = vpop.eup %4859 }
 0xae9   :  { %v4862_v55 = vpop.eup %4861  ;;  %v2128_v57 = vmul.f32 %v4860_v31, %v4844_v10  ;;  %v2276_v35 = vpop.permute.xlu2 %2275  ;;  %v4777_v31 = vld [vmem:[%s6372_s7 + $0x6] ss:$0 sm:$0xff] }
 0xaea   :  { %v2129_v51 = vmul.f32 %v4862_v55, %v4846_v34  ;;  %2288 = vmatpush.bf16.msra.mxu1 %v2276_v35  ;;  %v2114_v6 = vpop.xlane.xlu0 %2113  ;;  %v2111_v13 = vpop.xlane.xlu1 %2110 }
 0xaeb   :  { %v2136_v11 = vpack.c.bf16 %v2128_v57, %v2128_v57  ;;  %4863 = vrcp.f32 %v2114_v6 }
 0xaec   :  { %v2137_v58 = vpack.c.bf16 %v2129_v51, %v2129_v51  ;;  %4865 = vrcp.f32 %v2111_v13 }
 0xaed   :  { %4474 = vmatmul.msk.bf16.vlgmr.msra.gmra.mxu3 %vm2045_vm4, %v2136_v11 }
 0xaee   :  { %4475 = vmatmul.msk.bf16.vlgmr.msrb.gmra.mxu1 %vm2045_vm4, %v2137_v58 }
 0xaef   :  { %2383 = vmatpush.bf16.msrb.mxu1 %v2374_v15 }
 0xaf1   :  { %v4864_v12 = vpop.eup %4863 }
 0xaf2   :  { %v2157_v48 = vpop.f32.mrf.mxu0  ;;  %v2132_v52 = vmul.f32 %v4864_v12, %v4850_v50  ;;  %v4866_v43 = vpop.eup %4865  ;;  %v2326_v50 = vsel %vm1372_vm11, %v2320_v14, 0  ;;  %v4641_v14 = vld [vmem:[%s6371_s6 + $0x48] sm:$0xff] }
 0xaf3   :  { %v2131_v23 = vmul.f32 %v4866_v43, %v4852_v1  ;;  %2482 = vmatpush.bf16.msrb.mxu0 %v4641_v14 }
 0xaf4   :  { %v2140_v60 = vpack.c.bf16 %v2132_v52, %v2132_v52 }
 0xaf5   :  { %v2139_v16 = vpack.c.bf16 %v2131_v23, %v2131_v23 }
 0xaf7   :  { %2483 = vmatpush.bf16.msrb.mxu0 %v4640_v8 }
 0xafa   :  { %v2159_v18 = vpop.f32.mrf.mxu0 }
 0xafc   :  { %v2257_v22 = vpop.permute.xlu0 %2256 }
 0xafd   :  { %2269 = vmatpush.bf16.msrb.mxu3 %v2257_v22 }
 0xb00   :  { %4478 = vmatmul.msk.bf16.vlgmr.msrb.gmra.mxu3 %vm2045_vm4, %v2140_v60 }
 0xb01   :  { %2359 = vmatpush.bf16.msra.mxu3 %v2350_v28 }
 0xb02   :  { %v2238_v44 = vpop.permute.xlu1 %2237 }
 0xb03   :  { %2250 = vmatpush.bf16.msra.mxu2 %v2238_v44 }
 0xb06   :  { %4477 = vmatmul.msk.bf16.vlgmr.msra.gmra.mxu2 %vm2045_vm4, %v2139_v16 }
 0xb07   :  { %2335 = vmatpush.bf16.msrb.mxu2 %v2326_v50 }
 0xb2d   :  { %v2117_v42 = vpop.xlane.xlu1 %2116 }
 0xb2e   :  { %4867 = vrcp.f32 %v2117_v42 }
 0xb31   :  { %v2176_v32 = vpop.f32.mrf.mxu2 }
 0xb32   :  { %v2296_v10 = vpack.c.bf16 %v2176_v32, %v2157_v48 }
 0xb34   :  { %v4868_v34 = vpop.eup %4867  ;;  %4480 = vmatmul.msk.bf16.vlgmr.msra.gmra.mxu0 %vm1067_vm9, %v2296_v10 }
 0xb35   :  { %v2133_v46 = vmul.f32 %v4868_v34, %v4856_v63 }
 0xb37   :  { %v2141_v24 = vpack.c.bf16 %v2133_v46, %v2133_v46 }
 0xb39   :  { %4479 = vmatmul.msk.bf16.vlgmr.msra.gmra.mxu1 %vm2045_vm4, %v2141_v24  ;;  %v2178_v4 = vpop.f32.mrf.mxu2 }
 0xb62   :  { %v2233_v1 = vpop.f32.mrf.mxu0 }
 0xb6a   :  { %v2235_v25 = vpop.f32.mrf.mxu0 }
 0xb6b   :  { %v2214_v17 = vpop.f32.mrf.mxu1 }
 0xb70   :  { %v2195_v26 = vpop.f32.mrf.mxu3 }
 0xb71   :  { %v2321_v56 = vpack.c.bf16 %v2214_v17, %v2195_v26 }
 0xb73   :  { %v2216_v20 = vpop.f32.mrf.mxu1  ;;  %4481 = vmatmul.msk.bf16.vlgmr.msrb.gmra.mxu2 %vm1067_vm9, %v2321_v56 }
 0xb78   :  { %v2197_v29 = vpop.f32.mrf.mxu3 }
 0xb83   :  { %v2271_v41 = vpop.f32.mrf.mxu3 }
 0xb89   :  { %v2252_v47 = vpop.f32.mrf.mxu2 }
 0xb8a   :  { %v2345_v63 = vpack.c.bf16 %v2252_v47, %v2233_v1 }
 0xb8b   :  { %v2273_v39 = vpop.f32.mrf.mxu3 }
 0xb8c   :  { %4482 = vmatmul.msk.bf16.vlgmr.msra.gmra.mxu3 %vm1067_vm9, %v2345_v63 }
 0xb91   :  { %v2254_v37 = vpop.f32.mrf.mxu2 }
 0xbb1   :  { %v2312_v53 = vpop.f32.mrf.mxu0 }
 0xbb2   :  { %v2318_v35 = vadd.f32 %v4777_v31, %v2312_v53 }
 0xbb6   :  { %v2290_v38 = vpop.f32.mrf.mxu1 }
 0xbb7   :  { %v2369_v2 = vpack.c.bf16 %v2290_v38, %v2271_v41 }
 0xbb9   :  { %4483 = vmatmul.msk.bf16.vlgmr.msrb.gmra.mxu1 %vm1067_vm9, %v2369_v2  ;;  %v2314_v58 = vpop.f32.mrf.mxu0 }
 0xbba   :  { %v2319_v12 = vadd.f32 %v4777_v31, %v2314_v58 }
 0xbbe   :  { %v2292_v7 = vpop.f32.mrf.mxu1 }
 0xbbf   :  { %v4778_v7 = vld [vmem:[%s6372_s7 + $0xd] ss:$0 sm:$0xff] }
 0xbf6   :  { %v2337_v55 = vpop.f32.mrf.mxu2 }
 0xbf7   :  { %v2342_v51 = vadd.f32 %v2337_v55, %v2318_v35 }
 0xbfe   :  { %v2339_v13 = vpop.f32.mrf.mxu2 }
 0xbff   :  { %v2343_v22 = vadd.f32 %v2339_v13, %v2319_v12  ;;  %v4645_v13 = vld [vmem:[%s6371_s6 + $0x68] sm:$0xff]  ;;  %v4644_v12 = vld [vmem:[%s6371_s6 + $0x60] sm:$0xff] }
 0xc00   :  { %2524 = vmatpush.bf16.msra.mxu2 %v4645_v13 }
 0xc04   :  { %2525 = vmatpush.bf16.msra.mxu2 %v4644_v12 }
 0xc0f   :  { %v2361_v57 = vpop.f32.mrf.mxu3 }
 0xc10   :  { %v2366_v11 = vadd.f32 %v2361_v57, %v2342_v51  ;;  %v4779_v57 = vld [vmem:[%s6372_s7 + $0xe] ss:$0 sm:$0xff] }
 0xc17   :  { %v2363_v18 = vpop.f32.mrf.mxu3 }
 0xc18   :  { %v2367_v60 = vadd.f32 %v2363_v18, %v2343_v22  ;;  %v4643_v18 = vld [vmem:[%s6371_s6 + $0x58] sm:$0xff]  ;;  %v4642_v22 = vld [vmem:[%s6371_s6 + $0x50] sm:$0xff] }
 0xc19   :  { %2526 = vmatpush.bf16.msra.mxu2 %v4643_v18 }
 0xc1d   :  { %2527 = vmatpush.bf16.msra.mxu2 %v4642_v22  ;;  %v4783_v22 = vld [vmem:[%s6372_s7 + $0x16] ss:$0 sm:$0xff] }
 0xc36   :  { %v2385_v6 = vpop.f32.mrf.mxu1 }
 0xc37   :  { %v2390_v48 = vadd.f32 %v2385_v6, %v2366_v11 }
 0xc39   :  { %v5886_v52 = vadd.f32 %v2390_v48, %v5669_v9 }
 0xc3b   :  { %v2396_v43 = vsel %vm78_vm0, %v5886_v52, 0.0 }
 0xc3c   :  { %2397 = vadd.xlane.f32.xlu0 %v2396_v43 }
 0xc3e   :  { %v2387_v23 = vpop.f32.mrf.mxu1 }
 0xc3f   :  { %v2391_v44 = vadd.f32 %v2387_v23, %v2367_v60  ;;  %v4780_v60 = vld [vmem:[%s6372_s7 + $0x7] ss:$0 sm:$0xff] }
 0xc41   :  { %v5891_v16 = vadd.f32 %v2391_v44, %v5676_v33 }
 0xc43   :  { %v2399_v36 = vsel %vm78_vm0, %v5891_v16, 0.0 }
 0xc44   :  { %2400 = vadd.xlane.f32.xlu1 %v2399_v36 }
 0xcaf   :  { %v2398_v59 = vpop.xlane.xlu0 %2397 }
 0xcb0   :  { %v2402_v9 = vmul.f32 %v2398_v59, %v5279_v40 }
 0xcb2   :  { %v2404_v42 = vsub.f32 %v5886_v52, %v2402_v9 }
 0xcb4   :  { %v2406_v32 = vmul.f32 %v2404_v42, %v2404_v42 }
 0xcb6   :  { %v2408_v10 = vsel %vm78_vm0, %v2406_v32, 0.0  ;;  %v4781_v32 = vld [vmem:[%s6372_s7 + $0x8] ss:$0 sm:$0xff] }
 0xcb7   :  { %2409 = vadd.xlane.f32.xlu2 %v2408_v10  ;;  %v2401_v34 = vpop.xlane.xlu1 %2400 }
 0xcb8   :  { %v2403_v46 = vmul.f32 %v2401_v34, %v5279_v40 }
 0xcba   :  { %v2405_v24 = vsub.f32 %v5891_v16, %v2403_v46 }
 0xcbc   :  { %v2407_v33 = vmul.f32 %v2405_v24, %v2405_v24 }
 0xcbe   :  { %v2411_v4 = vsel %vm78_vm0, %v2407_v33, 0.0 }
 0xcbf   :  { %2412 = vadd.xlane.f32.xlu1 %v2411_v4 }
 0xd2a   :  { %v2410_v50 = vpop.xlane.xlu2 %2409 }
 0xd2b   :  { %v2414_v1 = vmul.f32 %v2410_v50, %v5279_v40 }
 0xd2d   :  { %v2416_v28 = vadd.f32 1e-05, %v2414_v1 }
 0xd2f   :  { %4869 = vrsqrt.f32 %v2416_v28  ;;  %vm2424_vm6 = vweird.f32 %v2416_v28 }
 0xd32   :  { %v2413_v25 = vpop.xlane.xlu1 %2412 }
 0xd33   :  { %v2415_v17 = vmul.f32 %v2413_v25, %v5279_v40 }
 0xd35   :  { %v4870_v26 = vpop.eup %4869  ;;  %v2417_v56 = vadd.f32 1e-05, %v2415_v17 }
 0xd36   :  { %v2419_v20 = vmul.f32 %v4870_v26, %v2416_v28  ;;  %vm2425_vm5 = vweird.f32 %v4870_v26 }
 0xd37   :  { %4871 = vrsqrt.f32 %v2417_v56  ;;  %vm2426_vm7 = vmor %vm2424_vm6, %vm2425_vm5  ;;  %vm2434_vm10 = vweird.f32 %v2417_v56 }
 0xd38   :  { %v2420_v29 = vmul.f32 %v4870_v26, %v2419_v20 }
 0xd3a   :  { %v2421_v41 = vmul.f32 0.5, %v2420_v29  ;;  %v4647_v29 = vld [vmem:[%s6371_s6 + $0x78] sm:$0xff] }
 0xd3b   :  { %2620 = vmatpush.bf16.msrb.mxu3 %v4647_v29 }
 0xd3c   :  { %v2422_v47 = vsub.f32 1.5, %v2421_v41 }
 0xd3d   :  { %v4872_v63 = vpop.eup %4871 }
 0xd3e   :  { %v2423_v39 = vmul.f32 %v4870_v26, %v2422_v47  ;;  %v2429_v37 = vmul.f32 %v4872_v63, %v2417_v56  ;;  %vm2435_vm8 = vweird.f32 %v4872_v63 }
 0xd3f   :  { %vm2436_vm12 = vmor %vm2434_vm10, %vm2435_vm8 }
 0xd40   :  { %v2430_v61 = vmul.f32 %v4872_v63, %v2429_v37  ;;  %v2427_v15 = vsel %vm2426_vm7, %v4870_v26, %v2423_v39 }
 0xd41   :  { %v2438_v53 = vmul.f32 %v2427_v15, %v2404_v42 }
 0xd42   :  { %v2431_v38 = vmul.f32 0.5, %v2430_v61 }
 0xd43   :  { %v2441_v35 = vmul.f32 %v4778_v7, %v2438_v53 }
 0xd44   :  { %v2432_v2 = vsub.f32 1.5, %v2431_v38 }
 0xd45   :  { %v2444_v58 = vadd.f32 %v4779_v57, %v2441_v35 }
 0xd46   :  { %v2433_v31 = vmul.f32 %v4872_v63, %v2432_v2 }
 0xd48   :  { %v2437_v55 = vsel %vm2436_vm12, %v4872_v63, %v2433_v31  ;;  %v4646_v63 = vld [vmem:[%s6371_s6 + $0x70] sm:$0xff] }
 0xd49   :  { %v2439_v51 = vmul.f32 %v2437_v55, %v2405_v24  ;;  %2621 = vmatpush.bf16.msrb.mxu3 %v4646_v63 }
 0xd4b   :  { %v2442_v11 = vmul.f32 %v4778_v7, %v2439_v51 }
 0xd4d   :  { %v2445_v6 = vadd.f32 %v4779_v57, %v2442_v11 }
 0xd4f   :  { %v2458_v48 = vpack.c.bf16 %v2445_v6, %v2444_v58 }
 0xd51   :  { %4492 = vmatmul.msk.bf16.vlgmr.msrb.gmra.mxu0 %vm78_vm0, %v2458_v48  ;;  %v4782_v48 = vld [vmem:[%s6372_s7 + $0x15] ss:$0 sm:$0xff] }
 0xdce   :  { %v2485_v43 = vpop.f32.mrf.mxu0 }
 0xdcf   :  { %v2486_v23 = vadd.f32 %v4780_v60, %v2485_v43 }
 0xdd1   :  { %v2490_v59 = vmax.f32 %v2486_v23, 0.0 }
 0xdd6   :  { %v2487_v44 = vpop.f32.mrf.mxu0 }
 0xdd7   :  { %v2488_v36 = vadd.f32 %v4780_v60, %v2487_v44 }
 0xdd9   :  { %v2491_v9 = vmax.f32 %v2488_v36, 0.0 }
 0xddb   :  { %v2492_v42 = vpack.c.bf16 %v2491_v9, %v2490_v59 }
 0xddd   :  { %4509 = vmatmul.msk.bf16.vlgmr.msra.gmra.mxu2 %vm238_vm1, %v2492_v42  ;;  %v4784_v42 = vld [vmem:[%s6372_s7 + $0xf] ss:$0 sm:$0xff] }
 0xe60   :  { %v2529_v10 = vpop.f32.mrf.mxu2 }
 0xe61   :  { %v2534_v34 = vadd.f32 %v2529_v10, %v5886_v52 }
 0xe63   :  { %v5936_v46 = vadd.f32 %v4781_v32, %v2534_v34 }
 0xe65   :  { %v2542_v24 = vsel %vm78_vm0, %v5936_v46, 0.0 }
 0xe66   :  { %2543 = vadd.xlane.f32.xlu1 %v2542_v24 }
 0xe68   :  { %v2531_v33 = vpop.f32.mrf.mxu2 }
 0xe69   :  { %v2535_v4 = vadd.f32 %v2531_v33, %v5891_v16 }
 0xe6b   :  { %v5941_v14 = vadd.f32 %v4781_v32, %v2535_v4 }
 0xe6d   :  { %v2545_v50 = vsel %vm78_vm0, %v5941_v14, 0.0 }
 0xe6e   :  { %2546 = vadd.xlane.f32.xlu1 %v2545_v50 }
 0xed9   :  { %v2544_v1 = vpop.xlane.xlu1 %2543 }
 0xeda   :  { %v2548_v8 = vmul.f32 %v2544_v1, %v5279_v40 }
 0xedc   :  { %v2550_v52 = vsub.f32 %v5936_v46, %v2548_v8 }
 0xede   :  { %v2552_v28 = vmul.f32 %v2550_v52, %v2550_v52 }
 0xee0   :  { %v2554_v25 = vsel %vm78_vm0, %v2552_v28, 0.0 }
 0xee1   :  { %2555 = vadd.xlane.f32.xlu1 %v2554_v25  ;;  %v2547_v17 = vpop.xlane.xlu1 %2546 }
 0xee2   :  { %v2549_v26 = vmul.f32 %v2547_v17, %v5279_v40 }
 0xee4   :  { %v2551_v16 = vsub.f32 %v5941_v14, %v2549_v26 }
 0xee6   :  { %v2553_v56 = vmul.f32 %v2551_v16, %v2551_v16 }
 0xee8   :  { %v2557_v20 = vsel %vm78_vm0, %v2553_v56, 0.0 }
 0xee9   :  { %2558 = vadd.xlane.f32.xlu1 %v2557_v20 }
 0xf54   :  { %v2556_v41 = vpop.xlane.xlu1 %2555 }
 0xf55   :  { %v2560_v47 = vmul.f32 %v2556_v41, %v5279_v40 }
 0xf57   :  { %v2562_v39 = vadd.f32 1e-05, %v2560_v47 }
 0xf59   :  { %4873 = vrsqrt.f32 %v2562_v39  ;;  %vm2570_vm14 = vweird.f32 %v2562_v39 }
 0xf5c   :  { %v2559_v37 = vpop.xlane.xlu1 %2558 }
 0xf5d   :  { %v2561_v61 = vmul.f32 %v2559_v37, %v5279_v40 }
 0xf5f   :  { %v4874_v15 = vpop.eup %4873  ;;  %v2563_v38 = vadd.f32 1e-05, %v2561_v61 }
 0xf60   :  { %v2565_v2 = vmul.f32 %v4874_v15, %v2562_v39  ;;  %vm2571_vm13 = vweird.f32 %v4874_v15 }
 0xf61   :  { %4875 = vrsqrt.f32 %v2563_v38  ;;  %vm2572_vm15 = vmor %vm2570_vm14, %vm2571_vm13  ;;  %vm2580_vm3 = vweird.f32 %v2563_v38 }
 0xf62   :  { %v2566_v7 = vmul.f32 %v4874_v15, %v2565_v2 }
 0xf64   :  { %v2567_v53 = vmul.f32 0.5, %v2566_v7 }
 0xf66   :  { %v2568_v31 = vsub.f32 1.5, %v2567_v53 }
 0xf67   :  { %v4876_v55 = vpop.eup %4875 }
 0xf68   :  { %v2569_v57 = vmul.f32 %v4874_v15, %v2568_v31  ;;  %v2575_v35 = vmul.f32 %v4876_v55, %v2563_v38  ;;  %vm2581_vm2 = vweird.f32 %v4876_v55 }
 0xf69   :  { %vm2582_vm5 = vmor %vm2580_vm3, %vm2581_vm2 }
 0xf6a   :  { %v2576_v51 = vmul.f32 %v4876_v55, %v2575_v35  ;;  %v2573_v11 = vsel %vm2572_vm15, %v4874_v15, %v2569_v57 }
 0xf6b   :  { %v2584_v13 = vmul.f32 %v2573_v11, %v2550_v52 }
 0xf6c   :  { %v2577_v58 = vmul.f32 0.5, %v2576_v51 }
 0xf6d   :  { %v2587_v43 = vmul.f32 %v4782_v48, %v2584_v13 }
 0xf6e   :  { %v2578_v6 = vsub.f32 1.5, %v2577_v58 }
 0xf6f   :  { %v2590_v44 = vadd.f32 %v4783_v22, %v2587_v43 }
 0xf70   :  { %v2579_v12 = vmul.f32 %v4876_v55, %v2578_v6 }
 0xf72   :  { %v2583_v18 = vsel %vm2582_vm5, %v4876_v55, %v2579_v12 }
 0xf73   :  { %v2585_v60 = vmul.f32 %v2583_v18, %v2551_v16 }
 0xf75   :  { %v2588_v23 = vmul.f32 %v4782_v48, %v2585_v60 }
 0xf77   :  { %v2591_v36 = vadd.f32 %v4783_v22, %v2588_v23 }
 0xf79   :  { %v2596_v59 = vpack.c.bf16 %v2591_v36, %v2590_v44 }
 0xf7b   :  { %4518 = vmatmul.msk.bf16.vlgmr.msrb.gmra.mxu3 %vm78_vm0, %v2596_v59 }
 0xffe   :  { %v2623_v9 = vpop.f32.mrf.mxu3 }
 0xfff   :  { %v2624_v10 = vadd.f32 %v4784_v42, %v2623_v9 }
0x1001   :  { %v2648_v20 = vpack.c.bf16 %v2624_v10, %v2624_v10 }
0x1003   :  { %v2657_v29 = vunpack.c.l.b16 %v2648_v20 }
0x1005   :  { %v5981_v41 = vpack.c.b16 %v2657_v29, %v2657_v29 }
0x1006   :  { %v2625_v32 = vpop.f32.mrf.mxu3 }
0x1007   :  { %v2626_v34 = vadd.f32 %v4784_v42, %v2625_v32 }
0x1009   :  { %v4718_v24 = vpack.i.bf16 %v2626_v34, %v2624_v10  ;;  %v2649_v33 = vpack.c.bf16 %v2626_v34, %v2626_v34 }
0x100b   :  { %4719 = vrot.lane.b32.xlu1 %v4718_v24, %s4991_s17  ;;  %4714 = vrot.lane.b32.xlu0 %v4718_v24, %s4990_s16  ;;  %v2681_v4 = vunpack.c.l.b16 %v2649_v33 }
0x100c   :  { %4709 = vrot.lane.b32.xlu2 %v4718_v24, %s4989_s15 }
0x100d   :  { %v5972_v50 = vpack.c.b16 %v2681_v4, %v2681_v4 }
0x1013   :  { %2683 = vrot.lane.b32.xlu1 %v5972_v50, %s4992_s18 }
0x1066   :  { %v4710_v1 = vpop.permute.xlu2 %4709 }
0x1067   :  { %v4712_v8 = vunpack.i.h.bf16 %v4710_v1  ;;  %v4711_v52 = vunpack.i.l.bf16 %v4710_v1 }
0x1069   :  { %v2651_v28 = vpack.c.bf16 %v4712_v8, %v4712_v8  ;;  %v2650_v25 = vpack.c.bf16 %v4711_v52, %v4711_v52 }
0x106b   :  { %v2729_v17 = vunpack.c.l.b16 %v2651_v28  ;;  %v2705_v26 = vunpack.c.l.b16 %v2650_v25 }
0x106d   :  { %v5976_v16 = vpack.c.b16 %v2729_v17, %v2729_v17  ;;  %v2706_v56 = vpack.c.b16 %v2705_v26, %v2705_v26 }
0x106f   :  { %2731 = vrot.lane.b32.xlu2 %v5976_v16, %s4992_s18  ;;  %2707 = vrot.lane.b32.xlu0 %v2706_v56, %s4992_s18 }
0x1077   :  { %2659 = vrot.lane.b32.xlu0 %v5981_v41, %s4992_s18 }
0x107d   :  { %v4720_v47 = vpop.permute.xlu1 %4719  ;;  %v4715_v63 = vpop.permute.xlu0 %4714 }
0x107e   :  { %v4721_v39 = vunpack.i.l.bf16 %v4720_v47  ;;  %v4717_v37 = vunpack.i.h.bf16 %v4715_v63  ;;  %v4716_v61 = vunpack.i.l.bf16 %v4715_v63  ;;  %v4722_v15 = vunpack.i.h.bf16 %v4720_v47 }
0x1080   :  { %v2652_v38 = vpack.c.bf16 %v4721_v39, %v4721_v39  ;;  %v2655_v2 = vpack.c.bf16 %v4717_v37, %v4717_v37  ;;  %v2654_v7 = vpack.c.bf16 %v4716_v61, %v4716_v61  ;;  %v2653_v57 = vpack.c.bf16 %v4722_v15, %v4722_v15 }
0x1082   :  { %v2753_v53 = vunpack.c.l.b16 %v2652_v38  ;;  %v2825_v31 = vunpack.c.l.b16 %v2655_v2  ;;  %v2801_v55 = vunpack.c.l.b16 %v2654_v7  ;;  %v2777_v48 = vunpack.c.l.b16 %v2653_v57 }
0x1084   :  { %v5985_v35 = vpack.c.b16 %v2753_v53, %v2753_v53  ;;  %v5987_v51 = vpack.c.b16 %v2801_v55, %v2801_v55  ;;  %v5989_v11 = vpack.c.b16 %v2825_v31, %v2825_v31  ;;  %v5998_v13 = vpack.c.b16 %v2777_v48, %v2777_v48 }
0x1085   :  { %v2684_v58 = vpop.permute.xlu1 %2683 }
0x1086   :  { %v2689_v6 = vsel %vm1067_vm9, %v2684_v58, 0  ;;  %2755 = vrot.lane.b32.xlu1 %v5985_v35, %s4992_s18  ;;  %2803 = vrot.lane.b32.xlu2 %v5987_v51, %s4992_s18 }
0x1087   :  { %2827 = vrot.lane.b32.xlu0 %v5989_v11, %s4992_s18  ;;  %2698 = vmatpush.bf16.xpose.msra.mxu0 %v2689_v6 }
0x108e   :  { %4520 = vmatmul.msk.bf16.vlgmr.msra.gmra.mxu0 %vm1067_vm9, %v2649_v33  ;;  %2779 = vrot.lane.b32.xlu2 %v5998_v13, %s4992_s18 }
0x108f   :  { %3002 = vrot.lane.b32.xlu0 %v2706_v56, %s4994_s4 }
0x10c9   :  { %v2732_v12 = vpop.permute.xlu2 %2731 }
0x10ca   :  { %v2737_v18 = vsel %vm1067_vm9, %v2732_v12, 0 }
0x10cb   :  { %2746 = vmatpush.bf16.xpose.msra.mxu3 %v2737_v18 }
0x10d2   :  { %4522 = vmatmul.msk.bf16.vlgmr.msra.gmra.mxu3 %vm1067_vm9, %v2651_v28 }
0x10e0   :  { %v2804_v22 = vpop.permute.xlu2 %2803 }
0x10e1   :  { %v2809_v43 = vsel %vm1067_vm9, %v2804_v22, 0  ;;  %v2708_v60 = vpop.permute.xlu0 %2707 }
0x10e2   :  { %v2713_v23 = vsel %vm1067_vm9, %v2708_v60, 0 }
0x10e3   :  { %2722 = vmatpush.bf16.xpose.msrb.mxu2 %v2713_v23 }
0x10e8   :  { %v2780_v44 = vpop.permute.xlu2 %2779 }
0x10e9   :  { %v2785_v36 = vsel %vm1067_vm9, %v2780_v44, 0  ;;  %v2660_v59 = vpop.permute.xlu0 %2659 }
0x10ea   :  { %v2665_v9 = vsel %vm1067_vm9, %v2660_v59, 0  ;;  %4521 = vmatmul.msk.bf16.vlgmr.msrb.gmra.mxu2 %vm1067_vm9, %v2650_v25  ;;  %2794 = vmatpush.bf16.xpose.msrb.mxu0 %v2785_v36 }
0x10eb   :  { %2818 = vmatpush.bf16.xpose.msra.mxu2 %v2809_v43  ;;  %2674 = vmatpush.bf16.xpose.msra.mxu1 %v2665_v9 }
0x10f1   :  { %4524 = vmatmul.msk.bf16.vlgmr.msrb.gmra.mxu0 %vm1067_vm9, %v2653_v57 }
0x10f2   :  { %4519 = vmatmul.msk.bf16.vlgmr.msra.gmra.mxu1 %vm1067_vm9, %v2648_v20 }
0x10f8   :  { %v2756_v42 = vpop.permute.xlu1 %2755 }
0x10f9   :  { %v2761_v32 = vsel %vm1067_vm9, %v2756_v42, 0  ;;  %v2828_v10 = vpop.permute.xlu0 %2827 }
0x10fa   :  { %v2833_v34 = vsel %vm1067_vm9, %v2828_v10, 0  ;;  %4525 = vmatmul.msk.bf16.vlgmr.msra.gmra.mxu2 %vm1067_vm9, %v2654_v7  ;;  %2770 = vmatpush.bf16.xpose.msrb.mxu1 %v2761_v32 }
0x10fb   :  { %2842 = vmatpush.bf16.xpose.msrb.mxu3 %v2833_v34 }
0x1101   :  { %v3003_v24 = vpop.permute.xlu0 %3002 }
0x1102   :  { %v3008_v33 = vsel %vm1372_vm11, %v3003_v24, 0  ;;  %4523 = vmatmul.msk.bf16.vlgmr.msrb.gmra.mxu1 %vm1067_vm9, %v2652_v38  ;;  %4526 = vmatmul.msk.bf16.vlgmr.msrb.gmra.mxu3 %vm1067_vm9, %v2655_v2 }
0x1103   :  { %3017 = vmatpush.bf16.msrb.mxu2 %v3008_v33 }
0x110b   :  { %v2700_v4 = vpop.f32.mrf.mxu0 }
0x110c   :  { %v2849_v1 = vmul.f32 0.35355338, %v2700_v4 }
0x110e   :  { %v2857_v8 = vadd.f32 %v2849_v1, %v5513_v30 }
0x1110   :  { %v2867_v52 = vsel %vm1067_vm9, %v2857_v8, -inf }
0x1111   :  { %2868 = vmax.xlane.f32.xlu0 %v2867_v52 }
0x1113   :  { %v2702_v28 = vpop.f32.mrf.mxu0 }
0x1155   :  { %v2748_v25 = vpop.f32.mrf.mxu3 }
0x1156   :  { %v2851_v17 = vmul.f32 0.35355338, %v2748_v25 }
0x1158   :  { %v2859_v26 = vadd.f32 %v2851_v17, %v5538_v45 }
0x115a   :  { %v2873_v56 = vsel %vm1067_vm9, %v2859_v26, -inf }
0x115b   :  { %2874 = vmax.xlane.f32.xlu1 %v2873_v56 }
0x115d   :  { %v2750_v20 = vpop.f32.mrf.mxu3 }
0x116d   :  { %v2724_v29 = vpop.f32.mrf.mxu2 }
0x116e   :  { %v2796_v47 = vpop.f32.mrf.mxu0 }
0x116f   :  { %v2676_v63 = vpop.f32.mrf.mxu1  ;;  %v2853_v61 = vmul.f32 0.35355338, %v2796_v47 }
0x1170   :  { %v2848_v39 = vmul.f32 0.35355338, %v2676_v63 }
0x1171   :  { %v6026_v7 = vadd.f32 %v2853_v61, %v5577_v27 }
0x1172   :  { %v2856_v37 = vadd.f32 %v2848_v39, %v5503_v54  ;;  %v2850_v54 = vmul.f32 0.35355338, %v2724_v29 }
0x1173   :  { %v2879_v45 = vsel %vm1067_vm9, %v6026_v7, -inf }
0x1174   :  { %v2864_v30 = vsel %vm1067_vm9, %v2856_v37, -inf  ;;  %v2858_v43 = vadd.f32 %v2850_v54, %v5527_v21 }
0x1175   :  { %v2726_v15 = vpop.f32.mrf.mxu2  ;;  %2865 = vmax.xlane.f32.xlu2 %v2864_v30 }
0x1176   :  { %v2798_v38 = vpop.f32.mrf.mxu0  ;;  %v2870_v60 = vsel %vm1067_vm9, %v2858_v43, -inf }
0x1177   :  { %v2678_v2 = vpop.f32.mrf.mxu1 }
0x117d   :  { %v2820_v53 = vpop.f32.mrf.mxu2  ;;  %2880 = vmax.xlane.f32.xlu2 %v2879_v45 }
0x117e   :  { %v2854_v4 = vmul.f32 0.35355338, %v2820_v53 }
0x117f   :  { %v2772_v31 = vpop.f32.mrf.mxu1 }
0x1180   :  { %v2852_v55 = vmul.f32 0.35355338, %v2772_v31  ;;  %v2862_v1 = vadd.f32 %v2854_v4, %v5570_v49 }
0x1182   :  { %v2860_v57 = vadd.f32 %v2852_v55, %v5547_v5  ;;  %v2882_v28 = vsel %vm1067_vm9, %v2862_v1, -inf }
0x1184   :  { %v2876_v58 = vsel %vm1067_vm9, %v2860_v57, -inf  ;;  %v2869_v6 = vpop.xlane.xlu0 %2868 }
0x1185   :  { %v2822_v48 = vpop.f32.mrf.mxu2  ;;  %2877 = vmax.xlane.f32.xlu0 %v2876_v58  ;;  %v2844_v12 = vpop.f32.mrf.mxu3  ;;  %v2889_v18 = vsub.f32 %v2857_v8, %v2869_v6 }
0x1186   :  { %v2855_v36 = vmul.f32 0.35355338, %v2844_v12 }
0x1187   :  { %v2898_v22 = vmul.f32 1.442695, %v2889_v18  ;;  %v2774_v27 = vpop.f32.mrf.mxu1 }
0x1188   :  { %v2863_v59 = vadd.f32 %v2855_v36, %v5561_v0 }
0x1189   :  { %4877 = vpow2.f32 %v2898_v22 }
0x118a   :  { %v2885_v9 = vsel %vm1067_vm9, %v2863_v59, -inf }
0x118d   :  { %2871 = vmax.xlane.f32.xlu0 %v2870_v60  ;;  %v2846_v23 = vpop.f32.mrf.mxu3 }
0x118f   :  { %v4878_v44 = vpop.eup %4877 }
0x1190   :  { %v2915_v5 = vsel %vm1067_vm9, %v4878_v44, 0.0 }
0x1191   :  { %2916 = vadd.xlane.f32.xlu1 %v2915_v5 }
0x1199   :  { %2886 = vmax.xlane.f32.xlu1 %v2885_v9 }
0x11a1   :  { %2981 = vrot.lane.b32.xlu0 %v5972_v50, %s4994_s4 }
0x11a9   :  { %3086 = vrot.lane.b32.xlu0 %v5987_v51, %s4994_s4 }
0x11b2   :  { %2960 = vrot.lane.b32.xlu1 %v5981_v41, %s4994_s4 }
0x11ce   :  { %v2875_v21 = vpop.xlane.xlu1 %2874 }
0x11cf   :  { %v2891_v42 = vsub.f32 %v2859_v26, %v2875_v21 }
0x11d1   :  { %v2902_v32 = vmul.f32 1.442695, %v2891_v42 }
0x11d3   :  { %4879 = vpow2.f32 %v2902_v32 }
0x11d9   :  { %v6043_v10 = vpop.eup %4879 }
0x11da   :  { %v2921_v0 = vsel %vm1067_vm9, %v6043_v10, 0.0 }
0x11db   :  { %2922 = vadd.xlane.f32.xlu0 %v2921_v0 }
0x11e8   :  { %v2866_v34 = vpop.xlane.xlu2 %2865 }
0x11e9   :  { %v2888_v24 = vsub.f32 %v2856_v37, %v2866_v34 }
0x11eb   :  { %v2896_v33 = vmul.f32 1.442695, %v2888_v24 }
0x11ed   :  { %4881 = vpow2.f32 %v2896_v33 }
0x11f3   :  { %v4882_v50 = vpop.eup %4881 }
0x11f4   :  { %v2912_v51 = vsel %vm1067_vm9, %v4882_v50, 0.0 }
0x11f5   :  { %2913 = vadd.xlane.f32.xlu2 %v2912_v51 }
0x11f8   :  { %v2878_v41 = vpop.xlane.xlu0 %2877 }
0x11f9   :  { %v2892_v8 = vsub.f32 %v2860_v57, %v2878_v41 }
0x11fb   :  { %v2904_v52 = vmul.f32 1.442695, %v2892_v8 }
0x11fd   :  { %4883 = vpow2.f32 %v2904_v52  ;;  %2883 = vmax.xlane.f32.xlu2 %v2882_v28 }
0x1200   :  { %v2872_v25 = vpop.xlane.xlu0 %2871 }
0x1201   :  { %v2890_v17 = vsub.f32 %v2858_v43, %v2872_v25 }
0x1203   :  { %v6050_v26 = vpop.eup %4883  ;;  %v2900_v56 = vmul.f32 1.442695, %v2890_v17 }
0x1204   :  { %v2917_v20 = vpop.xlane.xlu1 %2916  ;;  %v2924_v29 = vsel %vm1067_vm9, %v6050_v26, 0.0 }
0x1205   :  { %4885 = vpow2.f32 %v2900_v56  ;;  %2925 = vadd.xlane.f32.xlu1 %v2924_v29 }
0x1206   :  { %4887 = vrcp.f32 %v2917_v20 }
0x120b   :  { %v4886_v47 = vpop.eup %4885 }
0x120c   :  { %v2887_v49 = vpop.xlane.xlu1 %2886  ;;  %v2918_v63 = vsel %vm1067_vm9, %v4886_v47, 0.0  ;;  %v4888_v37 = vpop.eup %4887 }
0x120d   :  { %v2895_v39 = vsub.f32 %v2863_v59, %v2887_v49  ;;  %2919 = vadd.xlane.f32.xlu1 %v2918_v63  ;;  %v2945_v30 = vmul.f32 %v4888_v37, %v4878_v44 }
0x120f   :  { %v2910_v61 = vmul.f32 1.442695, %v2895_v39  ;;  %v2953_v2 = vpack.c.bf16 %v2945_v30, %v2945_v30  ;;  %v3129_v39 = vld [vmem:[%s6371_s6 + $0x80] sm:$0xf] }
0x1211   :  { %4889 = vpow2.f32 %v2910_v61 }
0x1213   :  { %v2982_v15 = vpop.permute.xlu0 %2981 }
0x1214   :  { %v2987_v38 = vsel %vm1372_vm11, %v2982_v15, 0 }
0x1215   :  { %3023 = vrot.lane.b32.xlu2 %v5976_v16, %s4994_s4  ;;  %2996 = vmatpush.bf16.msra.mxu0 %v2987_v38  ;;  %v2881_v16 = vpop.xlane.xlu2 %2880  ;;  %v3135_v38 = vsel %vm1372_vm11, %v3129_v39, 0 }
0x1216   :  { %v2893_v58 = vsub.f32 %v6026_v7, %v2881_v16 }
0x1217   :  { %v4890_v45 = vpop.eup %4889 }
0x1218   :  { %4528 = vmatmul.msk.bf16.vlgmr.msra.gmra.mxu0 %vm1067_vm9, %v2953_v2  ;;  %v2933_v53 = vsel %vm1067_vm9, %v4890_v45, 0.0  ;;  %v2906_v6 = vmul.f32 1.442695, %v2893_v58 }
0x1219   :  { %2934 = vadd.xlane.f32.xlu0 %v2933_v53 }
0x121a   :  { %4891 = vpow2.f32 %v2906_v6 }
0x121b   :  { %v3087_v31 = vpop.permute.xlu0 %3086 }
0x121c   :  { %v3092_v55 = vsel %vm1372_vm11, %v3087_v31, 0 }
0x121d   :  { %3101 = vmatpush.bf16.msra.mxu2 %v3092_v55 }
0x1220   :  { %v4892_v48 = vpop.eup %4891 }
0x1221   :  { %v2927_v12 = vsel %vm1067_vm9, %v4892_v48, 0.0 }
0x1224   :  { %v2961_v57 = vpop.permute.xlu1 %2960 }
0x1225   :  { %v2966_v54 = vsel %vm1372_vm11, %v2961_v57, 0 }
0x1226   :  { %3107 = vrot.lane.b32.xlu1 %v5989_v11, %s4994_s4  ;;  %2975 = vmatpush.bf16.msra.mxu1 %v2966_v54 }
0x122d   :  { %3065 = vrot.lane.b32.xlu0 %v5998_v13, %s4994_s4 }
0x123e   :  { %2928 = vadd.xlane.f32.xlu2 %v2927_v12 }
0x124e   :  { %v2923_v22 = vpop.xlane.xlu0 %2922 }
0x1268   :  { %v2914_v18 = vpop.xlane.xlu2 %2913 }
0x1269   :  { %4893 = vrcp.f32 %v2914_v18 }
0x126a   :  { %4895 = vrcp.f32 %v2923_v22  ;;  %v3178_v22 = vld [vmem:[%s6371_s6 + $0x88] sm:$0xf] }
0x126f   :  { %v4894_v27 = vpop.eup %4893 }
0x1270   :  { %v2944_v43 = vmul.f32 %v4894_v27, %v4882_v50  ;;  %v2884_v11 = vpop.xlane.xlu2 %2883  ;;  %v4896_v7 = vpop.eup %4895  ;;  %v3184_v27 = vsel %vm1372_vm11, %v3178_v22, 0 }
0x1271   :  { %v2894_v60 = vsub.f32 %v2862_v1, %v2884_v11  ;;  %v2947_v13 = vmul.f32 %v4896_v7, %v6043_v10 }
0x1272   :  { %v2952_v23 = vpack.c.bf16 %v2944_v43, %v2944_v43  ;;  %v3202_v43 = vld [vmem:[%s6371_s6 + $0x8c] sm:$0xf] }
0x1273   :  { %v2908_v44 = vmul.f32 1.442695, %v2894_v60  ;;  %v2955_v21 = vpack.c.bf16 %v2947_v13, %v2947_v13  ;;  %v3208_v11 = vsel %vm1372_vm11, %v3202_v43, 0  ;;  %v4787_v43 = vld [vmem:[%s6372_s7 + $0x17] ss:$0 sm:$0xff] }
0x1274   :  { %4527 = vmatmul.msk.bf16.vlgmr.msra.gmra.mxu1 %vm1067_vm9, %v2952_v23 }
0x1275   :  { %4897 = vpow2.f32 %v2908_v44 }
0x1278   :  { %v3024_v36 = vpop.permute.xlu2 %3023  ;;  %v2926_v5 = vpop.xlane.xlu1 %2925 }
0x1279   :  { %v3029_v59 = vsel %vm1372_vm11, %v3024_v36, 0 }
0x127a   :  { %3038 = vmatpush.bf16.msra.mxu3 %v3029_v59  ;;  %v4785_v59 = vld [vmem:[%s6372_s7 + $0x10] ss:$0 sm:$0xff] }
0x127b   :  { %v4898_v9 = vpop.eup %4897 }
0x127c   :  { %v2930_v42 = vsel %vm1067_vm9, %v4898_v9, 0.0 }
0x127d   :  { %2931 = vadd.xlane.f32.xlu2 %v2930_v42  ;;  %4530 = vmatmul.msk.bf16.vlgmr.msra.gmra.mxu3 %vm1067_vm9, %v2955_v21 }
0x1280   :  { %v2920_v32 = vpop.xlane.xlu1 %2919 }
0x1281   :  { %4899 = vrcp.f32 %v2920_v32 }
0x1287   :  { %v4900_v0 = vpop.eup %4899 }
0x1288   :  { %v2946_v34 = vmul.f32 %v4900_v0, %v4886_v47 }
0x128a   :  { %v2954_v24 = vpack.c.bf16 %v2946_v34, %v2946_v34 }
0x128c   :  { %4529 = vmatmul.msk.bf16.vlgmr.msrb.gmra.mxu2 %vm1067_vm9, %v2954_v24  ;;  %v2935_v10 = vpop.xlane.xlu0 %2934 }
0x128d   :  { %4901 = vrcp.f32 %v2935_v10  ;;  %3193 = vmatpush.bf16.msrb.mxu2 %v3184_v27 }
0x1293   :  { %v4902_v33 = vpop.eup %4901 }
0x1294   :  { %v2951_v4 = vmul.f32 %v4902_v33, %v4890_v45 }
0x1295   :  { %3044 = vrot.lane.b32.xlu2 %v5985_v35, %s4994_s4  ;;  %v2998_v50 = vpop.f32.mrf.mxu0  ;;  %v3154_v35 = vld [vmem:[%s6371_s6 + $0x84] sm:$0xf] }
0x1296   :  { %v2959_v1 = vpack.c.bf16 %v2951_v4, %v2951_v4  ;;  %v3160_v29 = vsel %vm1372_vm11, %v3154_v35, 0 }
0x1298   :  { %v3108_v51 = vpop.permute.xlu1 %3107 }
0x1299   :  { %v3113_v41 = vsel %vm1372_vm11, %v3108_v51, 0 }
0x129a   :  { %3122 = vmatpush.bf16.msrb.mxu3 %v3113_v41 }
0x129d   :  { %v3000_v8 = vpop.f32.mrf.mxu0  ;;  %4534 = vmatmul.msk.bf16.vlgmr.msrb.gmra.mxu3 %vm1067_vm9, %v2959_v1 }
0x129e   :  { %3217 = vmatpush.bf16.msra.mxu3 %v3208_v11 }
0x129f   :  { %v3066_v52 = vpop.permute.xlu0 %3065 }
0x12a0   :  { %v3071_v28 = vsel %vm1372_vm11, %v3066_v52, 0  ;;  %v4648_v52 = vld [vmem:[%s6371_s6 + $0x90] sm:$0xff] }
0x12a1   :  { %3080 = vmatpush.bf16.msrb.mxu0 %v3071_v28 }
0x12a5   :  { %3169 = vmatpush.bf16.msra.mxu0 %v3160_v29 }
0x12b1   :  { %v2929_v25 = vpop.xlane.xlu2 %2928 }
0x12b2   :  { %4903 = vrcp.f32 %v2929_v25 }
0x12b3   :  { %4905 = vrcp.f32 %v2926_v5 }
0x12b8   :  { %v4904_v17 = vpop.eup %4903 }
0x12b9   :  { %v2949_v56 = vmul.f32 %v4904_v17, %v4892_v48  ;;  %v4906_v63 = vpop.eup %4905 }
0x12ba   :  { %v2948_v61 = vmul.f32 %v4906_v63, %v6050_v26 }
0x12bb   :  { %v2957_v20 = vpack.c.bf16 %v2949_v56, %v2949_v56 }
0x12bc   :  { %v2956_v31 = vpack.c.bf16 %v2948_v61, %v2948_v61 }
0x12bd   :  { %4532 = vmatmul.msk.bf16.vlgmr.msrb.gmra.mxu0 %vm1067_vm9, %v2957_v20 }
0x12f0   :  { %v2932_v47 = vpop.xlane.xlu2 %2931 }
0x12f1   :  { %4907 = vrcp.f32 %v2932_v47  ;;  %v2977_v49 = vpop.f32.mrf.mxu1 }
0x12f2   :  { %v3130_v54 = vpack.c.bf16 %v2998_v50, %v2977_v49  ;;  %v4649_v50 = vld [vmem:[%s6371_s6 + $0x98] sm:$0xff] }
0x12f3   :  { %3318 = vrot.lane.b32.xlu2 %v4649_v50, %s4992_s18 }
0x12f7   :  { %v4908_v37 = vpop.eup %4907 }
0x12f8   :  { %v2950_v30 = vmul.f32 %v4908_v37, %v4898_v9  ;;  %v3045_v15 = vpop.permute.xlu2 %3044 }
0x12f9   :  { %v3050_v2 = vsel %vm1372_vm11, %v3045_v15, 0  ;;  %v2979_v45 = vpop.f32.mrf.mxu1 }
0x12fa   :  { %v2958_v53 = vpack.c.bf16 %v2950_v30, %v2950_v30  ;;  %3059 = vmatpush.bf16.msrb.mxu1 %v3050_v2 }
0x12fc   :  { %4533 = vmatmul.msk.bf16.vlgmr.msra.gmra.mxu2 %vm1067_vm9, %v2958_v53 }
0x12fd   :  { %4531 = vmatmul.msk.bf16.vlgmr.msrb.gmra.mxu1 %vm1067_vm9, %v2956_v31 }
0x12fe   :  { %3144 = vmatpush.bf16.msra.mxu1 %v3135_v38  ;;  %v6136_v38 = vld [vmem:[%s6372_s7 + $0x11] ss:$0 sm:$0xff] }
0x1300   :  { %v3040_v55 = vpop.f32.mrf.mxu3 }
0x1302   :  { %3308 = vmatpush.bf16.msrb.mxu1 %v4649_v50 }
0x1306   :  { %3309 = vmatpush.bf16.msrb.mxu1 %v4648_v52 }
0x1308   :  { %v3042_v57 = vpop.f32.mrf.mxu3 }
0x130d   :  { %4535 = vmatmul.msk.bf16.vlgmr.msra.gmra.mxu1 %vm1067_vm9, %v3130_v54 }
0x130f   :  { %v3019_v26 = vpop.f32.mrf.mxu2 }
0x1310   :  { %v3155_v16 = vpack.c.bf16 %v3040_v55, %v3019_v26 }
0x1312   :  { %4536 = vmatmul.msk.bf16.vlgmr.msra.gmra.mxu0 %vm1067_vm9, %v3155_v16 }
0x1317   :  { %v3021_v58 = vpop.f32.mrf.mxu2 }
0x1320   :  { %v3124_v6 = vpop.f32.mrf.mxu3 }
0x1328   :  { %v3126_v48 = vpop.f32.mrf.mxu3 }
0x133a   :  { %v3082_v12 = vpop.f32.mrf.mxu0 }
0x1342   :  { %v3084_v18 = vpop.f32.mrf.mxu0 }
0x134d   :  { %v3319_v20 = vpop.permute.xlu2 %3318 }
0x134e   :  { %3332 = vmatpush.bf16.msrb.mxu0 %v3319_v20 }
0x137a   :  { %v3061_v60 = vpop.f32.mrf.mxu1 }
0x137b   :  { %v3179_v23 = vpack.c.bf16 %v3082_v12, %v3061_v60 }
0x137d   :  { %4537 = vmatmul.msk.bf16.vlgmr.msrb.gmra.mxu2 %vm1067_vm9, %v3179_v23 }
0x137f   :  { %v3103_v44 = vpop.f32.mrf.mxu2 }
0x1380   :  { %v3203_v7 = vpack.c.bf16 %v3124_v6, %v3103_v44  ;;  %v4788_v44 = vld [vmem:[%s6372_s7 + $0x18] ss:$0 sm:$0xff] }
0x1382   :  { %v3063_v13 = vpop.f32.mrf.mxu1  ;;  %4538 = vmatmul.msk.bf16.vlgmr.msra.gmra.mxu3 %vm1067_vm9, %v3203_v7 }
0x1387   :  { %v3105_v36 = vpop.f32.mrf.mxu2 }
0x138a   :  { %v3146_v5 = vpop.f32.mrf.mxu1 }
0x138b   :  { %v3152_v21 = vadd.f32 %v4785_v59, %v3146_v5 }
0x138f   :  { %v3171_v9 = vpop.f32.mrf.mxu0 }
0x1390   :  { %v3176_v32 = vadd.f32 %v3171_v9, %v3152_v21 }
0x1392   :  { %v3148_v34 = vpop.f32.mrf.mxu1 }
0x1393   :  { %v3153_v4 = vadd.f32 %v4785_v59, %v3148_v34 }
0x1397   :  { %v3173_v33 = vpop.f32.mrf.mxu0 }
0x1398   :  { %v3177_v1 = vadd.f32 %v3173_v33, %v3153_v4 }
0x1400   :  { %v3195_v42 = vpop.f32.mrf.mxu2 }
0x1401   :  { %v3200_v0 = vadd.f32 %v3195_v42, %v3176_v32 }
0x1405   :  { %v3219_v24 = vpop.f32.mrf.mxu3 }
0x1406   :  { %v3224_v10 = vadd.f32 %v3219_v24, %v3200_v0 }
0x1408   :  { %v6111_v51 = vadd.f32 %v3224_v10, %v5936_v46  ;;  %v3197_v41 = vpop.f32.mrf.mxu2 }
0x1409   :  { %v3201_v28 = vadd.f32 %v3197_v41, %v3177_v1 }
0x140a   :  { %v3230_v8 = vsel %vm78_vm0, %v6111_v51, 0.0 }
0x140b   :  { %3231 = vadd.xlane.f32.xlu1 %v3230_v8 }
0x140d   :  { %v3221_v25 = vpop.f32.mrf.mxu3 }
0x140e   :  { %v3225_v17 = vadd.f32 %v3221_v25, %v3201_v28 }
0x1410   :  { %v6120_v46 = vadd.f32 %v3225_v17, %v5941_v14 }
0x1412   :  { %v3233_v56 = vsel %vm78_vm0, %v6120_v46, 0.0 }
0x1413   :  { %3234 = vadd.xlane.f32.xlu0 %v3233_v56 }
0x1427   :  { %3316 = vrot.lane.b32.xlu0 %v4648_v52, %s4992_s18 }
0x147e   :  { %v3232_v35 = vpop.xlane.xlu1 %3231 }
0x147f   :  { %v3236_v29 = vmul.f32 %v3232_v35, %v5279_v40 }
0x1481   :  { %v3238_v47 = vsub.f32 %v6111_v51, %v3236_v29 }
0x1483   :  { %v3240_v49 = vmul.f32 %v3238_v47, %v3238_v47 }
0x1485   :  { %v3242_v63 = vsel %vm78_vm0, %v3240_v49, 0.0 }
0x1486   :  { %3243 = vadd.xlane.f32.xlu2 %v3242_v63  ;;  %v3235_v39 = vpop.xlane.xlu0 %3234 }
0x1487   :  { %v3237_v14 = vmul.f32 %v3235_v39, %v5279_v40 }
0x1489   :  { %v3239_v37 = vsub.f32 %v6120_v46, %v3237_v14 }
0x148b   :  { %v3241_v61 = vmul.f32 %v3239_v37, %v3239_v37 }
0x148d   :  { %v3245_v30 = vsel %vm78_vm0, %v3241_v61, 0.0 }
0x148e   :  { %3246 = vadd.xlane.f32.xlu1 %v3245_v30 }
0x1499   :  { %v3317_v15 = vpop.permute.xlu0 %3316 }
0x149a   :  { %3333 = vmatpush.bf16.msrb.mxu0 %v3317_v15 }
0x149d   :  { %4548 = vmatmul.msk.bf16.vlgmr.msrb.gmra.mxu0 %vm78_vm0, %v5735_v19 }
0x14a7   :  { %3323 = vrot.lane.b32.xlu1 %v6136_v38, %s4992_s18 }
0x14ad   :  { %4549 = vmatmul.msk.bf16.gmra.mxu0 %vm78_vm0, %v5748_v62 }
0x14f9   :  { %v3244_v2 = vpop.xlane.xlu2 %3243 }
0x14fa   :  { %v3248_v45 = vmul.f32 %v3244_v2, %v5279_v40 }
0x14fc   :  { %v3250_v53 = vadd.f32 1e-05, %v3248_v45 }
0x14fe   :  { %4909 = vrsqrt.f32 %v3250_v53  ;;  %vm3258_vm7 = vweird.f32 %v3250_v53 }
0x1501   :  { %v3247_v31 = vpop.xlane.xlu1 %3246 }
0x1502   :  { %v3249_v55 = vmul.f32 %v3247_v31, %v5279_v40 }
0x1504   :  { %v4910_v19 = vpop.eup %4909  ;;  %v3251_v57 = vadd.f32 1e-05, %v3249_v55 }
0x1505   :  { %v3253_v54 = vmul.f32 %v4910_v19, %v3250_v53  ;;  %vm3259_vm6 = vweird.f32 %v4910_v19 }
0x1506   :  { %4911 = vrsqrt.f32 %v3251_v57  ;;  %vm3260_vm8 = vmor %vm3258_vm7, %vm3259_vm6  ;;  %vm3268_vm12 = vweird.f32 %v3251_v57  ;;  %vm4207_vm6 = vcmask 7168  }
0x1507   :  { %v3254_v26 = vmul.f32 %v4910_v19, %v3253_v54 }
0x1509   :  { %v3255_v16 = vmul.f32 0.5, %v3254_v26 }
0x150b   :  { %v3256_v58 = vsub.f32 1.5, %v3255_v16 }
0x150c   :  { %v4912_v6 = vpop.eup %4911 }
0x150d   :  { %v3257_v48 = vmul.f32 %v4910_v19, %v3256_v58  ;;  %v3263_v12 = vmul.f32 %v4912_v6, %v3251_v57  ;;  %vm3269_vm10 = vweird.f32 %v4912_v6 }
0x150e   :  { %vm3270_vm13 = vmor %vm3268_vm12, %vm3269_vm10 }
0x150f   :  { %v3264_v62 = vmul.f32 %v4912_v6, %v3263_v12  ;;  %v3261_v18 = vsel %vm3260_vm8, %v4910_v19, %v3257_v48 }
0x1510   :  { %v3272_v11 = vmul.f32 %v3261_v18, %v3238_v47 }
0x1511   :  { %v3265_v22 = vmul.f32 0.5, %v3264_v62 }
0x1512   :  { %v3275_v7 = vmul.f32 %v4787_v43, %v3272_v11 }
0x1513   :  { %v3266_v27 = vsub.f32 1.5, %v3265_v22 }
0x1514   :  { %v3278_v59 = vadd.f32 %v4788_v44, %v3275_v7 }
0x1515   :  { %v3267_v60 = vmul.f32 %v4912_v6, %v3266_v27 }
0x1517   :  { %v3271_v23 = vsel %vm3270_vm13, %v4912_v6, %v3267_v60  ;;  %vm4242_vm13 = vcmask 0  }
0x1518   :  { %v3273_v13 = vmul.f32 %v3271_v23, %v3239_v37 }
0x1519   :  { %v3324_v21 = vpop.permute.xlu1 %3323 }
0x151a   :  { %v3276_v36 = vmul.f32 %v4787_v43, %v3273_v13  ;;  %v3335_v5 = vpop.f32.mrf.mxu0 }
0x151b   :  { %v3336_v32 = vadd.f32 %v3335_v5, %v3324_v21 }
0x151c   :  { %v3279_v9 = vadd.f32 %v4788_v44, %v3276_v36 }
0x151d   :  { %v3413_v24 = vpack.c.bf16 %v3336_v32, %v3336_v32 }
0x151e   :  { %v3285_v42 = vpack.c.bf16 %v3279_v9, %v3278_v59 }
0x151f   :  { %v3431_v33 = vunpack.c.l.b16 %v3413_v24 }
0x1520   :  { %4547 = vmatmul.msk.bf16.vlgmr.msrb.gmra.mxu1 %vm78_vm0, %v3285_v42 }
0x1522   :  { %v3337_v0 = vpop.f32.mrf.mxu0 }
0x1523   :  { %v6151_v34 = vadd.f32 %v3337_v0, %v3324_v21 }
0x1525   :  { %v3414_v10 = vpack.c.bf16 %v6151_v34, %v6151_v34  ;;  %v4743_v49 = vpack.i.bf16 %v6151_v34, %v3336_v32 }
0x1527   :  { %v3432_v50 = vunpack.c.l.b16 %v3414_v10 }
0x1529   :  { %v3433_v4 = vpack.c.b16 %v3432_v50, %v3431_v33 }
0x152a   :  { %v3340_v41 = vpop.f32.mrf.mxu0 }
0x152b   :  { %v3438_v1 = vsel %vm1067_vm9, %v3433_v4, 0  ;;  %v3341_v8 = vadd.f32 %v3340_v41, %v3324_v21 }
0x152c   :  { %3447 = vmatpush.bf16.xpose.msra.mxu2 %v3438_v1 }
0x152d   :  { %v3415_v25 = vpack.c.bf16 %v3341_v8, %v3341_v8 }
0x152f   :  { %v3455_v20 = vunpack.c.l.b16 %v3415_v25 }
0x1532   :  { %v3342_v52 = vpop.f32.mrf.mxu0 }
0x1533   :  { %v3343_v28 = vadd.f32 %v3342_v52, %v3324_v21 }
0x1535   :  { %v4738_v17 = vpack.i.bf16 %v3343_v28, %v3341_v8  ;;  %v3416_v56 = vpack.c.bf16 %v3343_v28, %v3343_v28 }
0x1537   :  { %4739 = vrot.lane.b32.xlu1 %v4738_v17, %s4990_s16  ;;  %4724 = vrot.lane.b32.xlu2 %v4738_v17, %s4989_s15  ;;  %v3456_v35 = vunpack.c.l.b16 %v3416_v56 }
0x1539   :  { %v6158_v29 = vpack.c.b16 %v3456_v35, %v3455_v20 }
0x153b   :  { %v3462_v47 = vsel %vm1067_vm9, %v6158_v29, 0 }
0x153c   :  { %3471 = vmatpush.bf16.xpose.msrb.mxu3 %v3462_v47 }
0x153f   :  { %3395 = vrot.lane.b32.xlu1 %v6151_v34, %s4990_s16  ;;  %4744 = vrot.lane.b32.xlu2 %v4743_v49, %s4991_s17 }
0x1591   :  { %v4725_v63 = vpop.permute.xlu2 %4724 }
0x1592   :  { %v4727_v39 = vunpack.i.h.bf16 %v4725_v63  ;;  %v4726_v14 = vunpack.i.l.bf16 %v4725_v63 }
0x1594   :  { %v3420_v37 = vpack.c.bf16 %v4727_v39, %v4727_v39  ;;  %v3419_v61 = vpack.c.bf16 %v4726_v14, %v4726_v14 }
0x1596   :  { %v3504_v30 = vunpack.c.l.b16 %v3420_v37  ;;  %v3503_v15 = vunpack.c.l.b16 %v3419_v61 }
0x1598   :  { %v3505_v2 = vpack.c.b16 %v3504_v30, %v3503_v15 }
0x1599   :  { %v4745_v45 = vpop.permute.xlu2 %4744 }
0x159a   :  { %v4747_v53 = vunpack.i.h.bf16 %v4745_v45  ;;  %v4746_v31 = vunpack.i.l.bf16 %v4745_v45  ;;  %v3510_v55 = vsel %vm1067_vm9, %v3505_v2, 0 }
0x159b   :  { %3519 = vmatpush.bf16.xpose.msrb.mxu2 %v3510_v55 }
0x159c   :  { %v3422_v19 = vpack.c.bf16 %v4747_v53, %v4747_v53  ;;  %v3421_v57 = vpack.c.bf16 %v4746_v31, %v4746_v31 }
0x159d   :  { %v3311_v54 = vpop.f32.mrf.mxu1 }
0x159e   :  { %v3528_v26 = vunpack.c.l.b16 %v3422_v19  ;;  %v3527_v16 = vunpack.c.l.b16 %v3421_v57  ;;  %v3312_v58 = vadd.f32 %v6136_v38, %v3311_v54 }
0x15a0   :  { %v6168_v6 = vpack.c.b16 %v3528_v26, %v3527_v16  ;;  %v3405_v48 = vpack.c.bf16 %v3312_v58, %v3312_v58  ;;  %3359 = vrot.lane.b32.xlu1 %v3312_v58, %s4990_s16  ;;  %v4748_v12 = vpack.i.bf16 %v3341_v8, %v3312_v58 }
0x15a2   :  { %4749 = vrot.lane.b32.xlu2 %v4748_v12, %s4991_s17  ;;  %4550 = vmatmul.msk.bf16.vlgmr.msra.gmra.mxu2 %vm1067_vm9, %v3405_v48  ;;  %v3534_v62 = vsel %vm1067_vm9, %v6168_v6, 0 }
0x15a3   :  { %3543 = vmatpush.bf16.xpose.msra.mxu3 %v3534_v62 }
0x15a5   :  { %v3313_v18 = vpop.f32.mrf.mxu1 }
0x15a6   :  { %v3314_v22 = vadd.f32 %v6136_v38, %v3313_v18  ;;  %v4733_v38 = vpack.i.bf16 %v3312_v58, %v6151_v34 }
0x15a8   :  { %v3406_v27 = vpack.c.bf16 %v3314_v22, %v3314_v22  ;;  %3725 = vrot.lane.b32.xlu1 %v3433_v4, %s4992_s18  ;;  %v4728_v43 = vpack.i.bf16 %v3336_v32, %v3314_v22 }
0x15a9   :  { %v4740_v11 = vpop.permute.xlu1 %4739 }
0x15aa   :  { %v4742_v60 = vunpack.i.h.bf16 %v4740_v11  ;;  %v4741_v23 = vunpack.i.l.bf16 %v4740_v11  ;;  %4551 = vmatmul.msk.bf16.vlgmr.msrb.gmra.mxu3 %vm1067_vm9, %v3406_v27  ;;  %3356 = vrot.lane.b32.xlu2 %v3314_v22, %s4991_s17 }
0x15ab   :  { %4729 = vrot.lane.b32.xlu0 %v4728_v43, %s4989_s15 }
0x15ac   :  { %v3428_v44 = vpack.c.bf16 %v4742_v60, %v4742_v60  ;;  %v3427_v7 = vpack.c.bf16 %v4741_v23, %v4741_v23 }
0x15ae   :  { %v3600_v13 = vunpack.c.l.b16 %v3428_v44  ;;  %v3599_v36 = vunpack.c.l.b16 %v3427_v7 }
0x15b0   :  { %v6180_v5 = vpack.c.b16 %v3600_v13, %v3599_v36 }
0x15b1   :  { %v3396_v32 = vpop.permute.xlu1 %3395 }
0x15b2   :  { %3782 = vrot.lane.b32.xlu2 %v3505_v2, %s4992_s18  ;;  %v3606_v59 = vsel %vm1067_vm9, %v6180_v5, 0  ;;  %v3426_v39 = vpack.c.bf16 %v3396_v32, %v3396_v32 }
0x15b3   :  { %4734 = vrot.lane.b32.xlu0 %v4733_v38, %s4989_s15  ;;  %3615 = vmatpush.bf16.xpose.msra.mxu2 %v3606_v59 }
0x15b4   :  { %v3576_v19 = vunpack.c.l.b16 %v3426_v39 }
0x15bb   :  { %4754 = vrot.lane.b32.xlu0 %v4728_v43, %s4990_s16 }
0x15c3   :  { %3389 = vrot.lane.b32.xlu0 %v3343_v28, %s4991_s17 }
0x15fc   :  { %v4750_v9 = vpop.permute.xlu2 %4749 }
0x15fd   :  { %v4751_v21 = vunpack.i.l.bf16 %v4750_v9  ;;  %v4752_v2 = vunpack.i.h.bf16 %v4750_v9 }
0x15ff   :  { %v3409_v42 = vpack.c.bf16 %v4751_v21, %v4751_v21  ;;  %v3423_v54 = vpack.c.bf16 %v4752_v2, %v4752_v2 }
0x1601   :  { %4554 = vmatmul.msk.bf16.vlgmr.msra.gmra.mxu3 %vm1067_vm9, %v3409_v42  ;;  %v3551_v18 = vunpack.c.l.b16 %v3423_v54 }
0x1604   :  { %v3357_v34 = vpop.permute.xlu2 %3356 }
0x1605   :  { %v3410_v60 = vpack.c.bf16 %v3357_v34, %v3357_v34 }
0x160c   :  { %v3783_v4 = vpop.permute.xlu2 %3782 }
0x1612   :  { %v3360_v0 = vpop.permute.xlu1 %3359 }
0x1613   :  { %v3411_v43 = vpack.c.bf16 %v3360_v0, %v3360_v0 }
0x161a   :  { %v3726_v24 = vpop.permute.xlu1 %3725 }
0x161b   :  { %3738 = vmatpush.bf16.msrb.mxu3 %v3726_v24 }
0x161d   :  { %v4730_v10 = vpop.permute.xlu0 %4729 }
0x161e   :  { %v4731_v33 = vunpack.i.l.bf16 %v4730_v10  ;;  %v4732_v41 = vunpack.i.h.bf16 %v4730_v10 }
0x1620   :  { %v3408_v50 = vpack.c.bf16 %v4731_v33, %v4731_v33  ;;  %v3417_v52 = vpack.c.bf16 %v4732_v41, %v4732_v41 }
0x1622   :  { %4553 = vmatmul.msk.bf16.vlgmr.msrb.gmra.mxu2 %vm1067_vm9, %v3408_v50  ;;  %v3479_v20 = vunpack.c.l.b16 %v3417_v52 }
0x1623   :  { %3795 = vmatpush.bf16.msrb.mxu2 %v3783_v4 }
0x1625   :  { %v4735_v1 = vpop.permute.xlu0 %4734  ;;  %v3449_v8 = vpop.f32.mrf.mxu2 }
0x1626   :  { %v4736_v28 = vunpack.i.l.bf16 %v4735_v1  ;;  %v6191_v25 = vmul.f32 0.35355338, %v3449_v8  ;;  %v4737_v45 = vunpack.i.h.bf16 %v4735_v1 }
0x1628   :  { %v3418_v17 = vpack.c.bf16 %v4736_v28, %v4736_v28  ;;  %v3629_v56 = vsel %vm2045_vm4, %v6191_v25, -inf  ;;  %v3407_v26 = vpack.c.bf16 %v4737_v45, %v4737_v45 }
0x1629   :  { %3630 = vmax.xlane.f32.xlu1 %v3629_v56 }
0x162a   :  { %v3480_v35 = vunpack.c.l.b16 %v3418_v17 }
0x162c   :  { %v6195_v47 = vpack.c.b16 %v3480_v35, %v3479_v20 }
0x162d   :  { %v4755_v49 = vpop.permute.xlu0 %4754  ;;  %v3451_v63 = vpop.f32.mrf.mxu2 }
0x162e   :  { %v4757_v14 = vunpack.i.h.bf16 %v4755_v49  ;;  %v4756_v37 = vunpack.i.l.bf16 %v4755_v49  ;;  %v3473_v61 = vpop.f32.mrf.mxu3  ;;  %v3486_v30 = vsel %vm1067_vm9, %v6195_v47, 0 }
0x162f   :  { %v6199_v15 = vmul.f32 0.35355338, %v3473_v61  ;;  %3495 = vmatpush.bf16.xpose.msra.mxu1 %v3486_v30 }
0x1630   :  { %v3425_v53 = vpack.c.bf16 %v4757_v14, %v4757_v14  ;;  %v3412_v31 = vpack.c.bf16 %v4756_v37, %v4756_v37 }
0x1631   :  { %v3632_v55 = vsel %vm2045_vm4, %v6199_v15, -inf }
0x1632   :  { %v3575_v57 = vunpack.c.l.b16 %v3425_v53  ;;  %3633 = vmax.xlane.f32.xlu0 %v3632_v55  ;;  %4557 = vmatmul.msk.bf16.vlgmr.msra.gmra.mxu2 %vm1067_vm9, %v3412_v31 }
0x1634   :  { %v6204_v16 = vpack.c.b16 %v3576_v19, %v3575_v57 }
0x1635   :  { %v3390_v58 = vpop.permute.xlu0 %3389 }
0x1636   :  { %v3424_v48 = vpack.c.bf16 %v3390_v58, %v3390_v58  ;;  %v3475_v12 = vpop.f32.mrf.mxu3  ;;  %4552 = vmatmul.msk.bf16.vlgmr.msra.gmra.mxu1 %vm1067_vm9, %v3407_v26  ;;  %v3582_v62 = vsel %vm1067_vm9, %v6204_v16, 0 }
0x1637   :  { %3591 = vmatpush.bf16.xpose.msra.mxu0 %v3582_v62 }
0x1638   :  { %v3552_v22 = vunpack.c.l.b16 %v3424_v48 }
0x163a   :  { %v6209_v27 = vpack.c.b16 %v3552_v22, %v3551_v18 }
0x163c   :  { %v3558_v11 = vsel %vm1067_vm9, %v6209_v27, 0 }
0x163d   :  { %3567 = vmatpush.bf16.xpose.msrb.mxu1 %v3558_v11 }
0x163e   :  { %4556 = vmatmul.msk.bf16.vlgmr.msra.gmra.mxu0 %vm1067_vm9, %v3411_v43 }
0x1646   :  { %4555 = vmatmul.msk.bf16.vlgmr.msrb.gmra.mxu1 %vm1067_vm9, %v3410_v60 }
0x1684   :  { %v3545_v23 = vpop.f32.mrf.mxu3 }
0x1685   :  { %v3625_v21 = vmul.f32 0.35355338, %v3545_v23 }
0x1687   :  { %v3641_v34 = vsel %vm2045_vm4, %v3625_v21, -inf }
0x168c   :  { %v3547_v44 = vpop.f32.mrf.mxu3 }
0x169c   :  { %v3631_v56 = vpop.xlane.xlu1 %3630 }
0x169d   :  { %v3653_v20 = vsub.f32 %v6191_v25, %v3631_v56 }
0x169f   :  { %v3661_v35 = vmul.f32 1.442695, %v3653_v20 }
0x16a1   :  { %4913 = vpow2.f32 %v3661_v35 }
0x16a5   :  { %v3521_v7 = vpop.f32.mrf.mxu2  ;;  %v3634_v49 = vpop.xlane.xlu0 %3633 }
0x16a6   :  { %v3624_v33 = vmul.f32 0.35355338, %v3521_v7  ;;  %v3654_v63 = vsub.f32 %v6199_v15, %v3634_v49 }
0x16a7   :  { %v4914_v14 = vpop.eup %4913 }
0x16a8   :  { %v3638_v8 = vsel %vm2045_vm4, %v3624_v33, -inf  ;;  %v3663_v39 = vmul.f32 1.442695, %v3654_v63  ;;  %v3677_v37 = vsel %vm2045_vm4, %v4914_v14, 0.0 }
0x16aa   :  { %4915 = vpow2.f32 %v3663_v39 }
0x16ad   :  { %v3523_v13 = vpop.f32.mrf.mxu2 }
0x16b3   :  { %v3497_v36 = vpop.f32.mrf.mxu1 }
0x16b4   :  { %v3623_v38 = vmul.f32 0.35355338, %v3497_v36 }
0x16b5   :  { %v3617_v59 = vpop.f32.mrf.mxu2 }
0x16b6   :  { %v3635_v9 = vsel %vm2045_vm4, %v3623_v38, -inf  ;;  %v3628_v52 = vmul.f32 0.35355338, %v3617_v59 }
0x16b7   :  { %3636 = vmax.xlane.f32.xlu2 %v3635_v9 }
0x16b8   :  { %v3650_v17 = vsel %vm2045_vm4, %v3628_v52, -inf }
0x16bb   :  { %v3499_v42 = vpop.f32.mrf.mxu1  ;;  %v3593_v32 = vpop.f32.mrf.mxu0 }
0x16bc   :  { %v3627_v0 = vmul.f32 0.35355338, %v3593_v32 }
0x16bd   :  { %v3619_v24 = vpop.f32.mrf.mxu2 }
0x16be   :  { %v3647_v10 = vsel %vm2045_vm4, %v3627_v0, -inf }
0x16bf   :  { %3648 = vmax.xlane.f32.xlu0 %v3647_v10  ;;  %3642 = vmax.xlane.f32.xlu2 %v3641_v34 }
0x16c3   :  { %v3569_v50 = vpop.f32.mrf.mxu1  ;;  %v3595_v4 = vpop.f32.mrf.mxu0 }
0x16c4   :  { %v3626_v41 = vmul.f32 0.35355338, %v3569_v50 }
0x16c6   :  { %v3644_v1 = vsel %vm2045_vm4, %v3626_v41, -inf }
0x16c7   :  { %3645 = vmax.xlane.f32.xlu1 %v3644_v1  ;;  %3639 = vmax.xlane.f32.xlu0 %v3638_v8 }
0x16cb   :  { %v3571_v28 = vpop.f32.mrf.mxu1 }
0x16cf   :  { %3651 = vmax.xlane.f32.xlu1 %v3650_v17 }
0x16d7   :  { %3858 = vrot.lane.b32.xlu2 %v6180_v5, %s4992_s18  ;;  %v6230_v5 = vpop.eup %4915 }
0x16db   :  { %3763 = vrot.lane.b32.xlu0 %v6195_v47, %s4992_s18  ;;  %v3680_v47 = vsel %vm2045_vm4, %v6230_v5, 0.0 }
0x16e8   :  { %3744 = vrot.lane.b32.xlu1 %v6158_v29, %s4992_s18 }
0x1705   :  { %3678 = vadd.xlane.f32.xlu0 %v3677_v37 }
0x170d   :  { %3681 = vadd.xlane.f32.xlu0 %v3680_v47 }
0x172a   :  { %v3637_v29 = vpop.xlane.xlu2 %3636 }
0x172b   :  { %v3655_v61 = vsub.f32 %v3623_v38, %v3637_v29 }
0x172d   :  { %v3665_v25 = vmul.f32 1.442695, %v3655_v61 }
0x172f   :  { %4917 = vpow2.f32 %v3665_v25 }
0x1732   :  { %v3649_v30 = vpop.xlane.xlu0 %3648  ;;  %v3643_v2 = vpop.xlane.xlu2 %3642 }
0x1733   :  { %v3659_v45 = vsub.f32 %v3627_v0, %v3649_v30  ;;  %v3657_v15 = vsub.f32 %v3625_v21, %v3643_v2 }
0x1735   :  { %v4918_v53 = vpop.eup %4917  ;;  %v3673_v31 = vmul.f32 1.442695, %v3659_v45  ;;  %v3669_v55 = vmul.f32 1.442695, %v3657_v15 }
0x1736   :  { %v3683_v19 = vsel %vm2045_vm4, %v4918_v53, 0.0 }
0x1737   :  { %4919 = vpow2.f32 %v3673_v31  ;;  %3684 = vadd.xlane.f32.xlu1 %v3683_v19  ;;  %v3878_v31 = vld [vmem:[%s6371_s6 + $0xa0] sm:$0xf] }
0x1738   :  { %4921 = vpow2.f32 %v3669_v55  ;;  %v3884_v55 = vsel %vm1372_vm11, %v3878_v31, 0 }
0x173a   :  { %v3859_v57 = vpop.permute.xlu2 %3858  ;;  %v3646_v54 = vpop.xlane.xlu1 %3645 }
0x173b   :  { %v3658_v26 = vsub.f32 %v3626_v41, %v3646_v54  ;;  %v3640_v58 = vpop.xlane.xlu0 %3639  ;;  %3871 = vmatpush.bf16.msra.mxu2 %v3859_v57 }
0x173c   :  { %v3656_v48 = vsub.f32 %v3624_v33, %v3640_v58 }
0x173d   :  { %v6235_v12 = vpop.eup %4919  ;;  %v3671_v62 = vmul.f32 1.442695, %v3658_v26 }
0x173e   :  { %v4922_v18 = vpop.eup %4921  ;;  %v3667_v22 = vmul.f32 1.442695, %v3656_v48  ;;  %v3695_v43 = vsel %vm2045_vm4, %v6235_v12, 0.0  ;;  %v3903_v48 = vld [vmem:[%s6371_s6 + $0xa4] sm:$0xf] }
0x173f   :  { %4923 = vpow2.f32 %v3671_v62  ;;  %v3689_v11 = vsel %vm2045_vm4, %v4922_v18, 0.0  ;;  %3696 = vadd.xlane.f32.xlu1 %v3695_v43  ;;  %v3927_v62 = vld [vmem:[%s6371_s6 + $0xa8] sm:$0xf]  ;;  %v3951_v43 = vld [vmem:[%s6371_s6 + $0xac] sm:$0xf] }
0x1740   :  { %4925 = vpow2.f32 %v3667_v22  ;;  %3690 = vadd.xlane.f32.xlu0 %v3689_v11  ;;  %v3957_v11 = vsel %vm1372_vm11, %v3951_v43, 0 }
0x1742   :  { %v3652_v60 = vpop.xlane.xlu1 %3651 }
0x1743   :  { %v3660_v23 = vsub.f32 %v3628_v52, %v3652_v60 }
0x1745   :  { %v4924_v44 = vpop.eup %4923  ;;  %v3675_v7 = vmul.f32 1.442695, %v3660_v23 }
0x1746   :  { %v4926_v13 = vpop.eup %4925  ;;  %v3692_v36 = vsel %vm2045_vm4, %v4924_v44, 0.0 }
0x1747   :  { %4927 = vpow2.f32 %v3675_v7  ;;  %v3686_v38 = vsel %vm2045_vm4, %v4926_v13, 0.0 }
0x1748   :  { %3693 = vadd.xlane.f32.xlu0 %v3692_v36  ;;  %3687 = vadd.xlane.f32.xlu2 %v3686_v38 }
0x174d   :  { %v4928_v59 = vpop.eup %4927  ;;  %v3764_v9 = vpop.permute.xlu0 %3763 }
0x174e   :  { %3776 = vmatpush.bf16.msrb.mxu0 %v3764_v9  ;;  %v3698_v21 = vsel %vm2045_vm4, %v4928_v59, 0.0 }
0x1750   :  { %3699 = vadd.xlane.f32.xlu2 %v3698_v21 }
0x1758   :  { %3801 = vrot.lane.b32.xlu1 %v6168_v6, %s4992_s18 }
0x175a   :  { %v3745_v42 = vpop.permute.xlu1 %3744 }
0x175b   :  { %3757 = vmatpush.bf16.msra.mxu1 %v3745_v42 }
0x175c   :  { %3839 = vrot.lane.b32.xlu0 %v6204_v16, %s4992_s18 }
0x1768   :  { %3820 = vrot.lane.b32.xlu2 %v6209_v27, %s4992_s18 }
0x1778   :  { %v3679_v32 = vpop.xlane.xlu0 %3678 }
0x1779   :  { %4929 = vrcp.f32 %v3679_v32 }
0x177f   :  { %v4930_v0 = vpop.eup %4929 }
0x1780   :  { %v3709_v24 = vmul.f32 %v4930_v0, %v4914_v14  ;;  %v3682_v10 = vpop.xlane.xlu0 %3681 }
0x1781   :  { %4931 = vrcp.f32 %v3682_v10 }
0x1782   :  { %v3717_v34 = vpack.c.bf16 %v3709_v24, %v3709_v24 }
0x1784   :  { %4558 = vmatmul.msk.bf16.vlgmr.msrb.gmra.mxu3 %vm2045_vm4, %v3717_v34  ;;  %v4789_v34 = vld [vmem:[%s6372_s7 + $0x12] ss:$0 sm:$0xff] }
0x1787   :  { %v4932_v33 = vpop.eup %4931 }
0x1788   :  { %v3710_v6 = vmul.f32 %v4932_v33, %v6230_v5 }
0x178a   :  { %v3718_v50 = vpack.c.bf16 %v3710_v6, %v3710_v6 }
0x178c   :  { %4559 = vmatmul.msk.bf16.vlgmr.msra.gmra.mxu1 %vm2045_vm4, %v3718_v50 }
0x17aa   :  { %v3685_v4 = vpop.xlane.xlu1 %3684 }
0x17ab   :  { %4933 = vrcp.f32 %v3685_v4 }
0x17b1   :  { %v4934_v16 = vpop.eup %4933 }
0x17b2   :  { %v3711_v41 = vmul.f32 %v4934_v16, %v4918_v53  ;;  %v3697_v28 = vpop.xlane.xlu1 %3696 }
0x17b3   :  { %v3691_v27 = vpop.xlane.xlu0 %3690 }
0x17b4   :  { %v3719_v1 = vpack.c.bf16 %v3711_v41, %v3711_v41 }
0x17b6   :  { %4560 = vmatmul.msk.bf16.vlgmr.msrb.gmra.mxu0 %vm2045_vm4, %v3719_v1 }
0x17bb   :  { %v3688_v8 = vpop.xlane.xlu2 %3687  ;;  %v3694_v52 = vpop.xlane.xlu0 %3693 }
0x17bc   :  { %4935 = vrcp.f32 %v3688_v8 }
0x17bd   :  { %4937 = vrcp.f32 %v3691_v27 }
0x17be   :  { %4939 = vrcp.f32 %v3694_v52 }
0x17bf   :  { %4941 = vrcp.f32 %v3697_v28 }
0x17c2   :  { %v4936_v17 = vpop.eup %4935 }
0x17c3   :  { %v3712_v56 = vmul.f32 %v4936_v17, %v4926_v13  ;;  %v3700_v20 = vpop.xlane.xlu2 %3699  ;;  %v4938_v35 = vpop.eup %4937 }
0x17c4   :  { %v4940_v63 = vpop.eup %4939  ;;  %v3713_v39 = vmul.f32 %v4938_v35, %v4922_v18  ;;  %4943 = vrcp.f32 %v3700_v20  ;;  %v3933_v18 = vsel %vm1372_vm11, %v3927_v62, 0 }
0x17c5   :  { %v3720_v49 = vpack.c.bf16 %v3712_v56, %v3712_v56  ;;  %v4942_v14 = vpop.eup %4941  ;;  %v3714_v37 = vmul.f32 %v4940_v63, %v4924_v44 }
0x17c6   :  { %v3721_v29 = vpack.c.bf16 %v3713_v39, %v3713_v39  ;;  %v3715_v61 = vmul.f32 %v4942_v14, %v6235_v12  ;;  %v3909_v12 = vsel %vm1372_vm11, %v3903_v48, 0 }
0x17c7   :  { %4561 = vmatmul.msk.bf16.vlgmr.msrb.gmra.mxu2 %vm2045_vm4, %v3720_v49  ;;  %v3722_v25 = vpack.c.bf16 %v3714_v37, %v3714_v37 }
0x17c8   :  { %v3723_v45 = vpack.c.bf16 %v3715_v61, %v3715_v61  ;;  %3966 = vmatpush.bf16.msrb.mxu2 %v3957_v11 }
0x17ca   :  { %v3802_v5 = vpop.permute.xlu1 %3801  ;;  %v4944_v30 = vpop.eup %4943 }
0x17cb   :  { %v3821_v47 = vpop.permute.xlu2 %3820  ;;  %3814 = vmatpush.bf16.msra.mxu3 %v3802_v5  ;;  %v3716_v15 = vmul.f32 %v4944_v30, %v4928_v59 }
0x17cc   :  { %3833 = vmatpush.bf16.msrb.mxu1 %v3821_v47 }
0x17cd   :  { %v3724_v53 = vpack.c.bf16 %v3716_v15, %v3716_v15 }
0x17ce   :  { %v3840_v2 = vpop.permute.xlu0 %3839  ;;  %4562 = vmatmul.msk.bf16.vlgmr.msra.gmra.mxu3 %vm2045_vm4, %v3721_v29 }
0x17cf   :  { %4563 = vmatmul.msk.bf16.vlgmr.msrb.gmra.mxu1 %vm2045_vm4, %v3722_v25  ;;  %3852 = vmatpush.bf16.msra.mxu0 %v3840_v2 }
0x17d0   :  { %3893 = vmatpush.bf16.msrb.mxu3 %v3884_v55  ;;  %3918 = vmatpush.bf16.msra.mxu1 %v3909_v12  ;;  %v4650_v55 = vld [vmem:[%s6371_s6 + $0xb0] sm:$0xff] }
0x17d2   :  { %4564 = vmatmul.msk.bf16.vlgmr.msra.gmra.mxu0 %vm2045_vm4, %v3723_v45  ;;  %v4651_v45 = vld [vmem:[%s6371_s6 + $0xb8] sm:$0xff] }
0x17d3   :  { %3942 = vmatpush.bf16.msrb.mxu0 %v3933_v18 }
0x17d4   :  { %4065 = vmatpush.bf16.msra.mxu3 %v4651_v45 }
0x17d7   :  { %4565 = vmatmul.msk.bf16.vlgmr.msra.gmra.mxu2 %vm2045_vm4, %v3724_v53 }
0x17d8   :  { %4066 = vmatpush.bf16.msra.mxu3 %v4650_v55 }
0x1807   :  { %v3740_v19 = vpop.f32.mrf.mxu3 }
0x1809   :  { %v3759_v57 = vpop.f32.mrf.mxu1 }
0x180a   :  { %v3879_v54 = vpack.c.bf16 %v3759_v57, %v3740_v19 }
0x180c   :  { %4566 = vmatmul.msk.bf16.vlgmr.msrb.gmra.mxu3 %vm1067_vm9, %v3879_v54 }
0x180f   :  { %v3742_v26 = vpop.f32.mrf.mxu3 }
0x1811   :  { %v3761_v58 = vpop.f32.mrf.mxu1 }
0x1833   :  { %v3778_v22 = vpop.f32.mrf.mxu0 }
0x183b   :  { %v3780_v60 = vpop.f32.mrf.mxu0 }
0x184a   :  { %v3797_v23 = vpop.f32.mrf.mxu2 }
0x184b   :  { %v3904_v44 = vpack.c.bf16 %v3797_v23, %v3778_v22 }
0x184c   :  { %v3835_v7 = vpop.f32.mrf.mxu1 }
0x184d   :  { %4567 = vmatmul.msk.bf16.vlgmr.msra.gmra.mxu1 %vm1067_vm9, %v3904_v44 }
0x184f   :  { %v3854_v13 = vpop.f32.mrf.mxu0 }
0x1851   :  { %v3816_v36 = vpop.f32.mrf.mxu3 }
0x1852   :  { %v3799_v38 = vpop.f32.mrf.mxu2  ;;  %v3928_v59 = vpack.c.bf16 %v3835_v7, %v3816_v36 }
0x1853   :  { %v4791_v38 = vld [vmem:[%s6372_s7 + $0x1a] ss:$0 sm:$0xff] }
0x1854   :  { %v3837_v9 = vpop.f32.mrf.mxu1  ;;  %4568 = vmatmul.msk.bf16.vlgmr.msrb.gmra.mxu0 %vm1067_vm9, %v3928_v59 }
0x1857   :  { %v3856_v21 = vpop.f32.mrf.mxu0 }
0x1859   :  { %v3818_v42 = vpop.f32.mrf.mxu3 }
0x185a   :  { %v3873_v32 = vpop.f32.mrf.mxu2 }
0x185b   :  { %v3952_v0 = vpack.c.bf16 %v3873_v32, %v3854_v13 }
0x185d   :  { %4569 = vmatmul.msk.bf16.vlgmr.msrb.gmra.mxu2 %vm1067_vm9, %v3952_v0 }
0x1862   :  { %v3875_v24 = vpop.f32.mrf.mxu2 }
0x1863   :  { %v4655_v24 = vld [vmem:[%s6371_s6 + $0xd8] sm:$0xff] }
0x1864   :  { %4107 = vmatpush.bf16.msrb.mxu1 %v4655_v24 }
0x188f   :  { %v3895_v10 = vpop.f32.mrf.mxu3 }
0x1890   :  { %v3901_v50 = vadd.f32 %v4789_v34, %v3895_v10  ;;  %v4654_v10 = vld [vmem:[%s6371_s6 + $0xd0] sm:$0xff] }
0x1891   :  { %4108 = vmatpush.bf16.msrb.mxu1 %v4654_v10 }
0x1897   :  { %v3897_v41 = vpop.f32.mrf.mxu3 }
0x1898   :  { %v3902_v52 = vadd.f32 %v4789_v34, %v3897_v41  ;;  %v4653_v34 = vld [vmem:[%s6371_s6 + $0xc8] sm:$0xff] }
0x1899   :  { %4109 = vmatpush.bf16.msrb.mxu1 %v4653_v34 }
0x18ca   :  { %v3920_v33 = vpop.f32.mrf.mxu1 }
0x18cb   :  { %v3925_v4 = vadd.f32 %v3920_v33, %v3901_v50  ;;  %v4652_v33 = vld [vmem:[%s6371_s6 + $0xc0] sm:$0xff]  ;;  %v4792_v50 = vld [vmem:[%s6372_s7 + $0x13] ss:$0 sm:$0xff] }
0x18cc   :  { %4110 = vmatpush.bf16.msrb.mxu1 %v4652_v33 }
0x18d1   :  { %v3944_v6 = vpop.f32.mrf.mxu0 }
0x18d2   :  { %v3949_v16 = vadd.f32 %v3944_v6, %v3925_v4  ;;  %v3922_v8 = vpop.f32.mrf.mxu1 }
0x18d3   :  { %v3926_v56 = vadd.f32 %v3922_v8, %v3902_v52  ;;  %v4657_v52 = vld [vmem:[%s6373_s8 + $0x8] sm:$0xff] }
0x18d4   :  { %4151 = vmatpush.bf16.msra.mxu0 %v4657_v52 }
0x18d9   :  { %v3946_v17 = vpop.f32.mrf.mxu0 }
0x18da   :  { %v3950_v35 = vadd.f32 %v3946_v17, %v3926_v56  ;;  %v4656_v17 = vld [vmem:[%s6373_s8] sm:$0xff] }
0x18db   :  { %4152 = vmatpush.bf16.msra.mxu0 %v4656_v17  ;;  %v4181_v56 = vld [vmem:[%s6370_s5] sm:$0xff] }
0x18dc   :  { %vm4197_vm5 = vcmp.ne.s32.totalorder %v4181_v56, 0 }
0x18e0   :  { %v3968_v27 = vpop.f32.mrf.mxu2 }
0x18e1   :  { %v3973_v1 = vadd.f32 %v3968_v27, %v3949_v16 }
0x18e3   :  { %v6283_v28 = vadd.f32 %v3973_v1, %v6111_v51 }
0x18e5   :  { %v3979_v20 = vsel %vm78_vm0, %v6283_v28, 0.0 }
0x18e6   :  { %3980 = vadd.xlane.f32.xlu2 %v3979_v20  ;;  %v4995_v20 = vmov 0  }
0x18e7   :  { %4758 = vset.pattern.permute.xlu1 %v4995_v20  ;;  %4759 = vset.pattern.permute.xlu0 %v4995_v20 }
0x18e8   :  { %v3970_v49 = vpop.f32.mrf.mxu2 }
0x18e9   :  { %v3974_v63 = vadd.f32 %v3970_v49, %v3950_v35 }
0x18eb   :  { %v6288_v39 = vadd.f32 %v3974_v63, %v6120_v46  ;;  %v4793_v63 = vld [vmem:[%s6372_s7 + $0x14] ss:$0 sm:$0xff] }
0x18ed   :  { %v3982_v14 = vsel %vm78_vm0, %v6288_v39, 0.0 }
0x18ee   :  { %3983 = vadd.xlane.f32.xlu0 %v3982_v14 }
0x1959   :  { %v3981_v37 = vpop.xlane.xlu2 %3980 }
0x195a   :  { %v3985_v51 = vmul.f32 %v3981_v37, %v5279_v40 }
0x195c   :  { %v3987_v5 = vsub.f32 %v6283_v28, %v3985_v51 }
0x195e   :  { %v3989_v47 = vmul.f32 %v3987_v5, %v3987_v5 }
0x1960   :  { %v3991_v29 = vsel %vm78_vm0, %v3989_v47, 0.0 }
0x1961   :  { %3992 = vadd.xlane.f32.xlu1 %v3991_v29  ;;  %v3984_v61 = vpop.xlane.xlu0 %3983  ;;  %v4794_v29 = vld [vmem:[%s6372_s7 + $0x2] ss:$0 sm:$0xff] }
0x1962   :  { %v3986_v25 = vmul.f32 %v3984_v61, %v5279_v40 }
0x1964   :  { %v3988_v30 = vsub.f32 %v6288_v39, %v3986_v25 }
0x1966   :  { %v3990_v46 = vmul.f32 %v3988_v30, %v3988_v30 }
0x1968   :  { %v3994_v2 = vsel %vm78_vm0, %v3990_v46, 0.0 }
0x1969   :  { %3995 = vadd.xlane.f32.xlu2 %v3994_v2 }
0x197a   :  { %4184 = vperm.xlu1 %4758, %v4181_v56  }
0x19d4   :  { %v3993_v15 = vpop.xlane.xlu1 %3992 }
0x19d5   :  { %v3997_v53 = vmul.f32 %v3993_v15, %v5279_v40 }
0x19d7   :  { %v3999_v31 = vadd.f32 1e-05, %v3997_v53 }
0x19d9   :  { %4945 = vrsqrt.f32 %v3999_v31  ;;  %vm4007_vm11 = vweird.f32 %v3999_v31 }
0x19dc   :  { %v3996_v19 = vpop.xlane.xlu2 %3995 }
0x19dd   :  { %v3998_v57 = vmul.f32 %v3996_v19, %v5279_v40  ;;  %v4790_v40 = vld [vmem:[%s6372_s7 + $0x19] ss:$0 sm:$0xff] }
0x19df   :  { %v4946_v54 = vpop.eup %4945  ;;  %v4000_v26 = vadd.f32 1e-05, %v3998_v57 }
0x19e0   :  { %v4002_v58 = vmul.f32 %v4946_v54, %v3999_v31  ;;  %vm4008_vm9 = vweird.f32 %v4946_v54 }
0x19e1   :  { %4947 = vrsqrt.f32 %v4000_v26  ;;  %vm4009_vm4 = vmor %vm4007_vm11, %vm4008_vm9  ;;  %vm4017_vm15 = vweird.f32 %v4000_v26 }
0x19e2   :  { %v4003_v48 = vmul.f32 %v4946_v54, %v4002_v58 }
0x19e4   :  { %v4004_v12 = vmul.f32 0.5, %v4003_v48  ;;  %v4996_v48 = vmov 0.0  }
0x19e6   :  { %v4005_v62 = vsub.f32 1.5, %v4004_v12 }
0x19e7   :  { %v4948_v18 = vpop.eup %4947 }
0x19e8   :  { %v4006_v22 = vmul.f32 %v4946_v54, %v4005_v62  ;;  %v4012_v43 = vmul.f32 %v4948_v18, %v4000_v26  ;;  %vm4018_vm14 = vweird.f32 %v4948_v18  ;;  %v4605_v62 = vsel %vm4197_vm5, 1.0, %v4996_v48 }
0x19e9   :  { %vm4019_vm2 = vmor %vm4017_vm15, %vm4018_vm14 }
0x19ea   :  { %v4013_v11 = vmul.f32 %v4948_v18, %v4012_v43  ;;  %v4010_v60 = vsel %vm4009_vm4, %v4946_v54, %v4006_v22  ;;  %v4217_v22 = vsel %vm4207_vm6, %v4605_v62, 0.0 }
0x19eb   :  { %v4021_v7 = vmul.f32 %v4010_v60, %v3987_v5 }
0x19ec   :  { %v4014_v23 = vmul.f32 0.5, %v4013_v11  ;;  %v4185_v54 = vpop.permute.xlu1 %4184 }
0x19ed   :  { %v4024_v59 = vmul.f32 %v4790_v40, %v4021_v7 }
0x19ee   :  { %v4015_v44 = vsub.f32 1.5, %v4014_v23 }
0x19ef   :  { %v4027_v42 = vadd.f32 %v4791_v38, %v4024_v59 }
0x19f0   :  { %v4016_v13 = vmul.f32 %v4948_v18, %v4015_v44 }
0x19f2   :  { %v4020_v36 = vsel %vm4019_vm2, %v4948_v18, %v4016_v13 }
0x19f3   :  { %v4022_v9 = vmul.f32 %v4020_v36, %v3988_v30 }
0x19f5   :  { %v4025_v21 = vmul.f32 %v4790_v40, %v4022_v9 }
0x19f7   :  { %v4028_v32 = vadd.f32 %v4791_v38, %v4025_v21 }
0x19f9   :  { %v4041_v0 = vpack.c.bf16 %v4028_v32, %v4027_v42 }
0x19fb   :  { %4578 = vmatmul.msk.bf16.vlgmr.msra.gmra.mxu3 %vm78_vm0, %v4041_v0 }
0x1a7e   :  { %v4068_v6 = vpop.f32.mrf.mxu3 }
0x1a7f   :  { %v4069_v4 = vadd.f32 %v4792_v50, %v4068_v6 }
0x1a81   :  { %v4073_v27 = vmax.f32 %v4069_v4, 0.0 }
0x1a86   :  { %v4070_v16 = vpop.f32.mrf.mxu3 }
0x1a87   :  { %v4071_v41 = vadd.f32 %v4792_v50, %v4070_v16 }
0x1a89   :  { %v4074_v1 = vmax.f32 %v4071_v41, 0.0 }
0x1a8b   :  { %v4075_v8 = vpack.c.bf16 %v4074_v1, %v4073_v27 }
0x1a8d   :  { %4595 = vmatmul.msk.bf16.vlgmr.msrb.gmra.mxu1 %vm238_vm1, %v4075_v8  ;;  %vm4189_vm1 = vcmp.eq.s32.totalorder %v5490_v3, %v4185_v54 }
0x1b0a   :  { %v4112_v35 = vpop.f32.mrf.mxu1 }
0x1b0b   :  { %v4117_v49 = vadd.f32 %v4112_v35, %v6283_v28 }
0x1b0d   :  { %v4121_v51 = vadd.f32 %v4793_v63, %v4117_v49 }
0x1b12   :  { %v4114_v14 = vpop.f32.mrf.mxu1 }
0x1b13   :  { %v4118_v37 = vadd.f32 %v4114_v14, %v6288_v39  ;;  %v4182_v39 = vld [vmem:[%s6370_s5 + $0x8] sm:$0xff]  ;;  %s4997_s5 = smov [#allocation2]  }
0x1b14   :  { %vm4198_vm3 = vcmp.ne.s32.totalorder %v4182_v39, 0  ;;  %s4251_s7 = sshll.u32 %s4997_s5, 4  ;;  %s4252_s7 = int_to_ptr.vmem [resolvable:$true] %s4251_s7 }
0x1b15   :  { %v4122_v5 = vadd.f32 %v4793_v63, %v4118_v37  ;;  %v4606_v12 = vsel %vm4198_vm3, 1.0, %v4996_v48 }
0x1b16   :  { %v4218_v18 = vsel %vm4207_vm6, %v4606_v12, 0.0 }
0x1b17   :  { %v4127_v47 = vpack.c.bf16 %v4122_v5, %v4121_v51  ;;  %v4219_v43 = vadd.f32 %v4218_v18, %v4217_v22 }
0x1b19   :  { %4604 = vmatmul.msk.bf16.vlgmr.msra.gmra.mxu0 %vm78_vm0, %v4127_v47  ;;  %v4220_v11 = vrot.slane %v4219_v43, 4 }
0x1b1b   :  { %v4221_v60 = vadd.f32 %v4220_v11, %v4219_v43 }
0x1b1d   :  { %v4222_v23 = vrot.slane %v4221_v60, 2 }
0x1b1f   :  { %v4223_v44 = vadd.f32 %v4222_v23, %v4221_v60 }
0x1b21   :  { %v4224_v40 = vrot.slane %v4223_v44, 1 }
0x1b96   :  { %v4154_v61 = vpop.f32.mrf.mxu0 }
0x1b97   :  { %v4155_v25 = vadd.f32 %v4794_v29, %v4154_v61 }
0x1b99   :  { %4159 = vst [vmem:[%s6374_s9] sm:$0xff] %v4155_v25  ;;  %4161 = vmax.xlane.f32.xlu0 %v4155_v25  ;;  %v4191_v58 = vsel %vm4189_vm1, %v4155_v25, 0.0 }
0x1b9e   :  { %v4156_v28 = vpop.f32.mrf.mxu0 }
0x1b9f   :  { %v4157_v30 = vadd.f32 %v4794_v29, %v4156_v28 }
0x1ba1   :  { %4160 = vst [vmem:[%s6374_s9 + $0x8] sm:$0xff] %v4157_v30  ;;  %4163 = vmax.xlane.f32.xlu2 %v4157_v30 }
0x1bad   :  { %4187 = vperm.xlu0 %4759, %v4182_v39  }
0x1c0c   :  { %v4162_v46 = vpop.xlane.xlu0 %4161 }
0x1c0d   :  { %v4165_v2 = vsub.f32 %v4155_v25, %v4162_v46 }
0x1c0f   :  { %v4167_v45 = vmul.f32 1.442695, %v4165_v2 }
0x1c11   :  { %4949 = vpow2.f32 %v4167_v45 }
0x1c14   :  { %v4164_v15 = vpop.xlane.xlu2 %4163 }
0x1c15   :  { %v4166_v53 = vsub.f32 %v4157_v30, %v4164_v15 }
0x1c17   :  { %v4950_v31 = vpop.eup %4949  ;;  %v4169_v55 = vmul.f32 1.442695, %v4166_v53 }
0x1c18   :  { %4171 = vadd.xlane.f32.xlu2 %v4950_v31 }
0x1c19   :  { %4951 = vpow2.f32 %v4169_v55 }
0x1c1f   :  { %v4952_v19 = vpop.eup %4951  ;;  %v4188_v57 = vpop.permute.xlu0 %4187 }
0x1c20   :  { %vm4190_vm0 = vcmp.eq.s32.totalorder %v5490_v3, %v4188_v57  ;;  %4173 = vadd.xlane.f32.xlu2 %v4952_v19  ;;  %v4225_v3 = vadd.f32 %v4224_v40, %v4223_v44 }
0x1c21   :  { %v4192_v26 = vsel %vm4190_vm0, %v4157_v30, 0.0 }
0x1c22   :  { %4195 = vadd.xlane.f32.xlu1 %v4192_v26  ;;  %v4226_v13 = vmax.f32 %v4225_v3, 1.0 }
0x1c24   :  { %vm4232_vm7 = vweird.f32 %v4226_v13  ;;  %v4238_v17 = vand.u32 2147483648, %v4226_v13  ;;  %v4236_v35 = vand.u32 2147483647, %v4226_v13 }
0x1c26   :  { %v4239_v63 = vor.u32 1.1754944e-38, %v4238_v17  ;;  %vm4237_vm12 = vcmp.eq.f32.partialorder %v4236_v35, 8.507059e+37 }
0x1c28   :  { %4193 = vadd.xlane.f32.xlu2 %v4191_v58 }
0x1c8b   :  { %v4172_v7 = vpop.xlane.xlu2 %4171 }
0x1c8c   :  { %4953 = vlog2.f32 %v4172_v7 }
0x1c8d   :  { %4955 = vrcp.f32 %v4226_v13 }
0x1c92   :  { %v4954_v36 = vpop.eup %4953 }
0x1c93   :  { %v4174_v38 = vpop.xlane.xlu2 %4173  ;;  %v4176_v59 = vmul.f32 0.6931472, %v4954_v36  ;;  %v4956_v9 = vpop.eup %4955 }
0x1c94   :  { %4957 = vlog2.f32 %v4174_v38  ;;  %v4228_v10 = vmul.f32 %v4956_v9, %v4226_v13  ;;  %vm4233_vm8 = vweird.f32 %v4956_v9 }
0x1c95   :  { %v4179_v42 = vadd.f32 %v4176_v59, %v4162_v46  ;;  %v4196_v33 = vpop.xlane.xlu1 %4195  ;;  %vm4234_vm10 = vmor %vm4232_vm7, %vm4233_vm8 }
0x1c96   :  { %v4229_v4 = vsub.f32 1.0, %v4228_v10 }
0x1c98   :  { %v4230_v8 = vmul.f32 %v4956_v9, %v4229_v4 }
0x1c9a   :  { %v4958_v21 = vpop.eup %4957  ;;  %v4231_v20 = vadd.f32 %v4956_v9, %v4230_v8 }
0x1c9b   :  { %v4178_v32 = vmul.f32 0.6931472, %v4958_v21  ;;  %v4194_v0 = vpop.xlane.xlu2 %4193 }
0x1c9c   :  { %v4203_v24 = vsub.f32 %v4179_v42, %v4194_v0  ;;  %v4235_v37 = vsel %vm4234_vm10, %v4956_v9, %v4231_v20 }
0x1c9d   :  { %v4180_v34 = vadd.f32 %v4178_v32, %v4164_v15  ;;  %v4240_v5 = vsel %vm4237_vm12, %v4239_v63, %v4235_v37 }
0x1c9e   :  { %v4205_v50 = vmul.f32 %v4605_v62, %v4203_v24 }
0x1c9f   :  { %v4204_v6 = vsub.f32 %v4180_v34, %v4196_v33 }
0x1ca0   :  { %v4208_v27 = vsel %vm4207_vm6, %v4205_v50, 0.0 }
0x1ca1   :  { %v4206_v16 = vmul.f32 %v4606_v12, %v4204_v6 }
0x1ca3   :  { %v4209_v41 = vsel %vm4207_vm6, %v4206_v16, 0.0 }
0x1ca4   :  { %v4210_v1 = vadd.f32 %v4209_v41, %v4208_v27 }
0x1ca6   :  { %v4211_v52 = vrot.slane %v4210_v1, 4 }
0x1ca8   :  { %v4212_v56 = vadd.f32 %v4211_v52, %v4210_v1 }
0x1caa   :  { %v4213_v49 = vrot.slane %v4212_v56, 2 }
0x1cac   :  { %v4214_v14 = vadd.f32 %v4213_v49, %v4212_v56 }
0x1cae   :  { %v4215_v51 = vrot.slane %v4214_v14, 1 }
0x1cb0   :  { %v4216_v47 = vadd.f32 %v4215_v51, %v4214_v14 }
0x1cb2   :  { %v4241_v29 = vmul.f32 %v4240_v5, %v4216_v47 }
0x1cb4   :  { %4243 = vst.msk [vmem:[#allocation2] sm:$0x1] %vm4242_vm13, %v4241_v29 }
0x1cb5   :  { %4256 = dma.vmem_to_hbm [thread:$0]  %s4252_s7, 16, %s4254_s19, [#allocation3]  }
0x1cb6   :  { %4986 = dma.done.wait [#allocation3], 16  }
0x1cb7   :  { %4987 = vsyncadd [#allocation3], 4294967280 }
0x1cb8   :  { %4263 = vsyncpa [#allocation3], 1 }

</bundles_post_ra>
